<compile_context>
chip_gen: v6e
topology: v6e:2x2x1
jax: 0.10.0
libtpu: 0.0.40
codegen_flags: <defaults>
</compile_context>

<pallas_src>
import functools

import jax
import jax.numpy as jnp
import numpy as np
from jax.experimental import pallas as pl
from jax.experimental.pallas import tpu as pltpu

# ----------------------------- configuration --------------------------------
IMG = 16            # image_size
PS = 4              # patch_size
CIN = 4             # input_channels
D = 32              # embed_dimension
DEPTH = 2           # number of transformer blocks
HEADS = 4           # no_attn_heads
DH = D // HEADS     # per-head dim
MLP = 4 * D         # MLP hidden dim (standard ViT ratio of 4)
NCLS = 8            # no_classes
NPATCH = (IMG // PS) ** 2
SEQ = NPATCH + 1
PDIM = CIN * PS * PS
B = 2


# ----------------------------- math helpers ---------------------------------
def _layernorm(x, w, b, eps=1e-6):
    mu = jnp.mean(x, axis=-1, keepdims=True)
    var = jnp.mean(jnp.square(x - mu), axis=-1, keepdims=True)
    return (x - mu) * jax.lax.rsqrt(var + eps) * w + b


def _softmax(s, *, use_pl_recip=False):
    m = jnp.max(s, axis=-1, keepdims=True)
    e = jnp.exp(s - m)
    den = jnp.sum(e, axis=-1, keepdims=True)
    if use_pl_recip:
        return e * pl.reciprocal(den, approx=True)   # EUP, frees VPU divide
    return e / den


def _gelu(x):
    # TODO(synk): torch nn.GELU default is exact (erf-based); tanh approximation
    # is used here for guaranteed Mosaic lowering (numerically very close).
    c = jnp.float32(np.sqrt(2.0 / np.pi))
    return 0.5 * x * (1.0 + jnp.tanh(c * (x + 0.044715 * x * x * x)))


def _mm(a, b):
    """2-D matmul, bf16 operands, f32 accumulation (MXU-native)."""
    return jnp.dot(a.astype(jnp.bfloat16), b.astype(jnp.bfloat16),
                   preferred_element_type=jnp.float32)


def _bdot(a, b, dims):
    """Batched dot_general (batch dim 0), bf16 operands, f32 accumulation."""
    return jax.lax.dot_general(a.astype(jnp.bfloat16), b.astype(jnp.bfloat16),
                               dims, preferred_element_type=jnp.float32)


def _im2col(x_nchw):
    bsz, c, hh, ww = x_nchw.shape
    nh, nw = hh // PS, ww // PS
    pt = x_nchw.reshape(bsz, c, nh, PS, nw, PS)
    return pt.transpose(0, 2, 4, 1, 3, 5).reshape(bsz, nh * nw, c * PS * PS)


# ----------------------------- fused Pallas kernel ---------------------------
def vit_kernel(patches_ref, patch_w_ref, clspos_ref, wcat_ref, w2_ref,
               vecs_ref, lnf_ref, headw_ref, headb_ref, out_ref,
               *, depth, heads, bsz):
    scale = float(DH) ** -0.5

    # --- patch embedding + class token + positional embedding ---------------
    # patches has a zero row at each sample's class-token slot; clspos already
    # contains (cls + pos) for row 0 and (pos + conv bias) for rows 1:.
    tok = _mm(patches_ref[...], patch_w_ref[...])                   # [B*S, D]
    x = tok + jnp.concatenate([clspos_ref[...]] * bsz, axis=0)      # [B*S, D]
    # position_drop / attn_drop / proj_drop have p=0.0 -> identity

    for l in range(depth):                       # depth is static -> unrolled
        wcat = wcat_ref[l]                       # [D, 8D] bf16: qkv | proj | fc1
        vec = vecs_ref[l]                        # [13D] f32 packed small params

        # ---- multi-head self-attention (pre-norm) ----
        xn = _layernorm(x, vec[0:D], vec[D:2 * D])
        qkv = _mm(xn, wcat[:, 0:3 * D]) + vec[2 * D:5 * D]          # [B*S, 3D]

        def heads_to_batch(off):                 # -> [H*B, S, DH]
            return jnp.stack(
                [qkv[b * SEQ:(b + 1) * SEQ, off + h * DH: off + (h + 1) * DH]
                 for h in range(heads) for b in range(bsz)], axis=0)

        qh = heads_to_batch(0)
        kh = heads_to_batch(D)
        vh = heads_to_batch(2 * D)
        s = _bdot(qh, kh, (((2,), (2,)), ((0,), (0,)))) * scale     # [H*B, S, S]
        pr = _softmax(s, use_pl_recip=True)
        ctx = _bdot(pr, vh, (((2,), (1,)), ((0,), (0,))))           # [H*B, S, DH]
        # re-assemble [B*S, D] with head h occupying columns h*DH:(h+1)*DH
        attn = jnp.concatenate(
            [jnp.concatenate([ctx[h * bsz + b] for h in range(heads)], axis=-1)
             for b in range(bsz)], axis=0)                          # [B*S, D]
        x = x + _mm(attn, wcat[:, 3 * D:4 * D]) + vec[5 * D:6 * D]

        # ---- MLP (pre-norm) ----
        xn = _layernorm(x, vec[6 * D:7 * D], vec[7 * D:8 * D])
        hid = _gelu(_mm(xn, wcat[:, 4 * D:8 * D]) + vec[8 * D:12 * D])   # [B*S, MLP]
        x = x + _mm(hid, w2_ref[l]) + vec[12 * D:13 * D]

    # ---- final norm + classification head on the class tokens ----
    xn = _layernorm(x, lnf_ref[0], lnf_ref[1])
    cls_tok = jnp.concatenate(
        [xn[b * SEQ: b * SEQ + 1, :] for b in range(bsz)], axis=0)  # [B, D]
    out_ref[...] = _mm(cls_tok, headw_ref[...]) + headb_ref[...]


# ----------------------------- wrapper ---------------------------------------
_VMEM = pl.BlockSpec(memory_space=pltpu.MemorySpace.VMEM)


def vit_forward(x_nchw, kp):
    bsz = x_nchw.shape[0]
    patches = _im2col(x_nchw)                                # [B, N, PDIM]
    # zero "patch" at the class-token position so the embedding matmul covers
    # the full sequence (its contribution there is 0; cls+pos come from clspos)
    patches = jnp.pad(patches, ((0, 0), (1, 0), (0, 0)))     # [B, S, PDIM]
    patches = patches.reshape(bsz * SEQ, PDIM)

    kernel = functools.partial(vit_kernel, depth=DEPTH, heads=HEADS, bsz=bsz)
    args = (patches, kp["patch_w"], kp["clspos"], kp["wcat"], kp["w2"],
            kp["vecs"], kp["lnf"], kp["headw"], kp["headb"])
    return pl.pallas_call(
        kernel,
        out_shape=jax.ShapeDtypeStruct((bsz, NCLS), jnp.float32),
        in_specs=[_VMEM] * len(args),
        out_specs=_VMEM,
    )(*args)
    # TODO(synk): at larger batch sizes add a grid over batch with
    # dimension_semantics=("parallel",) so v7x's second TensorCore is used.


# ----------------------------- parameters ------------------------------------
def init_params(key):
    ks = jax.random.split(key, 14)

    def rnd(k, shape, scale=0.05):
        return (scale * jax.random.normal(k, shape)).astype(jnp.float32)

    p = {}
    conv_w = rnd(ks[0], (D, CIN, PS, PS))            # torch Conv2d weight layout
    p["patch_w"] = conv_w.reshape(D, PDIM).T         # [PDIM, D]
    p["patch_b"] = rnd(ks[1], (D,))
    # class token / positional embedding: torch init is zeros; small random
    # values here so the cls/pos path is actually exercised by the test.
    p["cls"] = rnd(ks[2], (1, 1, D), 0.02)
    p["pos"] = rnd(ks[3], (1, SEQ, D), 0.02)

    qkv_w = rnd(ks[4], (DEPTH, 3 * D, D))            # torch Linear(D, 3D).weight
    p["qkv_w"] = jnp.transpose(qkv_w, (0, 2, 1))     # [L, D, 3D]
    p["qkv_b"] = rnd(ks[5], (DEPTH, 3 * D))
    proj_w = rnd(ks[6], (DEPTH, D, D))               # torch Linear(D, D).weight
    p["proj_w"] = jnp.transpose(proj_w, (0, 2, 1))   # [L, D, D]
    p["proj_b"] = rnd(ks[7], (DEPTH, D))
    fc1_w = rnd(ks[8], (DEPTH, MLP, D))              # torch Linear(D, 4D).weight
    p["w1"] = jnp.transpose(fc1_w, (0, 2, 1))        # [L, D, MLP]
    p["b1"] = rnd(ks[9], (DEPTH, MLP))
    fc2_w = rnd(ks[10], (DEPTH, D, MLP))             # torch Linear(4D, D).weight
    p["w2"] = jnp.transpose(fc2_w, (0, 2, 1))        # [L, MLP, D]
    p["b2"] = rnd(ks[11], (DEPTH, D))

    # LayerNorms use torch default init (weight=1, bias=0); eps=1e-6 as in spec
    p["ln1w"] = jnp.ones((DEPTH, D), jnp.float32)
    p["ln1b"] = jnp.zeros((DEPTH, D), jnp.float32)
    p["ln2w"] = jnp.ones((DEPTH, D), jnp.float32)
    p["ln2b"] = jnp.zeros((DEPTH, D), jnp.float32)
    p["lnfw"] = jnp.ones((D,), jnp.float32)
    p["lnfb"] = jnp.zeros((D,), jnp.float32)

    head_w = rnd(ks[12], (NCLS, D))                  # torch Linear(D, NCLS).weight
    p["headw"] = head_w.T                            # [D, NCLS]
    p["headb"] = rnd(ks[13], (NCLS,))
    return p


def pack_params(p):
    """One-time packing into the fused-kernel layout (few, wide DMAs; bf16 weights)."""
    bf = jnp.bfloat16
    kp = {}
    kp["patch_w"] = p["patch_w"].astype(bf)                               # [PDIM, D]
    prefix = jnp.concatenate(
        [p["cls"].reshape(1, D),
         jnp.broadcast_to(p["patch_b"].reshape(1, D), (NPATCH, D))], axis=0)
    kp["clspos"] = p["pos"].reshape(SEQ, D) + prefix                      # [S, D] f32
    kp["wcat"] = jnp.concatenate(
        [p["qkv_w"], p["proj_w"], p["w1"]], axis=-1).astype(bf)           # [L, D, 8D]
    kp["w2"] = p["w2"].astype(bf)                                         # [L, MLP, D]
    kp["vecs"] = jnp.concatenate(
        [p["ln1w"], p["ln1b"], p["qkv_b"], p["proj_b"],
         p["ln2w"], p["ln2b"], p["b1"], p["b2"]], axis=-1)                # [L, 13D] f32
    kp["lnf"] = jnp.stack([p["lnfw"], p["lnfb"]], axis=0)                 # [2, D]
    kp["headw"] = p["headw"].astype(bf)                                   # [D, NCLS]
    kp["headb"] = p["headb"].reshape(1, NCLS)                             # [1, NCLS]
    return kp


# ----------------------------- pure-JAX reference ----------------------------
def reference_forward(x_nchw, p):
    bsz = x_nchw.shape[0]
    patches = _im2col(x_nchw)                                     # [B, N, PDIM]
    tok = patches @ p["patch_w"] + p["patch_b"]
    cls = jnp.broadcast_to(p["cls"], (bsz, 1, D))
    x = jnp.concatenate([cls, tok], axis=1) + p["pos"]            # [B, S, D]
    for l in range(DEPTH):
        xn = _layernorm(x, p["ln1w"][l], p["ln1b"][l])
        qkv = xn @ p["qkv_w"][l] + p["qkv_b"][l]                  # [B, S, 3D]
        q, k, v = jnp.split(qkv, 3, axis=-1)
        q = q.reshape(bsz, SEQ, HEADS, DH)
        k = k.reshape(bsz, SEQ, HEADS, DH)
        v = v.reshape(bsz, SEQ, HEADS, DH)
        s = jnp.einsum("bqhd,bkhd->bhqk", q, k) * (DH ** -0.5)
        a = _softmax(s)
        ctx = jnp.einsum("bhqk,bkhd->bqhd", a, v).reshape(bsz, SEQ, D)
        x = x + ctx @ p["proj_w"][l] + p["proj_b"][l]
        xn = _layernorm(x, p["ln2w"][l], p["ln2b"][l])
        x = x + _gelu(xn @ p["w1"][l] + p["b1"][l]) @ p["w2"][l] + p["b2"][l]
    xn = _layernorm(x, p["lnfw"], p["lnfb"])
    return xn[:, 0] @ p["headw"] + p["headb"]


# ----------------------------- main -------------------------------------------
if __name__ == "__main__":
    key = jax.random.PRNGKey(0)
    kx, kprm = jax.random.split(key)
    x = jax.random.normal(kx, (B, CIN, IMG, IMG), dtype=jnp.float32)
    params = init_params(kprm)
    packed = pack_params(params)

    out = jax.block_until_ready(jax.jit(vit_forward)(x, packed))
    ref = reference_forward(x, params)
    # tolerance covers bf16 matmul operands + approx softmax reciprocal
    np.testing.assert_allclose(np.asarray(out), np.asarray(ref),
                               rtol=5e-2, atol=2e-2)
    print("KERNEL_OK")
</pallas_src>

<mosaic_0001>
module attributes {stable_mosaic.version = 11 : i64} {
  func.func @vit_kernel(%arg0: memref<34x64xf32, #tpu.memory_space<vmem>>, %arg1: memref<64x32xbf16, #tpu.memory_space<vmem>>, %arg2: memref<17x32xf32, #tpu.memory_space<vmem>>, %arg3: memref<2x32x256xbf16, #tpu.memory_space<vmem>>, %arg4: memref<2x128x32xbf16, #tpu.memory_space<vmem>>, %arg5: memref<2x416xf32, #tpu.memory_space<vmem>>, %arg6: memref<2x32xf32, #tpu.memory_space<vmem>>, %arg7: memref<32x8xbf16, #tpu.memory_space<vmem>>, %arg8: memref<1x8xf32, #tpu.memory_space<vmem>>, %arg9: memref<2x8xf32, #tpu.memory_space<vmem>>) attributes {dimension_semantics = [], scalar_prefetch = 0 : i64, scratch_operands = 0 : i64, tpu.core_type = #tpu.core_type<tc>} {
    %c0 = arith.constant 0 : index
    %c0_0 = arith.constant 0 : index
    %0 = vector.load %arg0[%c0, %c0_0] : memref<34x64xf32, #tpu.memory_space<vmem>>, vector<34x64xf32>
    %c0_1 = arith.constant 0 : index
    %c0_2 = arith.constant 0 : index
    %1 = vector.load %arg1[%c0_1, %c0_2] : memref<64x32xbf16, #tpu.memory_space<vmem>>, vector<64x32xbf16>
    %2 = arith.truncf %0 : vector<34x64xf32> to vector<34x64xbf16>
    %cst = arith.constant dense<0.000000e+00> : vector<34x32xf32>
    %3 = tpu.matmul %2, %1, %cst {dimension_numbers = #tpu.dot_dimension_numbers<[1], [0], [0], [1], [0, 0, 1, 1], [], []>} : vector<34x64xbf16>, vector<64x32xbf16>, vector<34x32xf32> -> vector<34x32xf32>
    %c0_3 = arith.constant 0 : index
    %c0_4 = arith.constant 0 : index
    %4 = vector.load %arg2[%c0_3, %c0_4] : memref<17x32xf32, #tpu.memory_space<vmem>>, vector<17x32xf32>
    %5 = tpu.concatenate %4, %4 in 0 : vector<17x32xf32>, vector<17x32xf32> -> vector<34x32xf32>
    %6 = arith.addf %3, %5 : vector<34x32xf32>
    %c0_5 = arith.constant 0 : index
    %c0_6 = arith.constant 0 : index
    %c0_7 = arith.constant 0 : index
    %7 = vector.load %arg3[%c0_5, %c0_6, %c0_7] : memref<2x32x256xbf16, #tpu.memory_space<vmem>>, vector<1x32x256xbf16>
    %8 = vector.shape_cast %7 : vector<1x32x256xbf16> to vector<32x256xbf16>
    %c0_8 = arith.constant 0 : index
    %c0_9 = arith.constant 0 : index
    %9 = vector.load %arg5[%c0_8, %c0_9] : memref<2x416xf32, #tpu.memory_space<vmem>>, vector<1x416xf32>
    %10 = vector.shape_cast %9 : vector<1x416xf32> to vector<416xf32>
    %11 = vector.extract_strided_slice %10 {offsets = [0], sizes = [32], strides = [1]} : vector<416xf32> to vector<32xf32>
    %12 = vector.extract_strided_slice %10 {offsets = [32], sizes = [32], strides = [1]} : vector<416xf32> to vector<32xf32>
    %cst_10 = arith.constant dense<0.000000e+00> : vector<34xf32>
    %13 = vector.multi_reduction <add>, %6, %cst_10 [1] : vector<34x32xf32> to vector<34xf32>
    %14 = vector.shape_cast %13 : vector<34xf32> to vector<34x1xf32>
    %cst_11 = arith.constant 3.200000e+01 : f32
    %15 = vector.broadcast %cst_11 : f32 to vector<34x1xf32>
    %16 = arith.divf %14, %15 : vector<34x1xf32>
    %17 = vector.broadcast %16 : vector<34x1xf32> to vector<34x32xf32>
    %18 = arith.subf %6, %17 : vector<34x32xf32>
    %19 = arith.mulf %18, %18 : vector<34x32xf32>
    %cst_12 = arith.constant dense<0.000000e+00> : vector<34xf32>
    %20 = vector.multi_reduction <add>, %19, %cst_12 [1] : vector<34x32xf32> to vector<34xf32>
    %21 = vector.shape_cast %20 : vector<34xf32> to vector<34x1xf32>
    %cst_13 = arith.constant 3.200000e+01 : f32
    %22 = vector.broadcast %cst_13 : f32 to vector<34x1xf32>
    %23 = arith.divf %21, %22 : vector<34x1xf32>
    %24 = vector.broadcast %16 : vector<34x1xf32> to vector<34x32xf32>
    %25 = arith.subf %6, %24 : vector<34x32xf32>
    %cst_14 = arith.constant 9.99999997E-7 : f32
    %26 = vector.broadcast %cst_14 : f32 to vector<34x1xf32>
    %27 = arith.addf %23, %26 : vector<34x1xf32>
    %28 = math.rsqrt %27 : vector<34x1xf32>
    %29 = vector.broadcast %28 : vector<34x1xf32> to vector<34x32xf32>
    %30 = arith.mulf %25, %29 : vector<34x32xf32>
    %31 = vector.shape_cast %11 : vector<32xf32> to vector<1x32xf32>
    %32 = vector.broadcast %31 : vector<1x32xf32> to vector<34x32xf32>
    %33 = arith.mulf %30, %32 : vector<34x32xf32>
    %34 = vector.shape_cast %12 : vector<32xf32> to vector<1x32xf32>
    %35 = vector.broadcast %34 : vector<1x32xf32> to vector<34x32xf32>
    %36 = arith.addf %33, %35 : vector<34x32xf32>
    %37 = vector.extract_strided_slice %8 {offsets = [0, 0], sizes = [32, 96], strides = [1, 1]} : vector<32x256xbf16> to vector<32x96xbf16>
    %38 = arith.truncf %36 : vector<34x32xf32> to vector<34x32xbf16>
    %cst_15 = arith.constant dense<0.000000e+00> : vector<34x96xf32>
    %39 = tpu.matmul %38, %37, %cst_15 {dimension_numbers = #tpu.dot_dimension_numbers<[1], [0], [0], [1], [0, 0, 1, 1], [], []>} : vector<34x32xbf16>, vector<32x96xbf16>, vector<34x96xf32> -> vector<34x96xf32>
    %40 = vector.extract_strided_slice %10 {offsets = [64], sizes = [96], strides = [1]} : vector<416xf32> to vector<96xf32>
    %41 = vector.shape_cast %40 : vector<96xf32> to vector<1x96xf32>
    %42 = vector.broadcast %41 : vector<1x96xf32> to vector<34x96xf32>
    %43 = arith.addf %39, %42 : vector<34x96xf32>
    %44 = vector.extract_strided_slice %43 {offsets = [0, 0], sizes = [17, 8], strides = [1, 1]} : vector<34x96xf32> to vector<17x8xf32>
    %45 = vector.extract_strided_slice %43 {offsets = [17, 0], sizes = [17, 8], strides = [1, 1]} : vector<34x96xf32> to vector<17x8xf32>
    %46 = vector.extract_strided_slice %43 {offsets = [0, 8], sizes = [17, 8], strides = [1, 1]} : vector<34x96xf32> to vector<17x8xf32>
    %47 = vector.extract_strided_slice %43 {offsets = [17, 8], sizes = [17, 8], strides = [1, 1]} : vector<34x96xf32> to vector<17x8xf32>
    %48 = vector.extract_strided_slice %43 {offsets = [0, 16], sizes = [17, 8], strides = [1, 1]} : vector<34x96xf32> to vector<17x8xf32>
    %49 = vector.extract_strided_slice %43 {offsets = [17, 16], sizes = [17, 8], strides = [1, 1]} : vector<34x96xf32> to vector<17x8xf32>
    %50 = vector.extract_strided_slice %43 {offsets = [0, 24], sizes = [17, 8], strides = [1, 1]} : vector<34x96xf32> to vector<17x8xf32>
    %51 = vector.extract_strided_slice %43 {offsets = [17, 24], sizes = [17, 8], strides = [1, 1]} : vector<34x96xf32> to vector<17x8xf32>
    %52 = vector.shape_cast %44 : vector<17x8xf32> to vector<1x17x8xf32>
    %53 = vector.shape_cast %45 : vector<17x8xf32> to vector<1x17x8xf32>
    %54 = vector.shape_cast %46 : vector<17x8xf32> to vector<1x17x8xf32>
    %55 = vector.shape_cast %47 : vector<17x8xf32> to vector<1x17x8xf32>
    %56 = vector.shape_cast %48 : vector<17x8xf32> to vector<1x17x8xf32>
    %57 = vector.shape_cast %49 : vector<17x8xf32> to vector<1x17x8xf32>
    %58 = vector.shape_cast %50 : vector<17x8xf32> to vector<1x17x8xf32>
    %59 = vector.shape_cast %51 : vector<17x8xf32> to vector<1x17x8xf32>
    %60 = tpu.concatenate %52, %53, %54, %55, %56, %57, %58, %59 in 0 : vector<1x17x8xf32>, vector<1x17x8xf32>, vector<1x17x8xf32>, vector<1x17x8xf32>, vector<1x17x8xf32>, vector<1x17x8xf32>, vector<1x17x8xf32>, vector<1x17x8xf32> -> vector<8x17x8xf32>
    %61 = vector.extract_strided_slice %43 {offsets = [0, 32], sizes = [17, 8], strides = [1, 1]} : vector<34x96xf32> to vector<17x8xf32>
    %62 = vector.extract_strided_slice %43 {offsets = [17, 32], sizes = [17, 8], strides = [1, 1]} : vector<34x96xf32> to vector<17x8xf32>
    %63 = vector.extract_strided_slice %43 {offsets = [0, 40], sizes = [17, 8], strides = [1, 1]} : vector<34x96xf32> to vector<17x8xf32>
    %64 = vector.extract_strided_slice %43 {offsets = [17, 40], sizes = [17, 8], strides = [1, 1]} : vector<34x96xf32> to vector<17x8xf32>
    %65 = vector.extract_strided_slice %43 {offsets = [0, 48], sizes = [17, 8], strides = [1, 1]} : vector<34x96xf32> to vector<17x8xf32>
    %66 = vector.extract_strided_slice %43 {offsets = [17, 48], sizes = [17, 8], strides = [1, 1]} : vector<34x96xf32> to vector<17x8xf32>
    %67 = vector.extract_strided_slice %43 {offsets = [0, 56], sizes = [17, 8], strides = [1, 1]} : vector<34x96xf32> to vector<17x8xf32>
    %68 = vector.extract_strided_slice %43 {offsets = [17, 56], sizes = [17, 8], strides = [1, 1]} : vector<34x96xf32> to vector<17x8xf32>
    %69 = vector.shape_cast %61 : vector<17x8xf32> to vector<1x17x8xf32>
    %70 = vector.shape_cast %62 : vector<17x8xf32> to vector<1x17x8xf32>
    %71 = vector.shape_cast %63 : vector<17x8xf32> to vector<1x17x8xf32>
    %72 = vector.shape_cast %64 : vector<17x8xf32> to vector<1x17x8xf32>
    %73 = vector.shape_cast %65 : vector<17x8xf32> to vector<1x17x8xf32>
    %74 = vector.shape_cast %66 : vector<17x8xf32> to vector<1x17x8xf32>
    %75 = vector.shape_cast %67 : vector<17x8xf32> to vector<1x17x8xf32>
    %76 = vector.shape_cast %68 : vector<17x8xf32> to vector<1x17x8xf32>
    %77 = tpu.concatenate %69, %70, %71, %72, %73, %74, %75, %76 in 0 : vector<1x17x8xf32>, vector<1x17x8xf32>, vector<1x17x8xf32>, vector<1x17x8xf32>, vector<1x17x8xf32>, vector<1x17x8xf32>, vector<1x17x8xf32>, vector<1x17x8xf32> -> vector<8x17x8xf32>
    %78 = vector.extract_strided_slice %43 {offsets = [0, 64], sizes = [17, 8], strides = [1, 1]} : vector<34x96xf32> to vector<17x8xf32>
    %79 = vector.extract_strided_slice %43 {offsets = [17, 64], sizes = [17, 8], strides = [1, 1]} : vector<34x96xf32> to vector<17x8xf32>
    %80 = vector.extract_strided_slice %43 {offsets = [0, 72], sizes = [17, 8], strides = [1, 1]} : vector<34x96xf32> to vector<17x8xf32>
    %81 = vector.extract_strided_slice %43 {offsets = [17, 72], sizes = [17, 8], strides = [1, 1]} : vector<34x96xf32> to vector<17x8xf32>
    %82 = vector.extract_strided_slice %43 {offsets = [0, 80], sizes = [17, 8], strides = [1, 1]} : vector<34x96xf32> to vector<17x8xf32>
    %83 = vector.extract_strided_slice %43 {offsets = [17, 80], sizes = [17, 8], strides = [1, 1]} : vector<34x96xf32> to vector<17x8xf32>
    %84 = vector.extract_strided_slice %43 {offsets = [0, 88], sizes = [17, 8], strides = [1, 1]} : vector<34x96xf32> to vector<17x8xf32>
    %85 = vector.extract_strided_slice %43 {offsets = [17, 88], sizes = [17, 8], strides = [1, 1]} : vector<34x96xf32> to vector<17x8xf32>
    %86 = vector.shape_cast %78 : vector<17x8xf32> to vector<1x17x8xf32>
    %87 = vector.shape_cast %79 : vector<17x8xf32> to vector<1x17x8xf32>
    %88 = vector.shape_cast %80 : vector<17x8xf32> to vector<1x17x8xf32>
    %89 = vector.shape_cast %81 : vector<17x8xf32> to vector<1x17x8xf32>
    %90 = vector.shape_cast %82 : vector<17x8xf32> to vector<1x17x8xf32>
    %91 = vector.shape_cast %83 : vector<17x8xf32> to vector<1x17x8xf32>
    %92 = vector.shape_cast %84 : vector<17x8xf32> to vector<1x17x8xf32>
    %93 = vector.shape_cast %85 : vector<17x8xf32> to vector<1x17x8xf32>
    %94 = tpu.concatenate %86, %87, %88, %89, %90, %91, %92, %93 in 0 : vector<1x17x8xf32>, vector<1x17x8xf32>, vector<1x17x8xf32>, vector<1x17x8xf32>, vector<1x17x8xf32>, vector<1x17x8xf32>, vector<1x17x8xf32>, vector<1x17x8xf32> -> vector<8x17x8xf32>
    %95 = arith.truncf %60 : vector<8x17x8xf32> to vector<8x17x8xbf16>
    %96 = arith.truncf %77 : vector<8x17x8xf32> to vector<8x17x8xbf16>
    %cst_16 = arith.constant dense<0.000000e+00> : vector<8x17x17xf32>
    %97 = tpu.matmul %95, %96, %cst_16 {dimension_numbers = #tpu.dot_dimension_numbers<[2], [2], [1], [1], [0, 0, 0, 1, 1, 1], [0], [0]>} : vector<8x17x8xbf16>, vector<8x17x8xbf16>, vector<8x17x17xf32> -> vector<8x17x17xf32>
    %cst_17 = arith.constant 0.353553385 : f32
    %98 = vector.broadcast %cst_17 : f32 to vector<8x17x17xf32>
    %99 = arith.mulf %97, %98 : vector<8x17x17xf32>
    %cst_18 = arith.constant dense<0xFF800000> : vector<8x17xf32>
    %100 = vector.multi_reduction <maximumf>, %99, %cst_18 [2] : vector<8x17x17xf32> to vector<8x17xf32>
    %101 = vector.shape_cast %100 : vector<8x17xf32> to vector<8x17x1xf32>
    %102 = vector.broadcast %101 : vector<8x17x1xf32> to vector<8x17x17xf32>
    %103 = arith.subf %99, %102 : vector<8x17x17xf32>
    %104 = math.exp %103 : vector<8x17x17xf32>
    %cst_19 = arith.constant dense<0.000000e+00> : vector<8x17xf32>
    %105 = vector.multi_reduction <add>, %104, %cst_19 [2] : vector<8x17x17xf32> to vector<8x17xf32>
    %106 = vector.shape_cast %105 : vector<8x17xf32> to vector<8x17x1xf32>
    %107 = tpu.reciprocal %106 {approx = true} : vector<8x17x1xf32> -> vector<8x17x1xf32>
    %108 = vector.broadcast %107 : vector<8x17x1xf32> to vector<8x17x17xf32>
    %109 = arith.mulf %104, %108 : vector<8x17x17xf32>
    %110 = arith.truncf %109 : vector<8x17x17xf32> to vector<8x17x17xbf16>
    %111 = arith.truncf %94 : vector<8x17x8xf32> to vector<8x17x8xbf16>
    %cst_20 = arith.constant dense<0.000000e+00> : vector<8x17x8xf32>
    %112 = tpu.matmul %110, %111, %cst_20 {dimension_numbers = #tpu.dot_dimension_numbers<[2], [1], [1], [2], [0, 0, 0, 1, 1, 2], [0], [0]>} : vector<8x17x17xbf16>, vector<8x17x8xbf16>, vector<8x17x8xf32> -> vector<8x17x8xf32>
    %113 = vector.extract_strided_slice %112 {offsets = [0, 0, 0], sizes = [1, 17, 8], strides = [1, 1, 1]} : vector<8x17x8xf32> to vector<1x17x8xf32>
    %114 = vector.shape_cast %113 : vector<1x17x8xf32> to vector<17x8xf32>
    %115 = vector.extract_strided_slice %112 {offsets = [2, 0, 0], sizes = [1, 17, 8], strides = [1, 1, 1]} : vector<8x17x8xf32> to vector<1x17x8xf32>
    %116 = vector.shape_cast %115 : vector<1x17x8xf32> to vector<17x8xf32>
    %117 = vector.extract_strided_slice %112 {offsets = [4, 0, 0], sizes = [1, 17, 8], strides = [1, 1, 1]} : vector<8x17x8xf32> to vector<1x17x8xf32>
    %118 = vector.shape_cast %117 : vector<1x17x8xf32> to vector<17x8xf32>
    %119 = vector.extract_strided_slice %112 {offsets = [6, 0, 0], sizes = [1, 17, 8], strides = [1, 1, 1]} : vector<8x17x8xf32> to vector<1x17x8xf32>
    %120 = vector.shape_cast %119 : vector<1x17x8xf32> to vector<17x8xf32>
    %121 = tpu.concatenate %114, %116, %118, %120 in 1 : vector<17x8xf32>, vector<17x8xf32>, vector<17x8xf32>, vector<17x8xf32> -> vector<17x32xf32>
    %122 = vector.extract_strided_slice %112 {offsets = [1, 0, 0], sizes = [1, 17, 8], strides = [1, 1, 1]} : vector<8x17x8xf32> to vector<1x17x8xf32>
    %123 = vector.shape_cast %122 : vector<1x17x8xf32> to vector<17x8xf32>
    %124 = vector.extract_strided_slice %112 {offsets = [3, 0, 0], sizes = [1, 17, 8], strides = [1, 1, 1]} : vector<8x17x8xf32> to vector<1x17x8xf32>
    %125 = vector.shape_cast %124 : vector<1x17x8xf32> to vector<17x8xf32>
    %126 = vector.extract_strided_slice %112 {offsets = [5, 0, 0], sizes = [1, 17, 8], strides = [1, 1, 1]} : vector<8x17x8xf32> to vector<1x17x8xf32>
    %127 = vector.shape_cast %126 : vector<1x17x8xf32> to vector<17x8xf32>
    %128 = vector.extract_strided_slice %112 {offsets = [7, 0, 0], sizes = [1, 17, 8], strides = [1, 1, 1]} : vector<8x17x8xf32> to vector<1x17x8xf32>
    %129 = vector.shape_cast %128 : vector<1x17x8xf32> to vector<17x8xf32>
    %130 = tpu.concatenate %123, %125, %127, %129 in 1 : vector<17x8xf32>, vector<17x8xf32>, vector<17x8xf32>, vector<17x8xf32> -> vector<17x32xf32>
    %131 = tpu.concatenate %121, %130 in 0 : vector<17x32xf32>, vector<17x32xf32> -> vector<34x32xf32>
    %132 = vector.extract_strided_slice %8 {offsets = [0, 96], sizes = [32, 32], strides = [1, 1]} : vector<32x256xbf16> to vector<32x32xbf16>
    %133 = arith.truncf %131 : vector<34x32xf32> to vector<34x32xbf16>
    %cst_21 = arith.constant dense<0.000000e+00> : vector<34x32xf32>
    %134 = tpu.matmul %133, %132, %cst_21 {dimension_numbers = #tpu.dot_dimension_numbers<[1], [0], [0], [1], [0, 0, 1, 1], [], []>} : vector<34x32xbf16>, vector<32x32xbf16>, vector<34x32xf32> -> vector<34x32xf32>
    %135 = arith.addf %6, %134 : vector<34x32xf32>
    %136 = vector.extract_strided_slice %10 {offsets = [160], sizes = [32], strides = [1]} : vector<416xf32> to vector<32xf32>
    %137 = vector.shape_cast %136 : vector<32xf32> to vector<1x32xf32>
    %138 = vector.broadcast %137 : vector<1x32xf32> to vector<34x32xf32>
    %139 = arith.addf %135, %138 : vector<34x32xf32>
    %140 = vector.extract_strided_slice %10 {offsets = [192], sizes = [32], strides = [1]} : vector<416xf32> to vector<32xf32>
    %141 = vector.extract_strided_slice %10 {offsets = [224], sizes = [32], strides = [1]} : vector<416xf32> to vector<32xf32>
    %cst_22 = arith.constant dense<0.000000e+00> : vector<34xf32>
    %142 = vector.multi_reduction <add>, %139, %cst_22 [1] : vector<34x32xf32> to vector<34xf32>
    %143 = vector.shape_cast %142 : vector<34xf32> to vector<34x1xf32>
    %cst_23 = arith.constant 3.200000e+01 : f32
    %144 = vector.broadcast %cst_23 : f32 to vector<34x1xf32>
    %145 = arith.divf %143, %144 : vector<34x1xf32>
    %146 = vector.broadcast %145 : vector<34x1xf32> to vector<34x32xf32>
    %147 = arith.subf %139, %146 : vector<34x32xf32>
    %148 = arith.mulf %147, %147 : vector<34x32xf32>
    %cst_24 = arith.constant dense<0.000000e+00> : vector<34xf32>
    %149 = vector.multi_reduction <add>, %148, %cst_24 [1] : vector<34x32xf32> to vector<34xf32>
    %150 = vector.shape_cast %149 : vector<34xf32> to vector<34x1xf32>
    %cst_25 = arith.constant 3.200000e+01 : f32
    %151 = vector.broadcast %cst_25 : f32 to vector<34x1xf32>
    %152 = arith.divf %150, %151 : vector<34x1xf32>
    %153 = vector.broadcast %145 : vector<34x1xf32> to vector<34x32xf32>
    %154 = arith.subf %139, %153 : vector<34x32xf32>
    %cst_26 = arith.constant 9.99999997E-7 : f32
    %155 = vector.broadcast %cst_26 : f32 to vector<34x1xf32>
    %156 = arith.addf %152, %155 : vector<34x1xf32>
    %157 = math.rsqrt %156 : vector<34x1xf32>
    %158 = vector.broadcast %157 : vector<34x1xf32> to vector<34x32xf32>
    %159 = arith.mulf %154, %158 : vector<34x32xf32>
    %160 = vector.shape_cast %140 : vector<32xf32> to vector<1x32xf32>
    %161 = vector.broadcast %160 : vector<1x32xf32> to vector<34x32xf32>
    %162 = arith.mulf %159, %161 : vector<34x32xf32>
    %163 = vector.shape_cast %141 : vector<32xf32> to vector<1x32xf32>
    %164 = vector.broadcast %163 : vector<1x32xf32> to vector<34x32xf32>
    %165 = arith.addf %162, %164 : vector<34x32xf32>
    %166 = vector.extract_strided_slice %8 {offsets = [0, 128], sizes = [32, 128], strides = [1, 1]} : vector<32x256xbf16> to vector<32x128xbf16>
    %167 = arith.truncf %165 : vector<34x32xf32> to vector<34x32xbf16>
    %cst_27 = arith.constant dense<0.000000e+00> : vector<34x128xf32>
    %168 = tpu.matmul %167, %166, %cst_27 {dimension_numbers = #tpu.dot_dimension_numbers<[1], [0], [0], [1], [0, 0, 1, 1], [], []>} : vector<34x32xbf16>, vector<32x128xbf16>, vector<34x128xf32> -> vector<34x128xf32>
    %169 = vector.extract_strided_slice %10 {offsets = [256], sizes = [128], strides = [1]} : vector<416xf32> to vector<128xf32>
    %170 = vector.shape_cast %169 : vector<128xf32> to vector<1x128xf32>
    %171 = vector.broadcast %170 : vector<1x128xf32> to vector<34x128xf32>
    %172 = arith.addf %168, %171 : vector<34x128xf32>
    %cst_28 = arith.constant 5.000000e-01 : f32
    %173 = vector.broadcast %cst_28 : f32 to vector<34x128xf32>
    %174 = arith.mulf %173, %172 : vector<34x128xf32>
    %cst_29 = arith.constant 4.471500e-02 : f32
    %175 = vector.broadcast %cst_29 : f32 to vector<34x128xf32>
    %176 = arith.mulf %175, %172 : vector<34x128xf32>
    %177 = arith.mulf %176, %172 : vector<34x128xf32>
    %178 = arith.mulf %177, %172 : vector<34x128xf32>
    %179 = arith.addf %172, %178 : vector<34x128xf32>
    %cst_30 = arith.constant 0.797884583 : f32
    %180 = vector.broadcast %cst_30 : f32 to vector<34x128xf32>
    %181 = arith.mulf %180, %179 : vector<34x128xf32>
    %182 = math.tanh %181 : vector<34x128xf32>
    %cst_31 = arith.constant 1.000000e+00 : f32
    %183 = vector.broadcast %cst_31 : f32 to vector<34x128xf32>
    %184 = arith.addf %183, %182 : vector<34x128xf32>
    %185 = arith.mulf %174, %184 : vector<34x128xf32>
    %c0_32 = arith.constant 0 : index
    %c0_33 = arith.constant 0 : index
    %c0_34 = arith.constant 0 : index
    %186 = vector.load %arg4[%c0_32, %c0_33, %c0_34] : memref<2x128x32xbf16, #tpu.memory_space<vmem>>, vector<1x128x32xbf16>
    %187 = vector.shape_cast %186 : vector<1x128x32xbf16> to vector<128x32xbf16>
    %188 = arith.truncf %185 : vector<34x128xf32> to vector<34x128xbf16>
    %cst_35 = arith.constant dense<0.000000e+00> : vector<34x32xf32>
    %189 = tpu.matmul %188, %187, %cst_35 {dimension_numbers = #tpu.dot_dimension_numbers<[1], [0], [0], [1], [0, 0, 1, 1], [], []>} : vector<34x128xbf16>, vector<128x32xbf16>, vector<34x32xf32> -> vector<34x32xf32>
    %190 = arith.addf %139, %189 : vector<34x32xf32>
    %191 = vector.extract_strided_slice %10 {offsets = [384], sizes = [32], strides = [1]} : vector<416xf32> to vector<32xf32>
    %192 = vector.shape_cast %191 : vector<32xf32> to vector<1x32xf32>
    %193 = vector.broadcast %192 : vector<1x32xf32> to vector<34x32xf32>
    %194 = arith.addf %190, %193 : vector<34x32xf32>
    %c1 = arith.constant 1 : index
    %c0_36 = arith.constant 0 : index
    %c0_37 = arith.constant 0 : index
    %195 = vector.load %arg3[%c1, %c0_36, %c0_37] : memref<2x32x256xbf16, #tpu.memory_space<vmem>>, vector<1x32x256xbf16>
    %196 = vector.shape_cast %195 : vector<1x32x256xbf16> to vector<32x256xbf16>
    %c1_38 = arith.constant 1 : index
    %c0_39 = arith.constant 0 : index
    %197 = vector.load %arg5[%c1_38, %c0_39] : memref<2x416xf32, #tpu.memory_space<vmem>>, vector<1x416xf32>
    %198 = vector.shape_cast %197 : vector<1x416xf32> to vector<416xf32>
    %199 = vector.extract_strided_slice %198 {offsets = [0], sizes = [32], strides = [1]} : vector<416xf32> to vector<32xf32>
    %200 = vector.extract_strided_slice %198 {offsets = [32], sizes = [32], strides = [1]} : vector<416xf32> to vector<32xf32>
    %cst_40 = arith.constant dense<0.000000e+00> : vector<34xf32>
    %201 = vector.multi_reduction <add>, %194, %cst_40 [1] : vector<34x32xf32> to vector<34xf32>
    %202 = vector.shape_cast %201 : vector<34xf32> to vector<34x1xf32>
    %cst_41 = arith.constant 3.200000e+01 : f32
    %203 = vector.broadcast %cst_41 : f32 to vector<34x1xf32>
    %204 = arith.divf %202, %203 : vector<34x1xf32>
    %205 = vector.broadcast %204 : vector<34x1xf32> to vector<34x32xf32>
    %206 = arith.subf %194, %205 : vector<34x32xf32>
    %207 = arith.mulf %206, %206 : vector<34x32xf32>
    %cst_42 = arith.constant dense<0.000000e+00> : vector<34xf32>
    %208 = vector.multi_reduction <add>, %207, %cst_42 [1] : vector<34x32xf32> to vector<34xf32>
    %209 = vector.shape_cast %208 : vector<34xf32> to vector<34x1xf32>
    %cst_43 = arith.constant 3.200000e+01 : f32
    %210 = vector.broadcast %cst_43 : f32 to vector<34x1xf32>
    %211 = arith.divf %209, %210 : vector<34x1xf32>
    %212 = vector.broadcast %204 : vector<34x1xf32> to vector<34x32xf32>
    %213 = arith.subf %194, %212 : vector<34x32xf32>
    %cst_44 = arith.constant 9.99999997E-7 : f32
    %214 = vector.broadcast %cst_44 : f32 to vector<34x1xf32>
    %215 = arith.addf %211, %214 : vector<34x1xf32>
    %216 = math.rsqrt %215 : vector<34x1xf32>
    %217 = vector.broadcast %216 : vector<34x1xf32> to vector<34x32xf32>
    %218 = arith.mulf %213, %217 : vector<34x32xf32>
    %219 = vector.shape_cast %199 : vector<32xf32> to vector<1x32xf32>
    %220 = vector.broadcast %219 : vector<1x32xf32> to vector<34x32xf32>
    %221 = arith.mulf %218, %220 : vector<34x32xf32>
    %222 = vector.shape_cast %200 : vector<32xf32> to vector<1x32xf32>
    %223 = vector.broadcast %222 : vector<1x32xf32> to vector<34x32xf32>
    %224 = arith.addf %221, %223 : vector<34x32xf32>
    %225 = vector.extract_strided_slice %196 {offsets = [0, 0], sizes = [32, 96], strides = [1, 1]} : vector<32x256xbf16> to vector<32x96xbf16>
    %226 = arith.truncf %224 : vector<34x32xf32> to vector<34x32xbf16>
    %cst_45 = arith.constant dense<0.000000e+00> : vector<34x96xf32>
    %227 = tpu.matmul %226, %225, %cst_45 {dimension_numbers = #tpu.dot_dimension_numbers<[1], [0], [0], [1], [0, 0, 1, 1], [], []>} : vector<34x32xbf16>, vector<32x96xbf16>, vector<34x96xf32> -> vector<34x96xf32>
    %228 = vector.extract_strided_slice %198 {offsets = [64], sizes = [96], strides = [1]} : vector<416xf32> to vector<96xf32>
    %229 = vector.shape_cast %228 : vector<96xf32> to vector<1x96xf32>
    %230 = vector.broadcast %229 : vector<1x96xf32> to vector<34x96xf32>
    %231 = arith.addf %227, %230 : vector<34x96xf32>
    %232 = vector.extract_strided_slice %231 {offsets = [0, 0], sizes = [17, 8], strides = [1, 1]} : vector<34x96xf32> to vector<17x8xf32>
    %233 = vector.extract_strided_slice %231 {offsets = [17, 0], sizes = [17, 8], strides = [1, 1]} : vector<34x96xf32> to vector<17x8xf32>
    %234 = vector.extract_strided_slice %231 {offsets = [0, 8], sizes = [17, 8], strides = [1, 1]} : vector<34x96xf32> to vector<17x8xf32>
    %235 = vector.extract_strided_slice %231 {offsets = [17, 8], sizes = [17, 8], strides = [1, 1]} : vector<34x96xf32> to vector<17x8xf32>
    %236 = vector.extract_strided_slice %231 {offsets = [0, 16], sizes = [17, 8], strides = [1, 1]} : vector<34x96xf32> to vector<17x8xf32>
    %237 = vector.extract_strided_slice %231 {offsets = [17, 16], sizes = [17, 8], strides = [1, 1]} : vector<34x96xf32> to vector<17x8xf32>
    %238 = vector.extract_strided_slice %231 {offsets = [0, 24], sizes = [17, 8], strides = [1, 1]} : vector<34x96xf32> to vector<17x8xf32>
    %239 = vector.extract_strided_slice %231 {offsets = [17, 24], sizes = [17, 8], strides = [1, 1]} : vector<34x96xf32> to vector<17x8xf32>
    %240 = vector.shape_cast %232 : vector<17x8xf32> to vector<1x17x8xf32>
    %241 = vector.shape_cast %233 : vector<17x8xf32> to vector<1x17x8xf32>
    %242 = vector.shape_cast %234 : vector<17x8xf32> to vector<1x17x8xf32>
    %243 = vector.shape_cast %235 : vector<17x8xf32> to vector<1x17x8xf32>
    %244 = vector.shape_cast %236 : vector<17x8xf32> to vector<1x17x8xf32>
    %245 = vector.shape_cast %237 : vector<17x8xf32> to vector<1x17x8xf32>
    %246 = vector.shape_cast %238 : vector<17x8xf32> to vector<1x17x8xf32>
    %247 = vector.shape_cast %239 : vector<17x8xf32> to vector<1x17x8xf32>
    %248 = tpu.concatenate %240, %241, %242, %243, %244, %245, %246, %247 in 0 : vector<1x17x8xf32>, vector<1x17x8xf32>, vector<1x17x8xf32>, vector<1x17x8xf32>, vector<1x17x8xf32>, vector<1x17x8xf32>, vector<1x17x8xf32>, vector<1x17x8xf32> -> vector<8x17x8xf32>
    %249 = vector.extract_strided_slice %231 {offsets = [0, 32], sizes = [17, 8], strides = [1, 1]} : vector<34x96xf32> to vector<17x8xf32>
    %250 = vector.extract_strided_slice %231 {offsets = [17, 32], sizes = [17, 8], strides = [1, 1]} : vector<34x96xf32> to vector<17x8xf32>
    %251 = vector.extract_strided_slice %231 {offsets = [0, 40], sizes = [17, 8], strides = [1, 1]} : vector<34x96xf32> to vector<17x8xf32>
    %252 = vector.extract_strided_slice %231 {offsets = [17, 40], sizes = [17, 8], strides = [1, 1]} : vector<34x96xf32> to vector<17x8xf32>
    %253 = vector.extract_strided_slice %231 {offsets = [0, 48], sizes = [17, 8], strides = [1, 1]} : vector<34x96xf32> to vector<17x8xf32>
    %254 = vector.extract_strided_slice %231 {offsets = [17, 48], sizes = [17, 8], strides = [1, 1]} : vector<34x96xf32> to vector<17x8xf32>
    %255 = vector.extract_strided_slice %231 {offsets = [0, 56], sizes = [17, 8], strides = [1, 1]} : vector<34x96xf32> to vector<17x8xf32>
    %256 = vector.extract_strided_slice %231 {offsets = [17, 56], sizes = [17, 8], strides = [1, 1]} : vector<34x96xf32> to vector<17x8xf32>
    %257 = vector.shape_cast %249 : vector<17x8xf32> to vector<1x17x8xf32>
    %258 = vector.shape_cast %250 : vector<17x8xf32> to vector<1x17x8xf32>
    %259 = vector.shape_cast %251 : vector<17x8xf32> to vector<1x17x8xf32>
    %260 = vector.shape_cast %252 : vector<17x8xf32> to vector<1x17x8xf32>
    %261 = vector.shape_cast %253 : vector<17x8xf32> to vector<1x17x8xf32>
    %262 = vector.shape_cast %254 : vector<17x8xf32> to vector<1x17x8xf32>
    %263 = vector.shape_cast %255 : vector<17x8xf32> to vector<1x17x8xf32>
    %264 = vector.shape_cast %256 : vector<17x8xf32> to vector<1x17x8xf32>
    %265 = tpu.concatenate %257, %258, %259, %260, %261, %262, %263, %264 in 0 : vector<1x17x8xf32>, vector<1x17x8xf32>, vector<1x17x8xf32>, vector<1x17x8xf32>, vector<1x17x8xf32>, vector<1x17x8xf32>, vector<1x17x8xf32>, vector<1x17x8xf32> -> vector<8x17x8xf32>
    %266 = vector.extract_strided_slice %231 {offsets = [0, 64], sizes = [17, 8], strides = [1, 1]} : vector<34x96xf32> to vector<17x8xf32>
    %267 = vector.extract_strided_slice %231 {offsets = [17, 64], sizes = [17, 8], strides = [1, 1]} : vector<34x96xf32> to vector<17x8xf32>
    %268 = vector.extract_strided_slice %231 {offsets = [0, 72], sizes = [17, 8], strides = [1, 1]} : vector<34x96xf32> to vector<17x8xf32>
    %269 = vector.extract_strided_slice %231 {offsets = [17, 72], sizes = [17, 8], strides = [1, 1]} : vector<34x96xf32> to vector<17x8xf32>
    %270 = vector.extract_strided_slice %231 {offsets = [0, 80], sizes = [17, 8], strides = [1, 1]} : vector<34x96xf32> to vector<17x8xf32>
    %271 = vector.extract_strided_slice %231 {offsets = [17, 80], sizes = [17, 8], strides = [1, 1]} : vector<34x96xf32> to vector<17x8xf32>
    %272 = vector.extract_strided_slice %231 {offsets = [0, 88], sizes = [17, 8], strides = [1, 1]} : vector<34x96xf32> to vector<17x8xf32>
    %273 = vector.extract_strided_slice %231 {offsets = [17, 88], sizes = [17, 8], strides = [1, 1]} : vector<34x96xf32> to vector<17x8xf32>
    %274 = vector.shape_cast %266 : vector<17x8xf32> to vector<1x17x8xf32>
    %275 = vector.shape_cast %267 : vector<17x8xf32> to vector<1x17x8xf32>
    %276 = vector.shape_cast %268 : vector<17x8xf32> to vector<1x17x8xf32>
    %277 = vector.shape_cast %269 : vector<17x8xf32> to vector<1x17x8xf32>
    %278 = vector.shape_cast %270 : vector<17x8xf32> to vector<1x17x8xf32>
    %279 = vector.shape_cast %271 : vector<17x8xf32> to vector<1x17x8xf32>
    %280 = vector.shape_cast %272 : vector<17x8xf32> to vector<1x17x8xf32>
    %281 = vector.shape_cast %273 : vector<17x8xf32> to vector<1x17x8xf32>
    %282 = tpu.concatenate %274, %275, %276, %277, %278, %279, %280, %281 in 0 : vector<1x17x8xf32>, vector<1x17x8xf32>, vector<1x17x8xf32>, vector<1x17x8xf32>, vector<1x17x8xf32>, vector<1x17x8xf32>, vector<1x17x8xf32>, vector<1x17x8xf32> -> vector<8x17x8xf32>
    %283 = arith.truncf %248 : vector<8x17x8xf32> to vector<8x17x8xbf16>
    %284 = arith.truncf %265 : vector<8x17x8xf32> to vector<8x17x8xbf16>
    %cst_46 = arith.constant dense<0.000000e+00> : vector<8x17x17xf32>
    %285 = tpu.matmul %283, %284, %cst_46 {dimension_numbers = #tpu.dot_dimension_numbers<[2], [2], [1], [1], [0, 0, 0, 1, 1, 1], [0], [0]>} : vector<8x17x8xbf16>, vector<8x17x8xbf16>, vector<8x17x17xf32> -> vector<8x17x17xf32>
    %cst_47 = arith.constant 0.353553385 : f32
    %286 = vector.broadcast %cst_47 : f32 to vector<8x17x17xf32>
    %287 = arith.mulf %285, %286 : vector<8x17x17xf32>
    %cst_48 = arith.constant dense<0xFF800000> : vector<8x17xf32>
    %288 = vector.multi_reduction <maximumf>, %287, %cst_48 [2] : vector<8x17x17xf32> to vector<8x17xf32>
    %289 = vector.shape_cast %288 : vector<8x17xf32> to vector<8x17x1xf32>
    %290 = vector.broadcast %289 : vector<8x17x1xf32> to vector<8x17x17xf32>
    %291 = arith.subf %287, %290 : vector<8x17x17xf32>
    %292 = math.exp %291 : vector<8x17x17xf32>
    %cst_49 = arith.constant dense<0.000000e+00> : vector<8x17xf32>
    %293 = vector.multi_reduction <add>, %292, %cst_49 [2] : vector<8x17x17xf32> to vector<8x17xf32>
    %294 = vector.shape_cast %293 : vector<8x17xf32> to vector<8x17x1xf32>
    %295 = tpu.reciprocal %294 {approx = true} : vector<8x17x1xf32> -> vector<8x17x1xf32>
    %296 = vector.broadcast %295 : vector<8x17x1xf32> to vector<8x17x17xf32>
    %297 = arith.mulf %292, %296 : vector<8x17x17xf32>
    %298 = arith.truncf %297 : vector<8x17x17xf32> to vector<8x17x17xbf16>
    %299 = arith.truncf %282 : vector<8x17x8xf32> to vector<8x17x8xbf16>
    %cst_50 = arith.constant dense<0.000000e+00> : vector<8x17x8xf32>
    %300 = tpu.matmul %298, %299, %cst_50 {dimension_numbers = #tpu.dot_dimension_numbers<[2], [1], [1], [2], [0, 0, 0, 1, 1, 2], [0], [0]>} : vector<8x17x17xbf16>, vector<8x17x8xbf16>, vector<8x17x8xf32> -> vector<8x17x8xf32>
    %301 = vector.extract_strided_slice %300 {offsets = [0, 0, 0], sizes = [1, 17, 8], strides = [1, 1, 1]} : vector<8x17x8xf32> to vector<1x17x8xf32>
    %302 = vector.shape_cast %301 : vector<1x17x8xf32> to vector<17x8xf32>
    %303 = vector.extract_strided_slice %300 {offsets = [2, 0, 0], sizes = [1, 17, 8], strides = [1, 1, 1]} : vector<8x17x8xf32> to vector<1x17x8xf32>
    %304 = vector.shape_cast %303 : vector<1x17x8xf32> to vector<17x8xf32>
    %305 = vector.extract_strided_slice %300 {offsets = [4, 0, 0], sizes = [1, 17, 8], strides = [1, 1, 1]} : vector<8x17x8xf32> to vector<1x17x8xf32>
    %306 = vector.shape_cast %305 : vector<1x17x8xf32> to vector<17x8xf32>
    %307 = vector.extract_strided_slice %300 {offsets = [6, 0, 0], sizes = [1, 17, 8], strides = [1, 1, 1]} : vector<8x17x8xf32> to vector<1x17x8xf32>
    %308 = vector.shape_cast %307 : vector<1x17x8xf32> to vector<17x8xf32>
    %309 = tpu.concatenate %302, %304, %306, %308 in 1 : vector<17x8xf32>, vector<17x8xf32>, vector<17x8xf32>, vector<17x8xf32> -> vector<17x32xf32>
    %310 = vector.extract_strided_slice %300 {offsets = [1, 0, 0], sizes = [1, 17, 8], strides = [1, 1, 1]} : vector<8x17x8xf32> to vector<1x17x8xf32>
    %311 = vector.shape_cast %310 : vector<1x17x8xf32> to vector<17x8xf32>
    %312 = vector.extract_strided_slice %300 {offsets = [3, 0, 0], sizes = [1, 17, 8], strides = [1, 1, 1]} : vector<8x17x8xf32> to vector<1x17x8xf32>
    %313 = vector.shape_cast %312 : vector<1x17x8xf32> to vector<17x8xf32>
    %314 = vector.extract_strided_slice %300 {offsets = [5, 0, 0], sizes = [1, 17, 8], strides = [1, 1, 1]} : vector<8x17x8xf32> to vector<1x17x8xf32>
    %315 = vector.shape_cast %314 : vector<1x17x8xf32> to vector<17x8xf32>
    %316 = vector.extract_strided_slice %300 {offsets = [7, 0, 0], sizes = [1, 17, 8], strides = [1, 1, 1]} : vector<8x17x8xf32> to vector<1x17x8xf32>
    %317 = vector.shape_cast %316 : vector<1x17x8xf32> to vector<17x8xf32>
    %318 = tpu.concatenate %311, %313, %315, %317 in 1 : vector<17x8xf32>, vector<17x8xf32>, vector<17x8xf32>, vector<17x8xf32> -> vector<17x32xf32>
    %319 = tpu.concatenate %309, %318 in 0 : vector<17x32xf32>, vector<17x32xf32> -> vector<34x32xf32>
    %320 = vector.extract_strided_slice %196 {offsets = [0, 96], sizes = [32, 32], strides = [1, 1]} : vector<32x256xbf16> to vector<32x32xbf16>
    %321 = arith.truncf %319 : vector<34x32xf32> to vector<34x32xbf16>
    %cst_51 = arith.constant dense<0.000000e+00> : vector<34x32xf32>
    %322 = tpu.matmul %321, %320, %cst_51 {dimension_numbers = #tpu.dot_dimension_numbers<[1], [0], [0], [1], [0, 0, 1, 1], [], []>} : vector<34x32xbf16>, vector<32x32xbf16>, vector<34x32xf32> -> vector<34x32xf32>
    %323 = arith.addf %194, %322 : vector<34x32xf32>
    %324 = vector.extract_strided_slice %198 {offsets = [160], sizes = [32], strides = [1]} : vector<416xf32> to vector<32xf32>
    %325 = vector.shape_cast %324 : vector<32xf32> to vector<1x32xf32>
    %326 = vector.broadcast %325 : vector<1x32xf32> to vector<34x32xf32>
    %327 = arith.addf %323, %326 : vector<34x32xf32>
    %328 = vector.extract_strided_slice %198 {offsets = [192], sizes = [32], strides = [1]} : vector<416xf32> to vector<32xf32>
    %329 = vector.extract_strided_slice %198 {offsets = [224], sizes = [32], strides = [1]} : vector<416xf32> to vector<32xf32>
    %cst_52 = arith.constant dense<0.000000e+00> : vector<34xf32>
    %330 = vector.multi_reduction <add>, %327, %cst_52 [1] : vector<34x32xf32> to vector<34xf32>
    %331 = vector.shape_cast %330 : vector<34xf32> to vector<34x1xf32>
    %cst_53 = arith.constant 3.200000e+01 : f32
    %332 = vector.broadcast %cst_53 : f32 to vector<34x1xf32>
    %333 = arith.divf %331, %332 : vector<34x1xf32>
    %334 = vector.broadcast %333 : vector<34x1xf32> to vector<34x32xf32>
    %335 = arith.subf %327, %334 : vector<34x32xf32>
    %336 = arith.mulf %335, %335 : vector<34x32xf32>
    %cst_54 = arith.constant dense<0.000000e+00> : vector<34xf32>
    %337 = vector.multi_reduction <add>, %336, %cst_54 [1] : vector<34x32xf32> to vector<34xf32>
    %338 = vector.shape_cast %337 : vector<34xf32> to vector<34x1xf32>
    %cst_55 = arith.constant 3.200000e+01 : f32
    %339 = vector.broadcast %cst_55 : f32 to vector<34x1xf32>
    %340 = arith.divf %338, %339 : vector<34x1xf32>
    %341 = vector.broadcast %333 : vector<34x1xf32> to vector<34x32xf32>
    %342 = arith.subf %327, %341 : vector<34x32xf32>
    %cst_56 = arith.constant 9.99999997E-7 : f32
    %343 = vector.broadcast %cst_56 : f32 to vector<34x1xf32>
    %344 = arith.addf %340, %343 : vector<34x1xf32>
    %345 = math.rsqrt %344 : vector<34x1xf32>
    %346 = vector.broadcast %345 : vector<34x1xf32> to vector<34x32xf32>
    %347 = arith.mulf %342, %346 : vector<34x32xf32>
    %348 = vector.shape_cast %328 : vector<32xf32> to vector<1x32xf32>
    %349 = vector.broadcast %348 : vector<1x32xf32> to vector<34x32xf32>
    %350 = arith.mulf %347, %349 : vector<34x32xf32>
    %351 = vector.shape_cast %329 : vector<32xf32> to vector<1x32xf32>
    %352 = vector.broadcast %351 : vector<1x32xf32> to vector<34x32xf32>
    %353 = arith.addf %350, %352 : vector<34x32xf32>
    %354 = vector.extract_strided_slice %196 {offsets = [0, 128], sizes = [32, 128], strides = [1, 1]} : vector<32x256xbf16> to vector<32x128xbf16>
    %355 = arith.truncf %353 : vector<34x32xf32> to vector<34x32xbf16>
    %cst_57 = arith.constant dense<0.000000e+00> : vector<34x128xf32>
    %356 = tpu.matmul %355, %354, %cst_57 {dimension_numbers = #tpu.dot_dimension_numbers<[1], [0], [0], [1], [0, 0, 1, 1], [], []>} : vector<34x32xbf16>, vector<32x128xbf16>, vector<34x128xf32> -> vector<34x128xf32>
    %357 = vector.extract_strided_slice %198 {offsets = [256], sizes = [128], strides = [1]} : vector<416xf32> to vector<128xf32>
    %358 = vector.shape_cast %357 : vector<128xf32> to vector<1x128xf32>
    %359 = vector.broadcast %358 : vector<1x128xf32> to vector<34x128xf32>
    %360 = arith.addf %356, %359 : vector<34x128xf32>
    %cst_58 = arith.constant 5.000000e-01 : f32
    %361 = vector.broadcast %cst_58 : f32 to vector<34x128xf32>
    %362 = arith.mulf %361, %360 : vector<34x128xf32>
    %cst_59 = arith.constant 4.471500e-02 : f32
    %363 = vector.broadcast %cst_59 : f32 to vector<34x128xf32>
    %364 = arith.mulf %363, %360 : vector<34x128xf32>
    %365 = arith.mulf %364, %360 : vector<34x128xf32>
    %366 = arith.mulf %365, %360 : vector<34x128xf32>
    %367 = arith.addf %360, %366 : vector<34x128xf32>
    %cst_60 = arith.constant 0.797884583 : f32
    %368 = vector.broadcast %cst_60 : f32 to vector<34x128xf32>
    %369 = arith.mulf %368, %367 : vector<34x128xf32>
    %370 = math.tanh %369 : vector<34x128xf32>
    %cst_61 = arith.constant 1.000000e+00 : f32
    %371 = vector.broadcast %cst_61 : f32 to vector<34x128xf32>
    %372 = arith.addf %371, %370 : vector<34x128xf32>
    %373 = arith.mulf %362, %372 : vector<34x128xf32>
    %c1_62 = arith.constant 1 : index
    %c0_63 = arith.constant 0 : index
    %c0_64 = arith.constant 0 : index
    %374 = vector.load %arg4[%c1_62, %c0_63, %c0_64] : memref<2x128x32xbf16, #tpu.memory_space<vmem>>, vector<1x128x32xbf16>
    %375 = vector.shape_cast %374 : vector<1x128x32xbf16> to vector<128x32xbf16>
    %376 = arith.truncf %373 : vector<34x128xf32> to vector<34x128xbf16>
    %cst_65 = arith.constant dense<0.000000e+00> : vector<34x32xf32>
    %377 = tpu.matmul %376, %375, %cst_65 {dimension_numbers = #tpu.dot_dimension_numbers<[1], [0], [0], [1], [0, 0, 1, 1], [], []>} : vector<34x128xbf16>, vector<128x32xbf16>, vector<34x32xf32> -> vector<34x32xf32>
    %378 = arith.addf %327, %377 : vector<34x32xf32>
    %379 = vector.extract_strided_slice %198 {offsets = [384], sizes = [32], strides = [1]} : vector<416xf32> to vector<32xf32>
    %380 = vector.shape_cast %379 : vector<32xf32> to vector<1x32xf32>
    %381 = vector.broadcast %380 : vector<1x32xf32> to vector<34x32xf32>
    %382 = arith.addf %378, %381 : vector<34x32xf32>
    %c0_66 = arith.constant 0 : index
    %c0_67 = arith.constant 0 : index
    %383 = vector.load %arg6[%c0_66, %c0_67] : memref<2x32xf32, #tpu.memory_space<vmem>>, vector<1x32xf32>
    %384 = vector.shape_cast %383 : vector<1x32xf32> to vector<32xf32>
    %c1_68 = arith.constant 1 : index
    %c0_69 = arith.constant 0 : index
    %385 = vector.load %arg6[%c1_68, %c0_69] : memref<2x32xf32, #tpu.memory_space<vmem>>, vector<1x32xf32>
    %386 = vector.shape_cast %385 : vector<1x32xf32> to vector<32xf32>
    %cst_70 = arith.constant dense<0.000000e+00> : vector<34xf32>
    %387 = vector.multi_reduction <add>, %382, %cst_70 [1] : vector<34x32xf32> to vector<34xf32>
    %388 = vector.shape_cast %387 : vector<34xf32> to vector<34x1xf32>
    %cst_71 = arith.constant 3.200000e+01 : f32
    %389 = vector.broadcast %cst_71 : f32 to vector<34x1xf32>
    %390 = arith.divf %388, %389 : vector<34x1xf32>
    %391 = vector.broadcast %390 : vector<34x1xf32> to vector<34x32xf32>
    %392 = arith.subf %382, %391 : vector<34x32xf32>
    %393 = arith.mulf %392, %392 : vector<34x32xf32>
    %cst_72 = arith.constant dense<0.000000e+00> : vector<34xf32>
    %394 = vector.multi_reduction <add>, %393, %cst_72 [1] : vector<34x32xf32> to vector<34xf32>
    %395 = vector.shape_cast %394 : vector<34xf32> to vector<34x1xf32>
    %cst_73 = arith.constant 3.200000e+01 : f32
    %396 = vector.broadcast %cst_73 : f32 to vector<34x1xf32>
    %397 = arith.divf %395, %396 : vector<34x1xf32>
    %398 = vector.broadcast %390 : vector<34x1xf32> to vector<34x32xf32>
    %399 = arith.subf %382, %398 : vector<34x32xf32>
    %cst_74 = arith.constant 9.99999997E-7 : f32
    %400 = vector.broadcast %cst_74 : f32 to vector<34x1xf32>
    %401 = arith.addf %397, %400 : vector<34x1xf32>
    %402 = math.rsqrt %401 : vector<34x1xf32>
    %403 = vector.broadcast %402 : vector<34x1xf32> to vector<34x32xf32>
    %404 = arith.mulf %399, %403 : vector<34x32xf32>
    %405 = vector.shape_cast %384 : vector<32xf32> to vector<1x32xf32>
    %406 = vector.broadcast %405 : vector<1x32xf32> to vector<34x32xf32>
    %407 = arith.mulf %404, %406 : vector<34x32xf32>
    %408 = vector.shape_cast %386 : vector<32xf32> to vector<1x32xf32>
    %409 = vector.broadcast %408 : vector<1x32xf32> to vector<34x32xf32>
    %410 = arith.addf %407, %409 : vector<34x32xf32>
    %411 = vector.extract_strided_slice %410 {offsets = [0, 0], sizes = [1, 32], strides = [1, 1]} : vector<34x32xf32> to vector<1x32xf32>
    %412 = vector.extract_strided_slice %410 {offsets = [17, 0], sizes = [1, 32], strides = [1, 1]} : vector<34x32xf32> to vector<1x32xf32>
    %413 = tpu.concatenate %411, %412 in 0 : vector<1x32xf32>, vector<1x32xf32> -> vector<2x32xf32>
    %c0_75 = arith.constant 0 : index
    %c0_76 = arith.constant 0 : index
    %414 = vector.load %arg7[%c0_75, %c0_76] : memref<32x8xbf16, #tpu.memory_space<vmem>>, vector<32x8xbf16>
    %415 = arith.truncf %413 : vector<2x32xf32> to vector<2x32xbf16>
    %cst_77 = arith.constant dense<0.000000e+00> : vector<2x8xf32>
    %416 = tpu.matmul %415, %414, %cst_77 {dimension_numbers = #tpu.dot_dimension_numbers<[1], [0], [0], [1], [0, 0, 1, 1], [], []>} : vector<2x32xbf16>, vector<32x8xbf16>, vector<2x8xf32> -> vector<2x8xf32>
    %c0_78 = arith.constant 0 : index
    %c0_79 = arith.constant 0 : index
    %417 = vector.load %arg8[%c0_78, %c0_79] : memref<1x8xf32, #tpu.memory_space<vmem>>, vector<1x8xf32>
    %418 = vector.broadcast %417 : vector<1x8xf32> to vector<2x8xf32>
    %419 = arith.addf %416, %418 : vector<2x8xf32>
    %c0_80 = arith.constant 0 : index
    %c0_81 = arith.constant 0 : index
    %420 = vector.load %arg9[%c0_80, %c0_81] : memref<2x8xf32, #tpu.memory_space<vmem>>, vector<2x8xf32>
    tpu.vector_store %arg9[%c0_80, %c0_81], %419 {strides = array<i32>} : memref<2x8xf32, #tpu.memory_space<vmem>>, vector<2x8xf32>,
    return
  }
}

</mosaic_0001>

<bundles_post_ra>
// kernel: vit_forward.1
= control target key start
LH: loop header
LB: loop body
LE: loop exit
PB: predicated region body
PF: predicated region fallthrough
CT: control target
= control target key end

     0   :  { %v5824_v1 = vmov 0.0   ;;  %vm5825_vm0 = vmmov 0   ;;  %vm90_vm1 = vcmask 523264   ;;  %s7443_s0 = inlined_call_operand.vmem [shape: f32[34,64], index: 0, kind: input, shape index: {}]   ;;  %s7444_s1 = inlined_call_operand.vmem [shape: bf16[64,32], index: 1, kind: input, shape index: {}]   ;;  %s7445_s2 = inlined_call_operand.vmem [shape: f32[17,32], index: 2, kind: input, shape index: {}]   ;;  %s7446_s3 = inlined_call_operand.vmem [shape: bf16[2,32,256], index: 3, kind: input, shape index: {}]   ;;  %s7447_s4 = inlined_call_operand.vmem [shape: bf16[2,128,32], index: 4, kind: input, shape index: {}]   ;;  %s7448_s5 = inlined_call_operand.vmem [shape: f32[2,416], index: 5, kind: input, shape index: {}]   ;;  %s7449_s6 = inlined_call_operand.vmem [shape: f32[2,32], index: 6, kind: input, shape index: {}]   ;;  %s7450_s7 = inlined_call_operand.vmem [shape: bf16[32,8], index: 7, kind: input, shape index: {}]   ;;  %s7451_s8 = inlined_call_operand.vmem [shape: f32[1,8], index: 8, kind: input, shape index: {}]   ;;  %s7452_s9 = inlined_call_operand.hbm [shape: f32[2,8], index: 9, kind: output, shape index: {}]  }
   0x1   :  { %v5506_v0 = vld [vmem:[%s7444_s1 + $0x18] sm:$0xff]   ;;  %4897 = vmatprep.subr.bf16.mxu0 %v5824_v1  ;;  %5333 = vmatprep.subr.bf16.mxu1 %v5824_v1  ;;  %v5507_v2 = vld [vmem:[%s7444_s1 + $0x10] sm:$0xff]   ;;  %v5508_v3 = vld [vmem:[%s7444_s1 + $0x8] sm:$0xff]  }
   0x2   :  { %4898 = vmatpush3.bf16.msra.mxu0 %v5506_v0  ;;  %5337 = vmatpush3.bf16.msra.mxu1 %v5506_v0  ;;  %v5509_v4 = vld [vmem:[%s7444_s1] sm:$0xff]   ;;  %v35_v6 = vld [vmem:[%s7443_s0 + $0x8] sm:$0xff]  ;;  %v36_v10 = vld [vmem:[%s7443_s0 + $0x10] sm:$0xff] }
   0x3   :  { %4899 = vmatprep.subr.bf16.mxu0 %v5824_v1  ;;  %5334 = vmatprep.subr.bf16.mxu1 %v5824_v1  ;;  %v34_v5 = vld [vmem:[%s7443_s0] sm:$0xff]  ;;  %v37_v11 = vld [vmem:[%s7443_s0 + $0x18] sm:$0xff] }
   0x4   :  { %4905 = vmatprep.mubr.msk.bf16.mxu0 %vm5825_vm0, %v5824_v1  ;;  %4913 = vmatprep.mubr.msk.bf16.mxu1 %vm5825_vm0, %v5824_v1  ;;  %v38_v7 = vld [vmem:[%s7443_s0 + $0x20] sm:$0x3]  ;;  %v47_v8 = vpack.c.bf16 %v35_v6, %v34_v5 }
   0x5   :  { %v49_v9 = vpack.c.bf16 %v38_v7, %v38_v7 }
   0x6   :  { %4900 = vmatpush3.bf16.msra.mxu0 %v5507_v2  ;;  %5338 = vmatpush3.bf16.msra.mxu1 %v5507_v2 }
   0x7   :  { %4901 = vmatprep.subr.bf16.mxu0 %v5824_v1  ;;  %5335 = vmatprep.subr.bf16.mxu1 %v5824_v1 }
   0xa   :  { %4902 = vmatpush3.bf16.msra.mxu0 %v5508_v3  ;;  %5339 = vmatpush3.bf16.msra.mxu1 %v5508_v3 }
   0xb   :  { %4903 = vmatprep.subr.bf16.mxu0 %v5824_v1  ;;  %5336 = vmatprep.subr.bf16.mxu1 %v5824_v1 }
   0xe   :  { %4904 = vmatpush3.bf16.msra.mxu0 %v5509_v4  ;;  %5340 = vmatpush3.bf16.msra.mxu1 %v5509_v4 }
   0xf   :  { %4917 = vmatprep.subr.bf16.mxu1 %v5824_v1 }
  0x11   :  { %4906 = vmatmul.mubr.msk.bf16.vlgmr.msra.gmra.mxu0 %vm90_vm1, %v47_v8  ;;  %4914 = vmatmul.mubr.msk.bf16.vlgmr.msra.gmra.mxu1 %vm90_vm1, %v49_v9 }
  0x12   :  { %4909 = vmatprep.mubr.msk.bf16.mxu0 %vm5825_vm0, %v5824_v1  ;;  %4921 = vmatprep.mubr.msk.bf16.mxu1 %vm5825_vm0, %v5824_v1 }
  0x13   :  { %14 = vsyncpa [#allocation3], 0  ;;  %v48_v12 = vpack.c.bf16 %v37_v11, %v36_v10  ;;  %v51_v13 = vld [vmem:[%s7445_s2 + $0x8] sm:$0xff]  ;;  %v52_v14 = vld [vmem:[%s7445_s2 + $0x10] sm:$0x1]  ;;  %vm56_vm2 = vcmask 1040384   ;;  %v230_v6 = vlaneseq }
  0x14   :  { %v50_v15 = vld [vmem:[%s7445_s2] sm:$0xff]  ;;  %v58_v16 = vrot.slane %v51_v13, 7  ;;  %v60_v17 = vrot.slane %v52_v14, 7  ;;  %vm161_vm3 = vcmask 261120   ;;  %vm174_vm4 = vcmask 254976   ;;  %s5826_s13 = smov 96  }
  0x15   :  { %v57_v21 = vrot.slane %v50_v15, 7  ;;  %v5988_v7 = vshrl.u32 %v230_v6, 7  ;;  %v160_v9 = vld [vmem:[%s7448_s5] ss:$2 sm:$0xf]  ;;  %s5827_s16 = smov 64  }
  0x16   :  { %v61_v23 = vsel %vm56_vm2, %v58_v16, %v60_v17  ;;  %v5510_v11 = vld [vmem:[%s7446_s3 + $0x10] ss:$8 sps:$4 sm:$0xff]   ;;  %vm428_vm5 = vcmask 64512   ;;  %s5828_s17 = smov 120   ;;  %vm341_vm6 = vcmask 1046528   ;;  %s5829_s18 = smov 112  }
  0x17   :  { %v65_v31 = vsel %vm56_vm2, %v52_v14, %v57_v21  ;;  %v59_v38 = vsel %vm56_vm2, %v57_v21, %v58_v16  ;;  %v5991_v8 = vsub.s32 0, %v5988_v7  ;;  %4918 = vmatpush3.bf16.msra.mxu1 %v5510_v11  ;;  %s5830_s19 = smov 104   ;;  %vm982_vm7 = vcmask 131072   ;;  %s5832_s22 = smov 32  }
  0x18   :  { %4919 = vmatprep.subr.bf16.mxu1 %v5824_v1  ;;  %vm975_vm8 = vcmask 138240   ;;  %s5833_s24 = smov 8   ;;  %s5834_s25 = smov 16   ;;  %vm1794_vm9 = vcmask 130048   ;;  %vm1798_vm10 = vcmask 195584   ;;  %vm4551_vm11 = vcmask 58368  }
  0x19   :  { %4910 = vmatmul.mubr.msk.bf16.gmra.mxu0 %vm90_vm1, %v48_v12  ;;  %v233_v10 = vrot.slane %v160_v9, %v5991_v8  ;;  %v5512_v12 = vld [vmem:[%s7446_s3] ss:$8 sps:$4 sm:$0xff]   ;;  %s5835_s26 = smov 24  }
  0x1b   :  { %4920 = vmatpush3.bf16.msra.mxu1 %v5512_v12 }
  0xd1   :  { %v134_v18 = vpop.f32.mrf.mxu0  ;;  %v150_v19 = vpop.f32.mrf.mxu1 }
  0xd2   :  { %v5943_v20 = vadd.f32 %v134_v18, %v50_v15  ;;  %v5950_v29 = vadd.f32 %v150_v19, %v61_v23 }
  0xd3   :  { %v4907_v22 = vpop.f32.mrf.mxu0  ;;  %v4915_v24 = vpop.f32.mrf.mxu1 }
  0xd4   :  { %v162_v25 = vsel %vm161_vm3, %v5943_v20, 0.0  ;;  %v175_v36 = vsel %vm174_vm4, %v5950_v29, 0.0 }
  0xd5   :  { %163 = vadd.xlane.f32.xlu0 %v162_v25  ;;  %v137_v26 = vpop.f32.mrf.mxu0  ;;  %v153_v27 = vpop.f32.mrf.mxu1 }
  0xd6   :  { %v5948_v28 = vadd.f32 %v137_v26, %v51_v13  ;;  %v253_v13 = vsub.s32 1, %v5988_v7 }
  0xd7   :  { %v4908_v30 = vpop.f32.mrf.mxu0  ;;  %v4916_v32 = vpop.f32.mrf.mxu1 }
  0xd8   :  { %v165_v33 = vsel %vm161_vm3, %v5948_v28, 0.0  ;;  %v254_v14 = vrot.slane %v160_v9, %v253_v13 }
  0xd9   :  { %166 = vadd.xlane.f32.xlu0 %v165_v33  ;;  %v142_v34 = vpop.f32.mrf.mxu0 }
  0xda   :  { %v5955_v35 = vadd.f32 %v142_v34, %v65_v31 }
  0xdb   :  { %v4911_v37 = vpop.f32.mrf.mxu0 }
  0xdc   :  { %v168_v39 = vsel %vm161_vm3, %v5955_v35, 0.0 }
  0xdd   :  { %176 = vadd.xlane.f32.xlu0 %v175_v36  ;;  %169 = vadd.xlane.f32.xlu1 %v168_v39  ;;  %v145_v40 = vpop.f32.mrf.mxu0 }
  0xde   :  { %v5962_v41 = vadd.f32 %v145_v40, %v59_v38 }
  0xdf   :  { %v4912_v42 = vpop.f32.mrf.mxu0 }
  0xe0   :  { %v171_v43 = vsel %vm161_vm3, %v5962_v41, 0.0 }
  0xe1   :  { %172 = vadd.xlane.f32.xlu1 %v171_v43 }
 0x15e   :  { %v164_v44 = vpop.xlane.xlu0 %163 }
 0x15f   :  { %v179_v45 = vmul.f32 0.03125, %v164_v44 }
 0x161   :  { %v5967_v46 = vsub.f32 %v5943_v20, %v179_v45 }
 0x162   :  { %v167_v47 = vpop.xlane.xlu0 %166 }
 0x163   :  { %v180_v48 = vmul.f32 0.03125, %v167_v47  ;;  %v189_v49 = vmul.f32 %v5967_v46, %v5967_v46 }
 0x165   :  { %v5972_v50 = vsub.f32 %v5948_v28, %v180_v48  ;;  %v194_v51 = vsel %vm161_vm3, %v189_v49, 0.0 }
 0x166   :  { %v177_v52 = vpop.xlane.xlu0 %176  ;;  %v170_v53 = vpop.xlane.xlu1 %169  ;;  %195 = vadd.xlane.f32.xlu1 %v194_v51 }
 0x167   :  { %v183_v54 = vmul.f32 0.03125, %v177_v52  ;;  %v181_v55 = vmul.f32 0.03125, %v170_v53  ;;  %v190_v56 = vmul.f32 %v5972_v50, %v5972_v50 }
 0x169   :  { %v5978_v57 = vsub.f32 %v5950_v29, %v183_v54  ;;  %v186_v58 = vsub.f32 %v5955_v35, %v181_v55  ;;  %v197_v59 = vsel %vm161_vm3, %v190_v56, 0.0 }
 0x16a   :  { %198 = vadd.xlane.f32.xlu0 %v197_v59  ;;  %v173_v60 = vpop.xlane.xlu1 %172 }
 0x16b   :  { %v182_v61 = vmul.f32 0.03125, %v173_v60  ;;  %v191_v62 = vmul.f32 %v186_v58, %v186_v58  ;;  %v193_v2 = vmul.f32 %v5978_v57, %v5978_v57 }
 0x16d   :  { %v187_v63 = vsub.f32 %v5962_v41, %v182_v61  ;;  %v200_v0 = vsel %vm161_vm3, %v191_v62, 0.0  ;;  %v206_v4 = vsel %vm174_vm4, %v193_v2, 0.0 }
 0x16e   :  { %201 = vadd.xlane.f32.xlu1 %v200_v0 }
 0x16f   :  { %v192_v3 = vmul.f32 %v187_v63, %v187_v63 }
 0x171   :  { %v203_v5 = vsel %vm161_vm3, %v192_v3, 0.0 }
 0x172   :  { %207 = vadd.xlane.f32.xlu1 %v206_v4  ;;  %204 = vadd.xlane.f32.xlu0 %v203_v5 }
 0x183   :  { %267 = vrot.lane.b32.xlu1 %v233_v10, %s5827_s16 }
 0x187   :  { %269 = vrot.lane.b32.xlu1 %v254_v14, %s5827_s16 }
 0x188   :  { %240 = vrot.lane.b32.xlu0 %v233_v10, %s5826_s13 }
 0x1ef   :  { %v196_v15 = vpop.xlane.xlu1 %195 }
 0x1f0   :  { %v209_v16 = vmul.f32 0.03125, %v196_v15 }
 0x1f2   :  { %v214_v17 = vadd.f32 1e-06, %v209_v16 }
 0x1f3   :  { %v199_v18 = vpop.xlane.xlu0 %198 }
 0x1f4   :  { %5540 = vrsqrt.f32 %v214_v17  ;;  %v210_v19 = vmul.f32 0.03125, %v199_v18 }
 0x1f6   :  { %v215_v21 = vadd.f32 1e-06, %v210_v19 }
 0x1f7   :  { %v202_v22 = vpop.xlane.xlu1 %201 }
 0x1f8   :  { %5542 = vrsqrt.f32 %v215_v21  ;;  %v211_v23 = vmul.f32 0.03125, %v202_v22 }
 0x1fa   :  { %v216_v24 = vadd.f32 1e-06, %v211_v23 }
 0x1fb   :  { %v205_v25 = vpop.xlane.xlu0 %204  ;;  %v208_v26 = vpop.xlane.xlu1 %207 }
 0x1fc   :  { %5544 = vrsqrt.f32 %v216_v24  ;;  %v212_v27 = vmul.f32 0.03125, %v205_v25  ;;  %v213_v30 = vmul.f32 0.03125, %v208_v26 }
 0x1fe   :  { %v217_v31 = vadd.f32 1e-06, %v212_v27  ;;  %v218_v32 = vadd.f32 1e-06, %v213_v30 }
 0x1ff   :  { %v241_v39 = vpop.permute.xlu0 %240  ;;  %v268_v60 = vpop.permute.xlu1 %267 }
 0x200   :  { %5546 = vrsqrt.f32 %v217_v31 }
 0x201   :  { %v5541_v33 = vpop.eup %5540  ;;  %5548 = vrsqrt.f32 %v218_v32 }
 0x202   :  { %v224_v34 = vmul.f32 %v5541_v33, %v5967_v46 }
 0x203   :  { %v270_v61 = vpop.permute.xlu1 %269 }
 0x204   :  { %v235_v38 = vmul.f32 %v233_v10, %v224_v34 }
 0x205   :  { %v5543_v36 = vpop.eup %5542 }
 0x206   :  { %v225_v37 = vmul.f32 %v5543_v36, %v5972_v50  ;;  %v243_v43 = vadd.f32 %v241_v39, %v235_v38 }
 0x208   :  { %v236_v40 = vmul.f32 %v233_v10, %v225_v37 }
 0x209   :  { %v5545_v42 = vpop.eup %5544 }
 0x20a   :  { %v244_v44 = vadd.f32 %v241_v39, %v236_v40  ;;  %v226_v45 = vmul.f32 %v5545_v42, %v186_v58 }
 0x20c   :  { %v248_v47 = vpack.c.bf16 %v244_v44, %v243_v43  ;;  %v237_v52 = vmul.f32 %v233_v10, %v226_v45 }
 0x20d   :  { %v5547_v48 = vpop.eup %5546 }
 0x20e   :  { %v5549_v49 = vpop.eup %5548  ;;  %4922 = vmatmul.mubr.msk.bf16.vlgmr.msra.gmra.mxu1 %vm161_vm3, %v248_v47  ;;  %v227_v51 = vmul.f32 %v5547_v48, %v187_v63  ;;  %v245_v53 = vadd.f32 %v241_v39, %v237_v52  ;;  %v271_v63 = vsel %vm90_vm1, %v268_v60, %v270_v61 }
 0x20f   :  { %4925 = vmatprep.mubr.msk.bf16.mxu1 %vm5825_vm0, %v5824_v1  ;;  %v228_v50 = vmul.f32 %v5549_v49, %v5978_v57 }
 0x210   :  { %v238_v46 = vmul.f32 %v233_v10, %v227_v51 }
 0x211   :  { %v239_v56 = vmul.f32 %v233_v10, %v228_v50 }
 0x212   :  { %v246_v54 = vadd.f32 %v241_v39, %v238_v46 }
 0x213   :  { %v247_v58 = vadd.f32 %v241_v39, %v239_v56 }
 0x214   :  { %v249_v55 = vpack.c.bf16 %v246_v54, %v245_v53 }
 0x215   :  { %v250_v59 = vpack.c.bf16 %v247_v58, %v247_v58 }
 0x216   :  { %4926 = vmatmul.mubr.msk.bf16.gmra.mxu1 %vm161_vm3, %v249_v55 }
 0x217   :  { %4929 = vmatprep.mubr.msk.bf16.mxu1 %vm5825_vm0, %v5824_v1 }
 0x21e   :  { %4930 = vmatmul.mubr.msk.bf16.gmra.mxu1 %vm161_vm3, %v250_v59 }
 0x2ce   :  { %v316_v62 = vpop.f32.mrf.mxu1 }
 0x2cf   :  { %v317_v2 = vadd.f32 %v316_v62, %v271_v63 }
 0x2d0   :  { %v4923_v0 = vpop.f32.mrf.mxu1 }
 0x2d2   :  { %v319_v57 = vpop.f32.mrf.mxu1 }
 0x2d3   :  { %v320_v3 = vadd.f32 %v319_v57, %v271_v63 }
 0x2d4   :  { %v4924_v4 = vpop.f32.mrf.mxu1 }
 0x2d5   :  { %v6021_v5 = vpack.c.bf16 %v320_v3, %v317_v2 }
 0x2d6   :  { %v324_v6 = vpop.f32.mrf.mxu1 }
 0x2d7   :  { %v325_v9 = vadd.f32 %v324_v6, %v271_v63  ;;  %4937 = vmatprep.mubr.msk.bf16.mxu1 %vm428_vm5, %v6021_v5 }
 0x2d8   :  { %v4927_v10 = vpop.f32.mrf.mxu1 }
 0x2d9   :  { %356 = vrot.lane.b32.xlu1 %v325_v9, %s5828_s17  ;;  %v342_v19 = vrot.slane %v325_v9, 1  ;;  %v6045_v31 = vpack.c.bf16 %v325_v9, %v325_v9 }
 0x2da   :  { %v327_v11 = vpop.f32.mrf.mxu1 }
 0x2db   :  { %v328_v12 = vadd.f32 %v327_v11, %v271_v63 }
 0x2dc   :  { %v4928_v14 = vpop.f32.mrf.mxu1 }
 0x2dd   :  { %354 = vrot.lane.b32.xlu1 %v320_v3, %s5828_s17  ;;  %v343_v16 = vrot.slane %v328_v12, 1 }
 0x2de   :  { %v332_v15 = vpop.f32.mrf.mxu1 }
 0x2df   :  { %v333_v17 = vadd.f32 %v332_v15, %v271_v63  ;;  %v344_v23 = vsel %vm341_vm6, %v342_v19, %v343_v16 }
 0x2e0   :  { %v4931_v18 = vpop.f32.mrf.mxu1 }
 0x2e1   :  { %v345_v21 = vrot.slane %v333_v17, 1  ;;  %374 = vrot.lane.b32.xlu1 %v325_v9, %s5829_s18 }
 0x2e2   :  { %v335_v22 = vpop.f32.mrf.mxu1 }
 0x2e3   :  { %v5386_v24 = vpack.i.bf16 %v317_v2, %v345_v21  ;;  %v346_v25 = vsel %vm341_vm6, %v343_v16, %v345_v21  ;;  %v6049_v32 = vpack.c.bf16 %v345_v21, %v345_v21 }
 0x2e4   :  { %v4932_v26 = vpop.f32.mrf.mxu1  ;;  %v6030_v27 = vpack.c.bf16 %v346_v25, %v344_v23  ;;  %v5391_v30 = vpack.i.bf16 %v346_v25, %v344_v23 }
 0x2e5   :  { %372 = vrot.lane.b32.xlu1 %v320_v3, %s5829_s18  ;;  %5387 = vrot.lane.b32.xlu0 %v5386_v24, %s5828_s17 }
 0x2e6   :  { %4945 = vmatprep.mubr.msk.bf16.mxu0 %vm428_vm5, %v6030_v27 }
 0x2e9   :  { %392 = vrot.lane.b32.xlu1 %v325_v9, %s5830_s19  ;;  %5392 = vrot.lane.b32.xlu0 %v5391_v30, %s5828_s17 }
 0x2ed   :  { %390 = vrot.lane.b32.xlu1 %v320_v3, %s5830_s19  ;;  %5397 = vrot.lane.b32.xlu0 %v5386_v24, %s5829_s18 }
 0x2f1   :  { %5412 = vrot.lane.b32.xlu1 %v5391_v30, %s5830_s19  ;;  %5402 = vrot.lane.b32.xlu0 %v5391_v30, %s5829_s18 }
 0x2f5   :  { %5407 = vrot.lane.b32.xlu0 %v5386_v24, %s5830_s19  ;;  %424 = vrot.lane.b32.xlu1 %v6021_v5, %s5826_s13 }
 0x2f9   :  { %426 = vrot.lane.b32.xlu0 %v6045_v31, %s5826_s13 }
 0x2fd   :  { %493 = vrot.lane.b32.xlu0 %v6049_v32, %s5826_s13 }
 0x301   :  { %491 = vrot.lane.b32.xlu0 %v6030_v27, %s5826_s13 }
 0x34b   :  { %v357_v33 = vpop.permute.xlu1 %356 }
 0x34c   :  { %v6055_v34 = vpack.c.bf16 %v357_v33, %v357_v33 }
 0x34e   :  { %559 = vrot.lane.b32.xlu1 %v6055_v34, %s5826_s13 }
 0x34f   :  { %v355_v36 = vpop.permute.xlu1 %354 }
 0x353   :  { %v375_v37 = vpop.permute.xlu1 %374 }
 0x354   :  { %v6067_v51 = vpack.c.bf16 %v375_v37, %v375_v37 }
 0x357   :  { %v373_v38 = vpop.permute.xlu1 %372  ;;  %v5388_v39 = vpop.permute.xlu0 %5387 }
 0x358   :  { %v5390_v40 = vunpack.i.h.bf16 %v5388_v39  ;;  %v5389_v42 = vunpack.i.l.bf16 %v5388_v39 }
 0x35a   :  { %v6059_v43 = vpack.c.bf16 %v5389_v42, %v5389_v42  ;;  %v6061_v44 = vpack.c.bf16 %v355_v36, %v5390_v40 }
 0x35b   :  { %v393_v45 = vpop.permute.xlu1 %392  ;;  %v5393_v47 = vpop.permute.xlu0 %5392 }
 0x35c   :  { %v5395_v48 = vunpack.i.h.bf16 %v5393_v47  ;;  %v5394_v49 = vunpack.i.l.bf16 %v5393_v47  ;;  %625 = vrot.lane.b32.xlu0 %v6059_v43, %s5826_s13  ;;  %557 = vrot.lane.b32.xlu1 %v6061_v44, %s5826_s13  ;;  %v6080_v61 = vpack.c.bf16 %v393_v45, %v393_v45  ;;  %v5831_v47 = vmov 0  }
 0x35e   :  { %v412_v52 = vpack.c.bf16 %v5395_v48, %v5394_v49  ;;  %v6171_v48 = vsel %vm56_vm2, 65535, %v5831_v47 }
 0x35f   :  { %v5398_v46 = vpop.permute.xlu0 %5397  ;;  %v391_v54 = vpop.permute.xlu1 %390 }
 0x360   :  { %v5400_v50 = vunpack.i.h.bf16 %v5398_v46  ;;  %v5399_v53 = vunpack.i.l.bf16 %v5398_v46  ;;  %623 = vrot.lane.b32.xlu0 %v412_v52, %s5826_s13  ;;  %691 = vrot.lane.b32.xlu1 %v6067_v51, %s5826_s13 }
 0x362   :  { %v6072_v55 = vpack.c.bf16 %v5399_v53, %v5399_v53  ;;  %v6074_v56 = vpack.c.bf16 %v373_v38, %v5400_v50 }
 0x363   :  { %v5403_v58 = vpop.permute.xlu0 %5402  ;;  %v5413_v63 = vpop.permute.xlu1 %5412 }
 0x364   :  { %v5405_v59 = vunpack.i.h.bf16 %v5403_v58  ;;  %v5404_v60 = vunpack.i.l.bf16 %v5403_v58  ;;  %757 = vrot.lane.b32.xlu0 %v6072_v55, %s5826_s13  ;;  %689 = vrot.lane.b32.xlu1 %v6074_v56, %s5826_s13  ;;  %v5415_v3 = vunpack.i.h.bf16 %v5413_v63  ;;  %v5414_v4 = vunpack.i.l.bf16 %v5413_v63 }
 0x366   :  { %v6082_v62 = vpack.c.bf16 %v5405_v59, %v5404_v60  ;;  %v6099_v14 = vpack.c.bf16 %v5415_v3, %v5414_v4 }
 0x367   :  { %v5408_v0 = vpop.permute.xlu0 %5407  ;;  %v425_v12 = vpop.permute.xlu1 %424 }
 0x368   :  { %v5410_v57 = vunpack.i.h.bf16 %v5408_v0  ;;  %v5409_v2 = vunpack.i.l.bf16 %v5408_v0  ;;  %755 = vrot.lane.b32.xlu0 %v6082_v62, %s5826_s13  ;;  %823 = vrot.lane.b32.xlu1 %v6080_v61, %s5826_s13  ;;  %v436_v18 = vsel %vm428_vm5, %v425_v12, 0 }
 0x36a   :  { %v6088_v6 = vpack.c.bf16 %v5409_v2, %v5409_v2  ;;  %v6090_v9 = vpack.c.bf16 %v391_v54, %v5410_v57 }
 0x36b   :  { %v427_v10 = vpop.permute.xlu0 %426 }
 0x36c   :  { %5341 = vmatprep.subr.msk.bf16.mxu1 %vm428_vm5, %v427_v10  ;;  %889 = vrot.lane.b32.xlu0 %v6088_v6, %s5826_s13  ;;  %v439_v11 = vsel %vm428_vm5, %v427_v10, 0 }
 0x36d   :  { %821 = vrot.lane.b32.xlu1 %v6090_v9, %s5826_s13  ;;  %4934 = vmatpush3.bf16.xpose.msra.mxu1 %v439_v11 }
 0x36e   :  { %5342 = vmatprep.subr.msk.bf16.mxu1 %vm428_vm5, %v425_v12 }
 0x36f   :  { %v494_v15 = vpop.permute.xlu0 %493 }
 0x370   :  { %5343 = vmatprep.subr.msk.bf16.mxu0 %vm428_vm5, %v494_v15  ;;  %887 = vrot.lane.b32.xlu0 %v6099_v14, %s5826_s13  ;;  %v505_v16 = vsel %vm428_vm5, %v494_v15, 0 }
 0x371   :  { %1323 = vrot.lane.b32.xlu1 %v6049_v32, %s5827_s16  ;;  %4942 = vmatpush3.bf16.xpose.msra.mxu0 %v505_v16 }
 0x373   :  { %v492_v17 = vpop.permute.xlu0 %491 }
 0x374   :  { %5344 = vmatprep.subr.msk.bf16.mxu0 %vm428_vm5, %v492_v17  ;;  %1259 = vrot.lane.b32.xlu0 %v6045_v31, %s5827_s16  ;;  %v502_v19 = vsel %vm428_vm5, %v492_v17, 0 }
 0x375   :  { %1321 = vrot.lane.b32.xlu1 %v6030_v27, %s5827_s16  ;;  %4936 = vmatpush3.bf16.xpose.msra.mxu1 %v436_v18 }
 0x378   :  { %1257 = vrot.lane.b32.xlu0 %v6021_v5, %s5827_s16 }
 0x379   :  { %1507 = vrot.lane.b32.xlu1 %v6074_v56, %s5827_s16  ;;  %4944 = vmatpush3.bf16.xpose.msra.mxu0 %v502_v19 }
 0x37c   :  { %1385 = vrot.lane.b32.xlu0 %v6055_v34, %s5827_s16  ;;  %4938 = vmatmul.mubr.msk.bf16.vlgmr.msra.gmra.mxu1 %vm428_vm5, %v6045_v31 }
 0x37d   :  { %1445 = vrot.lane.b32.xlu1 %v412_v52, %s5827_s16  ;;  %4953 = vmatprep.mubr.msk.bf16.mxu1 %vm428_vm5, %v6061_v44 }
 0x380   :  { %4946 = vmatmul.mubr.msk.bf16.vlgmr.msra.gmra.mxu0 %vm428_vm5, %v6049_v32  ;;  %1447 = vrot.lane.b32.xlu0 %v6059_v43, %s5827_s16 }
 0x381   :  { %4961 = vmatprep.mubr.msk.bf16.mxu0 %vm428_vm5, %v412_v52 }
 0x384   :  { %1383 = vrot.lane.b32.xlu0 %v6061_v44, %s5827_s16 }
 0x388   :  { %1509 = vrot.lane.b32.xlu0 %v6067_v51, %s5827_s16 }
 0x38c   :  { %1571 = vrot.lane.b32.xlu0 %v6072_v55, %s5827_s16 }
 0x390   :  { %1633 = vrot.lane.b32.xlu0 %v6080_v61, %s5827_s16 }
 0x3c0   :  { %v560_v5 = vpop.permute.xlu1 %559 }
 0x3c1   :  { %5345 = vmatprep.subr.msk.bf16.mxu1 %vm428_vm5, %v560_v5  ;;  %v571_v21 = vsel %vm428_vm5, %v560_v5, 0 }
 0x3c2   :  { %4950 = vmatpush3.bf16.xpose.msra.mxu1 %v571_v21 }
 0x3ce   :  { %v626_v22 = vpop.permute.xlu0 %625  ;;  %v558_v23 = vpop.permute.xlu1 %557 }
 0x3cf   :  { %5346 = vmatprep.subr.msk.bf16.mxu1 %vm428_vm5, %v558_v23  ;;  %5347 = vmatprep.subr.msk.bf16.mxu0 %vm428_vm5, %v626_v22  ;;  %v568_v24 = vsel %vm428_vm5, %v558_v23, 0  ;;  %v637_v25 = vsel %vm428_vm5, %v626_v22, 0 }
 0x3d0   :  { %4952 = vmatpush3.bf16.xpose.msra.mxu1 %v568_v24  ;;  %4958 = vmatpush3.bf16.xpose.msra.mxu0 %v637_v25 }
 0x3d2   :  { %v624_v26 = vpop.permute.xlu0 %623  ;;  %v692_v27 = vpop.permute.xlu1 %691 }
 0x3d3   :  { %5348 = vmatprep.subr.msk.bf16.mxu0 %vm428_vm5, %v624_v26  ;;  %5349 = vmatprep.subr.msk.bf16.mxu1 %vm428_vm5, %v692_v27  ;;  %v634_v31 = vsel %vm428_vm5, %v624_v26, 0  ;;  %v703_v32 = vsel %vm428_vm5, %v692_v27, 0 }
 0x3d6   :  { %v758_v30 = vpop.permute.xlu0 %757  ;;  %v690_v33 = vpop.permute.xlu1 %689 }
 0x3d7   :  { %4954 = vmatmul.mubr.msk.bf16.vlgmr.msra.gmra.mxu1 %vm428_vm5, %v6055_v34  ;;  %v700_v34 = vsel %vm428_vm5, %v690_v33, 0  ;;  %v769_v37 = vsel %vm428_vm5, %v758_v30, 0 }
 0x3d8   :  { %4960 = vmatpush3.bf16.xpose.msra.mxu0 %v634_v31  ;;  %4966 = vmatpush3.bf16.xpose.msra.mxu1 %v703_v32 }
 0x3d9   :  { %4969 = vmatprep.mubr.msk.bf16.mxu1 %vm428_vm5, %v6074_v56  ;;  %5350 = vmatprep.subr.msk.bf16.mxu1 %vm428_vm5, %v690_v33 }
 0x3da   :  { %5351 = vmatprep.subr.msk.bf16.mxu0 %vm428_vm5, %v758_v30  ;;  %v756_v36 = vpop.permute.xlu0 %755  ;;  %v824_v39 = vpop.permute.xlu1 %823 }
 0x3db   :  { %v766_v42 = vsel %vm428_vm5, %v756_v36, 0 }
 0x3de   :  { %v890_v38 = vpop.permute.xlu0 %889 }
 0x3df   :  { %4962 = vmatmul.mubr.msk.bf16.vlgmr.msra.gmra.mxu0 %vm428_vm5, %v6059_v43  ;;  %v835_v43 = vsel %vm428_vm5, %v824_v39, 0  ;;  %v822_v44 = vpop.permute.xlu1 %821 }
 0x3e0   :  { %4968 = vmatpush3.bf16.xpose.msra.mxu1 %v700_v34  ;;  %4974 = vmatpush3.bf16.xpose.msra.mxu0 %v769_v37  ;;  %v832_v49 = vsel %vm428_vm5, %v822_v44, 0 }
 0x3e1   :  { %4977 = vmatprep.mubr.msk.bf16.mxu0 %vm428_vm5, %v6082_v62  ;;  %5352 = vmatprep.subr.msk.bf16.mxu0 %vm428_vm5, %v756_v36 }
 0x3e2   :  { %5353 = vmatprep.subr.msk.bf16.mxu1 %vm428_vm5, %v824_v39  ;;  %v888_v40 = vpop.permute.xlu0 %887 }
 0x3e3   :  { %v1324_v50 = vpop.permute.xlu1 %1323  ;;  %v898_v54 = vsel %vm428_vm5, %v888_v40, 0 }
 0x3e4   :  { %v1333_v53 = vand.u32 %v1324_v50, %v6171_v48 }
 0x3e6   :  { %v1260_v45 = vpop.permute.xlu0 %1259 }
 0x3e7   :  { %4970 = vmatmul.mubr.msk.bf16.vlgmr.msra.gmra.mxu1 %vm428_vm5, %v6067_v51  ;;  %v901_v51 = vsel %vm428_vm5, %v890_v38, 0  ;;  %v1271_v52 = vand.u32 %v6171_v48, %v1260_v45  ;;  %v1322_v58 = vpop.permute.xlu1 %1321 }
 0x3e8   :  { %4976 = vmatpush3.bf16.xpose.msra.mxu0 %v766_v42  ;;  %4982 = vmatpush3.bf16.xpose.msra.mxu1 %v835_v43 }
 0x3e9   :  { %4985 = vmatprep.mubr.msk.bf16.mxu1 %vm428_vm5, %v6090_v9  ;;  %5354 = vmatprep.subr.msk.bf16.mxu1 %vm428_vm5, %v822_v44 }
 0x3ea   :  { %5355 = vmatprep.subr.msk.bf16.mxu0 %vm428_vm5, %v890_v38  ;;  %v1258_v46 = vpop.permute.xlu0 %1257 }
 0x3ef   :  { %4978 = vmatmul.mubr.msk.bf16.vlgmr.msra.gmra.mxu0 %vm428_vm5, %v6072_v55  ;;  %v1386_v55 = vpop.permute.xlu0 %1385 }
 0x3f0   :  { %4984 = vmatpush3.bf16.xpose.msra.mxu1 %v832_v49  ;;  %4990 = vmatpush3.bf16.xpose.msra.mxu0 %v901_v51  ;;  %v6186_v56 = vand.u32 %v1386_v55, %v6171_v48 }
 0x3f1   :  { %4993 = vmatprep.mubr.msk.bf16.mxu0 %vm428_vm5, %v6099_v14  ;;  %5356 = vmatprep.subr.msk.bf16.mxu0 %vm428_vm5, %v888_v40 }
 0x3f2   :  { %4997 = vmatprep.subr.bf16.mxu1 %v1271_v52 }
 0x3f3   :  { %v1448_v59 = vpop.permute.xlu0 %1447 }
 0x3f4   :  { %v6192_v60 = vand.u32 %v1448_v59, %v6171_v48 }
 0x3f7   :  { %4986 = vmatmul.mubr.msk.bf16.vlgmr.msra.gmra.mxu1 %vm428_vm5, %v6080_v61 }
 0x3f8   :  { %4992 = vmatpush3.bf16.xpose.msra.mxu0 %v898_v54  ;;  %4998 = vmatpush3.bf16.msra.mxu1 %v1271_v52 }
 0x3f9   :  { %4999 = vmatprep.subr.bf16.mxu1 %v1258_v46  ;;  %5005 = vmatprep.subr.bf16.mxu0 %v1333_v53 }
 0x3fc   :  { %5000 = vmatpush3.bf16.msra.mxu1 %v1258_v46 }
 0x3fd   :  { %5013 = vmatprep.subr.bf16.mxu1 %v6186_v56 }
 0x3ff   :  { %4994 = vmatmul.mubr.msk.bf16.vlgmr.msra.gmra.mxu0 %vm428_vm5, %v6088_v6 }
 0x400   :  { %5006 = vmatpush3.bf16.msra.mxu0 %v1333_v53 }
 0x401   :  { %5007 = vmatprep.subr.bf16.mxu0 %v1322_v58 }
 0x404   :  { %5008 = vmatpush3.bf16.msra.mxu0 %v1322_v58 }
 0x405   :  { %5021 = vmatprep.subr.bf16.mxu0 %v6192_v60 }
 0x43c   :  { %v4939_v61 = vpop.f32.mrf.mxu1 }
 0x43d   :  { %v6195_v63 = vmul.f32 0.35355338, %v4939_v61 }
 0x43e   :  { %v475_v0 = vpop.f32.mrf.mxu1 }
 0x43f   :  { %v6197_v57 = vmul.f32 0.35355338, %v475_v0  ;;  %v983_v2 = vsel %vm982_vm7, %v6195_v63, -inf }
 0x440   :  { %984 = vmax.xlane.f32.xlu0 %v983_v2  ;;  %v4940_v3 = vpop.f32.mrf.mxu1  ;;  %v4947_v4 = vpop.f32.mrf.mxu0 }
 0x441   :  { %v976_v10 = vsel %vm975_vm8, %v6197_v57, -inf  ;;  %v6205_v17 = vmul.f32 0.35355338, %v4947_v4 }
 0x442   :  { %977 = vmax.xlane.f32.xlu1 %v976_v10  ;;  %v478_v11 = vpop.f32.mrf.mxu1  ;;  %v541_v12 = vpop.f32.mrf.mxu0 }
 0x443   :  { %v6203_v15 = vmul.f32 0.35355338, %v478_v11  ;;  %v6211_v21 = vmul.f32 0.35355338, %v541_v12  ;;  %v992_v22 = vsel %vm982_vm7, %v6205_v17, -inf  ;;  %v6257_v10 = vpop.permute.xlu0 %1383 }
 0x444   :  { %v4948_v16 = vpop.f32.mrf.mxu0 }
 0x445   :  { %v979_v18 = vsel %vm975_vm8, %v6203_v15, -inf  ;;  %v986_v24 = vsel %vm975_vm8, %v6211_v21, -inf }
 0x446   :  { %980 = vmax.xlane.f32.xlu0 %v979_v18  ;;  %v544_v19 = vpop.f32.mrf.mxu0 }
 0x447   :  { %v6209_v5 = vmul.f32 0.35355338, %v544_v19 }
 0x449   :  { %v989_v23 = vsel %vm975_vm8, %v6209_v5, -inf }
 0x44a   :  { %993 = vmax.xlane.f32.xlu0 %v992_v22  ;;  %990 = vmax.xlane.f32.xlu1 %v989_v23 }
 0x44e   :  { %987 = vmax.xlane.f32.xlu0 %v986_v24 }
 0x497   :  { %v4955_v25 = vpop.f32.mrf.mxu1 }
 0x498   :  { %v6219_v26 = vmul.f32 0.35355338, %v4955_v25 }
 0x499   :  { %v607_v27 = vpop.f32.mrf.mxu1 }
 0x49a   :  { %v6221_v30 = vmul.f32 0.35355338, %v607_v27  ;;  %v1001_v31 = vsel %vm982_vm7, %v6219_v26, -inf  ;;  %v6271_v27 = vpop.permute.xlu0 %1509 }
 0x49b   :  { %v4956_v32 = vpop.f32.mrf.mxu1  ;;  %1002 = vmax.xlane.f32.xlu1 %v1001_v31 }
 0x49c   :  { %v995_v34 = vsel %vm975_vm8, %v6221_v30, -inf }
 0x49d   :  { %v610_v33 = vpop.f32.mrf.mxu1 }
 0x49e   :  { %v6225_v36 = vmul.f32 0.35355338, %v610_v33 }
 0x49f   :  { %996 = vmax.xlane.f32.xlu1 %v995_v34  ;;  %v4963_v37 = vpop.f32.mrf.mxu0 }
 0x4a0   :  { %v6229_v38 = vmul.f32 0.35355338, %v4963_v37  ;;  %v998_v39 = vsel %vm975_vm8, %v6225_v36, -inf }
 0x4a1   :  { %999 = vmax.xlane.f32.xlu0 %v998_v39  ;;  %v673_v40 = vpop.f32.mrf.mxu0 }
 0x4a2   :  { %v6233_v43 = vmul.f32 0.35355338, %v673_v40  ;;  %v1010_v44 = vsel %vm982_vm7, %v6229_v38, -inf  ;;  %v6279_v40 = vpop.permute.xlu0 %1571 }
 0x4a3   :  { %v4964_v42 = vpop.f32.mrf.mxu0 }
 0x4a4   :  { %v1004_v52 = vsel %vm975_vm8, %v6233_v43, -inf }
 0x4a5   :  { %1011 = vmax.xlane.f32.xlu0 %v1010_v44  ;;  %v676_v45 = vpop.f32.mrf.mxu0 }
 0x4a6   :  { %v6237_v47 = vmul.f32 0.35355338, %v676_v45 }
 0x4a7   :  { %v4971_v49 = vpop.f32.mrf.mxu1 }
 0x4a8   :  { %v6239_v51 = vmul.f32 0.35355338, %v4971_v49  ;;  %v1007_v46 = vsel %vm975_vm8, %v6237_v47, -inf }
 0x4a9   :  { %v739_v50 = vpop.f32.mrf.mxu1  ;;  %1005 = vmax.xlane.f32.xlu0 %v1004_v52  ;;  %1008 = vmax.xlane.f32.xlu1 %v1007_v46  ;;  %v6287_v52 = vpop.permute.xlu1 %1507 }
 0x4aa   :  { %v6245_v54 = vmul.f32 0.35355338, %v739_v50  ;;  %v1019_v55 = vsel %vm982_vm7, %v6239_v51, -inf }
 0x4ab   :  { %v4972_v53 = vpop.f32.mrf.mxu1 }
 0x4ac   :  { %v1013_v3 = vsel %vm975_vm8, %v6245_v54, -inf }
 0x4ad   :  { %v742_v58 = vpop.f32.mrf.mxu1  ;;  %1020 = vmax.xlane.f32.xlu1 %v1019_v55 }
 0x4ae   :  { %v6249_v59 = vmul.f32 0.35355338, %v742_v58  ;;  %v6293_v58 = vpop.permute.xlu0 %1633 }
 0x4af   :  { %v4979_v61 = vpop.f32.mrf.mxu0 }
 0x4b0   :  { %v6251_v0 = vmul.f32 0.35355338, %v4979_v61  ;;  %v1016_v2 = vsel %vm975_vm8, %v6249_v59, -inf  ;;  %v6295_v61 = vpop.permute.xlu1 %1445 }
 0x4b1   :  { %1017 = vmax.xlane.f32.xlu0 %v1016_v2  ;;  %1014 = vmax.xlane.f32.xlu1 %v1013_v3  ;;  %v805_v4 = vpop.f32.mrf.mxu0 }
 0x4b2   :  { %v6259_v12 = vmul.f32 0.35355338, %v805_v4  ;;  %v1028_v16 = vsel %vm982_vm7, %v6251_v0, -inf }
 0x4b3   :  { %v4980_v11 = vpop.f32.mrf.mxu0 }
 0x4b4   :  { %v1022_v24 = vsel %vm975_vm8, %v6259_v12, -inf }
 0x4b5   :  { %1029 = vmax.xlane.f32.xlu0 %v1028_v16  ;;  %v808_v18 = vpop.f32.mrf.mxu0 }
 0x4b6   :  { %v6263_v19 = vmul.f32 0.35355338, %v808_v18 }
 0x4b7   :  { %v4987_v22 = vpop.f32.mrf.mxu1 }
 0x4b8   :  { %v6265_v23 = vmul.f32 0.35355338, %v4987_v22  ;;  %v1025_v25 = vsel %vm975_vm8, %v6263_v19, -inf }
 0x4b9   :  { %v871_v31 = vpop.f32.mrf.mxu1  ;;  %1023 = vmax.xlane.f32.xlu0 %v1022_v24  ;;  %1026 = vmax.xlane.f32.xlu1 %v1025_v25 }
 0x4ba   :  { %v6273_v33 = vmul.f32 0.35355338, %v871_v31  ;;  %v1037_v34 = vsel %vm982_vm7, %v6265_v23, -inf }
 0x4bb   :  { %v4988_v32 = vpop.f32.mrf.mxu1 }
 0x4bc   :  { %v1031_v49 = vsel %vm975_vm8, %v6273_v33, -inf }
 0x4bd   :  { %v874_v37 = vpop.f32.mrf.mxu1  ;;  %1038 = vmax.xlane.f32.xlu1 %v1037_v34 }
 0x4be   :  { %v6277_v39 = vmul.f32 0.35355338, %v874_v37 }
 0x4bf   :  { %v4995_v42 = vpop.f32.mrf.mxu0 }
 0x4c0   :  { %v6281_v44 = vmul.f32 0.35355338, %v4995_v42  ;;  %v1034_v45 = vsel %vm975_vm8, %v6277_v39, -inf }
 0x4c1   :  { %1035 = vmax.xlane.f32.xlu0 %v1034_v45  ;;  %1032 = vmax.xlane.f32.xlu1 %v1031_v49  ;;  %v937_v46 = vpop.f32.mrf.mxu0 }
 0x4c2   :  { %v6289_v53 = vmul.f32 0.35355338, %v937_v46  ;;  %v1046_v55 = vsel %vm982_vm7, %v6281_v44, -inf }
 0x4c3   :  { %v4996_v50 = vpop.f32.mrf.mxu0 }
 0x4c4   :  { %v1040_v2 = vsel %vm975_vm8, %v6289_v53, -inf }
 0x4c5   :  { %1047 = vmax.xlane.f32.xlu0 %v1046_v55 }
 0x4c9   :  { %v985_v3 = vpop.xlane.xlu0 %984  ;;  %1041 = vmax.xlane.f32.xlu0 %v1040_v2 }
 0x4ca   :  { %v1051_v4 = vsub.f32 %v6195_v63, %v985_v3 }
 0x4cb   :  { %v978_v11 = vpop.xlane.xlu1 %977 }
 0x4cc   :  { %v1077_v16 = vmul.f32 1.442695, %v1051_v4  ;;  %v1049_v18 = vsub.f32 %v6197_v57, %v978_v11 }
 0x4ce   :  { %5550 = vpow2.f32 %v1077_v16  ;;  %v1073_v22 = vmul.f32 1.442695, %v1049_v18 }
 0x4cf   :  { %v981_v24 = vpop.xlane.xlu0 %980 }
 0x4d0   :  { %5552 = vpow2.f32 %v1073_v22  ;;  %v1050_v25 = vsub.f32 %v6203_v15, %v981_v24  ;;  %v940_v15 = vpop.f32.mrf.mxu0 }
 0x4d1   :  { %v6310_v50 = vmul.f32 0.35355338, %v940_v15 }
 0x4d2   :  { %v1075_v31 = vmul.f32 1.442695, %v1050_v25 }
 0x4d3   :  { %v994_v32 = vpop.xlane.xlu0 %993  ;;  %v1043_v2 = vsel %vm975_vm8, %v6310_v50, -inf  ;;  %v991_v18 = vpop.xlane.xlu1 %990 }
 0x4d4   :  { %5554 = vpow2.f32 %v1075_v31  ;;  %v1054_v34 = vsub.f32 %v6205_v17, %v994_v32  ;;  %v1053_v22 = vsub.f32 %v6209_v5, %v991_v18 }
 0x4d6   :  { %v1083_v37 = vmul.f32 1.442695, %v1054_v34  ;;  %v1081_v24 = vmul.f32 1.442695, %v1053_v22 }
 0x4d7   :  { %v988_v42 = vpop.xlane.xlu0 %987 }
 0x4d8   :  { %5556 = vpow2.f32 %v1083_v37  ;;  %v1052_v63 = vsub.f32 %v6211_v21, %v988_v42 }
 0x4da   :  { %v1079_v45 = vmul.f32 1.442695, %v1052_v63 }
 0x4db   :  { %v6304_v49 = vpop.eup %5550 }
 0x4dc   :  { %5558 = vpow2.f32 %v1079_v45  ;;  %v1127_v57 = vsel %vm982_vm7, %v6304_v49, 0.0 }
 0x4dd   :  { %v6308_v46 = vpop.eup %5552  ;;  %1128 = vadd.xlane.f32.xlu1 %v1127_v57  ;;  %5560 = vpow2.f32 %v1081_v24 }
 0x4de   :  { %v1121_v17 = vsel %vm975_vm8, %v6308_v46, 0.0 }
 0x4e1   :  { %v6314_v55 = vpop.eup %5554  ;;  %1122 = vadd.xlane.f32.xlu1 %v1121_v17 }
 0x4e2   :  { %v1124_v21 = vsel %vm975_vm8, %v6314_v55, 0.0 }
 0x4e3   :  { %1125 = vadd.xlane.f32.xlu0 %v1124_v21 }
 0x4e5   :  { %v6320_v3 = vpop.eup %5556  ;;  %1044 = vmax.xlane.f32.xlu1 %v1043_v2 }
 0x4e6   :  { %v1136_v4 = vsel %vm982_vm7, %v6320_v3, 0.0 }
 0x4e7   :  { %1137 = vadd.xlane.f32.xlu0 %v1136_v4 }
 0x4e9   :  { %v6324_v11 = vpop.eup %5558 }
 0x4ea   :  { %v1130_v16 = vsel %vm975_vm8, %v6324_v11, 0.0  ;;  %v6331_v25 = vpop.eup %5560 }
 0x4eb   :  { %1131 = vadd.xlane.f32.xlu0 %v1130_v16  ;;  %v1133_v31 = vsel %vm975_vm8, %v6331_v25, 0.0 }
 0x4f6   :  { %1569 = vrot.lane.b32.xlu1 %v6082_v62, %s5827_s16 }
 0x51a   :  { %1134 = vadd.xlane.f32.xlu1 %v1133_v31 }
 0x524   :  { %v1003_v32 = vpop.xlane.xlu1 %1002 }
 0x525   :  { %v1057_v34 = vsub.f32 %v6219_v26, %v1003_v32 }
 0x527   :  { %v1089_v37 = vmul.f32 1.442695, %v1057_v34 }
 0x528   :  { %v997_v42 = vpop.xlane.xlu1 %996 }
 0x529   :  { %5562 = vpow2.f32 %v1089_v37  ;;  %v1055_v63 = vsub.f32 %v6221_v30, %v997_v42 }
 0x52a   :  { %v1000_v62 = vpop.xlane.xlu0 %999 }
 0x52b   :  { %v1085_v45 = vmul.f32 1.442695, %v1055_v63  ;;  %v1056_v5 = vsub.f32 %v6225_v36, %v1000_v62 }
 0x52d   :  { %5564 = vpow2.f32 %v1085_v45  ;;  %v1087_v57 = vmul.f32 1.442695, %v1056_v5 }
 0x52e   :  { %v1012_v15 = vpop.xlane.xlu0 %1011 }
 0x52f   :  { %5566 = vpow2.f32 %v1087_v57  ;;  %v1060_v17 = vsub.f32 %v6229_v38, %v1012_v15 }
 0x531   :  { %v1095_v21 = vmul.f32 1.442695, %v1060_v17 }
 0x532   :  { %v1006_v2 = vpop.xlane.xlu0 %1005  ;;  %v1009_v4 = vpop.xlane.xlu1 %1008 }
 0x533   :  { %5568 = vpow2.f32 %v1095_v21  ;;  %v1058_v26 = vsub.f32 %v6233_v43, %v1006_v2  ;;  %v1059_v16 = vsub.f32 %v6237_v47, %v1009_v4 }
 0x535   :  { %v1091_v18 = vmul.f32 1.442695, %v1058_v26  ;;  %v1093_v30 = vmul.f32 1.442695, %v1059_v16 }
 0x536   :  { %v6341_v22 = vpop.eup %5562  ;;  %v1021_v24 = vpop.xlane.xlu1 %1020 }
 0x537   :  { %5570 = vpow2.f32 %v1091_v18  ;;  %v1063_v36 = vsub.f32 %v6239_v51, %v1021_v24  ;;  %v1145_v31 = vsel %vm982_vm7, %v6341_v22, 0.0 }
 0x538   :  { %5572 = vpow2.f32 %v1093_v30  ;;  %1146 = vadd.xlane.f32.xlu1 %v1145_v31 }
 0x539   :  { %v1101_v38 = vmul.f32 1.442695, %v1063_v36 }
 0x53a   :  { %v6346_v32 = vpop.eup %5564  ;;  %v1018_v34 = vpop.xlane.xlu0 %1017 }
 0x53b   :  { %v1015_v43 = vpop.xlane.xlu1 %1014  ;;  %5574 = vpow2.f32 %v1101_v38  ;;  %v1062_v47 = vsub.f32 %v6249_v59, %v1018_v34  ;;  %v1139_v42 = vsel %vm975_vm8, %v6346_v32, 0.0 }
 0x53c   :  { %v1061_v37 = vsub.f32 %v6245_v54, %v1015_v43  ;;  %v6352_v63 = vpop.eup %5566  ;;  %1140 = vadd.xlane.f32.xlu1 %v1139_v42 }
 0x53d   :  { %v1099_v51 = vmul.f32 1.442695, %v1062_v47  ;;  %v1142_v45 = vsel %vm975_vm8, %v6352_v63, 0.0 }
 0x53e   :  { %v1097_v62 = vmul.f32 1.442695, %v1061_v37  ;;  %v1030_v5 = vpop.xlane.xlu0 %1029  ;;  %1143 = vadd.xlane.f32.xlu0 %v1142_v45 }
 0x53f   :  { %5576 = vpow2.f32 %v1099_v51  ;;  %v1066_v57 = vsub.f32 %v6251_v0, %v1030_v5 }
 0x540   :  { %v6357_v15 = vpop.eup %5568  ;;  %5578 = vpow2.f32 %v1097_v62 }
 0x541   :  { %v1107_v54 = vmul.f32 1.442695, %v1066_v57  ;;  %v1154_v59 = vsel %vm982_vm7, %v6357_v15, 0.0 }
 0x542   :  { %v1027_v17 = vpop.xlane.xlu1 %1026  ;;  %1155 = vadd.xlane.f32.xlu0 %v1154_v59  ;;  %v1024_v16 = vpop.xlane.xlu0 %1023 }
 0x543   :  { %5580 = vpow2.f32 %v1107_v54  ;;  %v1065_v21 = vsub.f32 %v6263_v19, %v1027_v17 }
 0x544   :  { %v6362_v2 = vpop.eup %5570 }
 0x545   :  { %v6364_v4 = vpop.eup %5572  ;;  %v1105_v26 = vmul.f32 1.442695, %v1065_v21  ;;  %v1148_v0 = vsel %vm975_vm8, %v6362_v2, 0.0 }
 0x546   :  { %v1039_v18 = vpop.xlane.xlu1 %1038  ;;  %1149 = vadd.xlane.f32.xlu0 %v1148_v0  ;;  %v1151_v30 = vsel %vm975_vm8, %v6364_v4, 0.0 }
 0x547   :  { %v1069_v24 = vsub.f32 %v6265_v23, %v1039_v18  ;;  %1152 = vadd.xlane.f32.xlu1 %v1151_v30  ;;  %5582 = vpow2.f32 %v1105_v26 }
 0x548   :  { %v6371_v36 = vpop.eup %5574 }
 0x549   :  { %v1113_v19 = vmul.f32 1.442695, %v1069_v24  ;;  %v1163_v31 = vsel %vm982_vm7, %v6371_v36, 0.0 }
 0x54a   :  { %v1036_v38 = vpop.xlane.xlu0 %1035  ;;  %v1033_v34 = vpop.xlane.xlu1 %1032 }
 0x54b   :  { %5584 = vpow2.f32 %v1113_v19  ;;  %v1068_v43 = vsub.f32 %v6277_v39, %v1036_v38  ;;  %v1067_v47 = vsub.f32 %v6273_v33, %v1033_v34  ;;  %1164 = vadd.xlane.f32.xlu1 %v1163_v31  ;;  %v1064_v34 = vsub.f32 %v6259_v12, %v1024_v16 }
 0x54c   :  { %v6377_v37 = vpop.eup %5576 }
 0x54d   :  { %v6379_v42 = vpop.eup %5578  ;;  %v1109_v23 = vmul.f32 1.442695, %v1067_v47  ;;  %v1160_v51 = vsel %vm975_vm8, %v6377_v37, 0.0  ;;  %v1111_v62 = vmul.f32 1.442695, %v1068_v43 }
 0x54e   :  { %v1048_v45 = vpop.xlane.xlu0 %1047  ;;  %1161 = vadd.xlane.f32.xlu0 %v1160_v51  ;;  %v1157_v5 = vsel %vm975_vm8, %v6379_v42, 0.0 }
 0x54f   :  { %v1072_v57 = vsub.f32 %v6281_v44, %v1048_v45  ;;  %1158 = vadd.xlane.f32.xlu1 %v1157_v5  ;;  %5586 = vpow2.f32 %v1109_v23  ;;  %v1103_v23 = vmul.f32 1.442695, %v1064_v34 }
 0x550   :  { %v6386_v39 = vpop.eup %5580  ;;  %5588 = vpow2.f32 %v1111_v62 }
 0x551   :  { %v1172_v33 = vsel %vm982_vm7, %v6386_v39, 0.0  ;;  %v1119_v54 = vmul.f32 1.442695, %v1072_v57 }
 0x552   :  { %v1042_v38 = vpop.xlane.xlu0 %1041 }
 0x553   :  { %1173 = vadd.xlane.f32.xlu1 %v1172_v33  ;;  %5590 = vpow2.f32 %v1119_v54  ;;  %v1070_v51 = vsub.f32 %v6289_v53, %v1042_v38 }
 0x554   :  { %v6390_v59 = vpop.eup %5582 }
 0x555   :  { %v1169_v17 = vsel %vm975_vm8, %v6390_v59, 0.0  ;;  %v1115_v5 = vmul.f32 1.442695, %v1070_v51 }
 0x557   :  { %1170 = vadd.xlane.f32.xlu1 %v1169_v17 }
 0x558   :  { %v6394_v21 = vpop.eup %5584 }
 0x559   :  { %v1181_v44 = vsel %vm982_vm7, %v6394_v21, 0.0 }
 0x55b   :  { %1182 = vadd.xlane.f32.xlu1 %v1181_v44 }
 0x55c   :  { %v6398_v26 = vpop.eup %5586 }
 0x55d   :  { %v1175_v0 = vsel %vm975_vm8, %v6398_v26, 0.0  ;;  %v6402_v18 = vpop.eup %5588 }
 0x55e   :  { %v1178_v30 = vsel %vm975_vm8, %v6402_v18, 0.0 }
 0x55f   :  { %1176 = vadd.xlane.f32.xlu1 %v1175_v0 }
 0x560   :  { %v6406_v24 = vpop.eup %5590 }
 0x561   :  { %v1190_v31 = vsel %vm982_vm7, %v6406_v24, 0.0 }
 0x563   :  { %1179 = vadd.xlane.f32.xlu1 %v1178_v30 }
 0x564   :  { %1695 = vrot.lane.b32.xlu0 %v6088_v6, %s5827_s16 }
 0x566   :  { %v1129_v19 = vpop.xlane.xlu1 %1128 }
 0x567   :  { %1191 = vadd.xlane.f32.xlu1 %v1190_v31  ;;  %5592 = vrcp.f32 %v1129_v19 }
 0x56a   :  { %v1123_v43 = vpop.xlane.xlu1 %1122 }
 0x56b   :  { %5594 = vrcp.f32 %v1123_v43 }
 0x56c   :  { %v1126_v47 = vpop.xlane.xlu0 %1125 }
 0x56d   :  { %5596 = vrcp.f32 %v1126_v47 }
 0x56e   :  { %v1045_v62 = vpop.xlane.xlu1 %1044  ;;  %5598 = vpow2.f32 %v1103_v23 }
 0x56f   :  { %v1071_v45 = vsub.f32 %v6310_v50, %v1045_v62 }
 0x570   :  { %v1138_v19 = vpop.xlane.xlu0 %1137 }
 0x571   :  { %v1117_v6 = vmul.f32 1.442695, %v1071_v45 }
 0x572   :  { %v6441_v31 = vpop.permute.xlu1 %1569 }
 0x573   :  { %5600 = vpow2.f32 %v1117_v6 }
 0x574   :  { %5602 = vpow2.f32 %v1115_v5  ;;  %v5593_v57 = vpop.eup %5592  ;;  %v1132_v38 = vpop.xlane.xlu0 %1131 }
 0x575   :  { %v1219_v12 = vmul.f32 %v5593_v57, %v6304_v49  ;;  %5604 = vrcp.f32 %v1138_v19  ;;  %v1643_v19 = vand.u32 %v6293_v58, %v6171_v48 }
 0x576   :  { %5606 = vrcp.f32 %v1132_v38 }
 0x577   :  { %v1242_v0 = vpack.c.bf16 %v1219_v12, %v1219_v12 }
 0x578   :  { %v5595_v33 = vpop.eup %5594 }
 0x579   :  { %v1217_v16 = vmul.f32 %v5595_v33, %v6308_v46 }
 0x57a   :  { %v5597_v54 = vpop.eup %5596 }
 0x57b   :  { %v1218_v17 = vmul.f32 %v5597_v54, %v6314_v55  ;;  %v6418_v53 = vpop.eup %5598  ;;  %v1519_v55 = vand.u32 %v6271_v27, %v6171_v48 }
 0x57c   :  { %v1166_v49 = vsel %vm975_vm8, %v6418_v53, 0.0 }
 0x57d   :  { %v1241_v44 = vpack.c.bf16 %v1218_v17, %v1217_v16 }
 0x57f   :  { %5001 = vmatprep.mubr.msk.bf16.mxu1 %vm975_vm8, %v1241_v44 }
 0x580   :  { %v6421_v50 = vpop.eup %5600  ;;  %5002 = vmatmul.mubr.msk.bf16.vlgmr.msra.gmra.mxu1 %vm975_vm8, %v1242_v0 }
 0x581   :  { %5014 = vmatpush3.bf16.msra.mxu1 %v6186_v56  ;;  %v1187_v30 = vsel %vm975_vm8, %v6421_v50, 0.0  ;;  %v6430_v46 = vpop.eup %5602 }
 0x582   :  { %5015 = vmatprep.subr.bf16.mxu1 %v6257_v10  ;;  %1188 = vadd.xlane.f32.xlu1 %v1187_v30  ;;  %v1184_v56 = vsel %vm975_vm8, %v6430_v46, 0.0 }
 0x583   :  { %1167 = vadd.xlane.f32.xlu0 %v1166_v49 }
 0x585   :  { %5016 = vmatpush3.bf16.msra.mxu1 %v6257_v10  ;;  %v5605_v10 = vpop.eup %5604 }
 0x586   :  { %5029 = vmatprep.subr.bf16.mxu1 %v1519_v55  ;;  %v5607_v34 = vpop.eup %5606  ;;  %v1222_v47 = vmul.f32 %v5605_v10, %v6320_v3 }
 0x587   :  { %1185 = vadd.xlane.f32.xlu0 %v1184_v56  ;;  %v1220_v23 = vmul.f32 %v5607_v34, %v6324_v11 }
 0x588   :  { %v1244_v62 = vpack.c.bf16 %v1222_v47, %v1222_v47 }
 0x593   :  { %1631 = vrot.lane.b32.xlu1 %v6090_v9, %s5827_s16 }
 0x59d   :  { %1693 = vrot.lane.b32.xlu0 %v6099_v14, %s5827_s16  ;;  %v1581_v14 = vand.u32 %v6279_v40, %v6171_v48 }
 0x5a3   :  { %v1135_v27 = vpop.xlane.xlu1 %1134 }
 0x5a4   :  { %5608 = vrcp.f32 %v1135_v27 }
 0x5b1   :  { %v5609_v43 = vpop.eup %5608 }
 0x5b2   :  { %v1221_v9 = vmul.f32 %v5609_v43, %v6331_v25 }
 0x5b4   :  { %v1243_v51 = vpack.c.bf16 %v1221_v9, %v1220_v23 }
 0x5b6   :  { %5009 = vmatprep.mubr.msk.bf16.mxu0 %vm975_vm8, %v1243_v51 }
 0x5b7   :  { %5010 = vmatmul.mubr.msk.bf16.vlgmr.msra.gmra.mxu0 %vm975_vm8, %v1244_v62 }
 0x5b8   :  { %5022 = vmatpush3.bf16.msra.mxu0 %v6192_v60 }
 0x5b9   :  { %5023 = vmatprep.subr.bf16.mxu0 %v6295_v61 }
 0x5bc   :  { %5024 = vmatpush3.bf16.msra.mxu0 %v6295_v61 }
 0x5bd   :  { %5037 = vmatprep.subr.bf16.mxu0 %v1581_v14 }
 0x5c1   :  { %v1147_v3 = vpop.xlane.xlu1 %1146 }
 0x5c2   :  { %5610 = vrcp.f32 %v1147_v3 }
 0x5c5   :  { %v1141_v11 = vpop.xlane.xlu1 %1140 }
 0x5c6   :  { %5612 = vrcp.f32 %v1141_v11 }
 0x5c7   :  { %v1144_v25 = vpop.xlane.xlu0 %1143 }
 0x5c8   :  { %5614 = vrcp.f32 %v1144_v25 }
 0x5cb   :  { %v1156_v45 = vpop.xlane.xlu0 %1155 }
 0x5cc   :  { %5616 = vrcp.f32 %v1156_v45 }
 0x5cf   :  { %v1150_v6 = vpop.xlane.xlu0 %1149  ;;  %v5611_v60 = vpop.eup %5610 }
 0x5d0   :  { %5618 = vrcp.f32 %v1150_v6  ;;  %v1153_v5 = vpop.xlane.xlu1 %1152  ;;  %v1225_v40 = vmul.f32 %v5611_v60, %v6341_v22 }
 0x5d1   :  { %5620 = vrcp.f32 %v1153_v5 }
 0x5d2   :  { %v1246_v0 = vpack.c.bf16 %v1225_v40, %v1225_v40 }
 0x5d3   :  { %v5613_v57 = vpop.eup %5612 }
 0x5d4   :  { %v1165_v33 = vpop.xlane.xlu1 %1164  ;;  %v1223_v61 = vmul.f32 %v5613_v57, %v6346_v32 }
 0x5d5   :  { %v5615_v54 = vpop.eup %5614  ;;  %5622 = vrcp.f32 %v1165_v33 }
 0x5d6   :  { %v1224_v12 = vmul.f32 %v5615_v54, %v6352_v63 }
 0x5d7   :  { %v1162_v16 = vpop.xlane.xlu0 %1161 }
 0x5d8   :  { %5624 = vrcp.f32 %v1162_v16  ;;  %v1159_v17 = vpop.xlane.xlu1 %1158  ;;  %v1245_v44 = vpack.c.bf16 %v1224_v12, %v1223_v61 }
 0x5d9   :  { %5626 = vrcp.f32 %v1159_v17  ;;  %v5617_v30 = vpop.eup %5616 }
 0x5da   :  { %5017 = vmatprep.mubr.msk.bf16.mxu1 %vm975_vm8, %v1245_v44  ;;  %v1228_v63 = vmul.f32 %v5617_v30, %v6357_v15 }
 0x5db   :  { %5018 = vmatmul.mubr.msk.bf16.vlgmr.msra.gmra.mxu1 %vm975_vm8, %v1246_v0  ;;  %v1696_v47 = vpop.permute.xlu0 %1695 }
 0x5dc   :  { %5030 = vmatpush3.bf16.msra.mxu1 %v1519_v55  ;;  %v1174_v49 = vpop.xlane.xlu1 %1173  ;;  %v1248_v55 = vpack.c.bf16 %v1228_v63, %v1228_v63  ;;  %v1705_v23 = vand.u32 %v1696_v47, %v6171_v48 }
 0x5dd   :  { %v5619_v56 = vpop.eup %5618  ;;  %5031 = vmatprep.subr.bf16.mxu1 %v6287_v52 }
 0x5de   :  { %v5621_v22 = vpop.eup %5620  ;;  %v1226_v32 = vmul.f32 %v5619_v56, %v6362_v2 }
 0x5df   :  { %v1227_v38 = vmul.f32 %v5621_v22, %v6364_v4 }
 0x5e0   :  { %5032 = vmatpush3.bf16.msra.mxu1 %v6287_v52  ;;  %v1171_v27 = vpop.xlane.xlu1 %1170 }
 0x5e1   :  { %5045 = vmatprep.subr.bf16.mxu1 %v1643_v19  ;;  %v1247_v10 = vpack.c.bf16 %v1227_v38, %v1226_v32 }
 0x5e2   :  { %v5623_v34 = vpop.eup %5622 }
 0x5e3   :  { %5025 = vmatprep.mubr.msk.bf16.mxu0 %vm975_vm8, %v1247_v10  ;;  %v1231_v52 = vmul.f32 %v5623_v34, %v6371_v36 }
 0x5e4   :  { %5026 = vmatmul.mubr.msk.bf16.vlgmr.msra.gmra.mxu0 %vm975_vm8, %v1248_v55  ;;  %v1183_v43 = vpop.xlane.xlu1 %1182 }
 0x5e5   :  { %v5625_v2 = vpop.eup %5624  ;;  %5038 = vmatpush3.bf16.msra.mxu0 %v1581_v14  ;;  %v1250_v62 = vpack.c.bf16 %v1231_v52, %v1231_v52 }
 0x5e6   :  { %v5627_v15 = vpop.eup %5626  ;;  %5039 = vmatprep.subr.bf16.mxu0 %v6441_v31  ;;  %v1230_v58 = vmul.f32 %v5625_v2, %v6377_v37 }
 0x5e7   :  { %v1229_v4 = vmul.f32 %v5627_v15, %v6379_v42 }
 0x5e8   :  { %v1177_v9 = vpop.xlane.xlu1 %1176 }
 0x5e9   :  { %5040 = vmatpush3.bf16.msra.mxu0 %v6441_v31  ;;  %v1249_v51 = vpack.c.bf16 %v1230_v58, %v1229_v4  ;;  %5628 = vrcp.f32 %v1177_v9 }
 0x5ea   :  { %5053 = vmatprep.subr.bf16.mxu0 %v1705_v23 }
 0x5eb   :  { %5033 = vmatprep.mubr.msk.bf16.mxu1 %vm975_vm8, %v1249_v51 }
 0x5ec   :  { %5034 = vmatmul.mubr.msk.bf16.vlgmr.msra.gmra.mxu1 %vm975_vm8, %v1250_v62  ;;  %v1180_v14 = vpop.xlane.xlu1 %1179 }
 0x5ed   :  { %5046 = vmatpush3.bf16.msra.mxu1 %v1643_v19  ;;  %5630 = vrcp.f32 %v1180_v14 }
 0x5ee   :  { %5632 = vrcp.f32 %v1183_v43 }
 0x5ef   :  { %5634 = vrcp.f32 %v1174_v49 }
 0x5f0   :  { %v1192_v31 = vpop.xlane.xlu1 %1191  ;;  %5636 = vrcp.f32 %v1171_v27 }
 0x5f6   :  { %v5629_v37 = vpop.eup %5628 }
 0x5f7   :  { %v1235_v42 = vmul.f32 %v5629_v37, %v6398_v26 }
 0x5fa   :  { %v5631_v36 = vpop.eup %5630 }
 0x5fb   :  { %v1236_v3 = vmul.f32 %v5631_v36, %v6402_v18  ;;  %v5633_v25 = vpop.eup %5632 }
 0x5fc   :  { %v1237_v5 = vmul.f32 %v5633_v25, %v6394_v21  ;;  %v5635_v18 = vpop.eup %5634 }
 0x5fd   :  { %v1253_v11 = vpack.c.bf16 %v1236_v3, %v1235_v42  ;;  %v5637_v33 = vpop.eup %5636  ;;  %v1234_v21 = vmul.f32 %v5635_v18, %v6386_v39 }
 0x5fe   :  { %v1254_v26 = vpack.c.bf16 %v1237_v5, %v1237_v5  ;;  %v1233_v61 = vmul.f32 %v5637_v33, %v6390_v59 }
 0x5ff   :  { %5049 = vmatprep.mubr.msk.bf16.mxu1 %vm975_vm8, %v1253_v11  ;;  %v1252_v44 = vpack.c.bf16 %v1234_v21, %v1234_v21 }
 0x60b   :  { %v1189_v45 = vpop.xlane.xlu1 %1188 }
 0x60c   :  { %v1168_v6 = vpop.xlane.xlu0 %1167 }
 0x60d   :  { %5638 = vrcp.f32 %v1168_v6 }
 0x60e   :  { %5640 = vrcp.f32 %v1189_v45 }
 0x60f   :  { %v1632_v60 = vpop.permute.xlu1 %1631 }
 0x610   :  { %v1186_v57 = vpop.xlane.xlu0 %1185  ;;  %5047 = vmatprep.subr.bf16.mxu1 %v1632_v60 }
 0x611   :  { %5642 = vrcp.f32 %v1186_v57  ;;  %5048 = vmatpush3.bf16.msra.mxu1 %v1632_v60 }
 0x612   :  { %5644 = vrcp.f32 %v1192_v31  ;;  %5061 = vmatprep.subr.bf16.mxu1 %v5824_v1 }
 0x614   :  { %5050 = vmatmul.mubr.msk.bf16.vlgmr.msra.gmra.mxu1 %vm975_vm8, %v1254_v26  ;;  %v1694_v56 = vpop.permute.xlu0 %1693 }
 0x615   :  { %5065 = vmatprep.mubr.msk.bf16.mxu1 %vm5825_vm0, %v5824_v1 }
 0x61a   :  { %v5639_v54 = vpop.eup %5638 }
 0x61b   :  { %v1232_v40 = vmul.f32 %v5639_v54, %v6418_v53  ;;  %v5641_v12 = vpop.eup %5640 }
 0x61c   :  { %v1239_v49 = vmul.f32 %v5641_v12, %v6421_v50  ;;  %v5796_v50 = vld [vmem:[%s7446_s3 + $0x10] ss:$8 sps:$4 sm:$0xff]  }
 0x61d   :  { %v1251_v16 = vpack.c.bf16 %v1233_v61, %v1232_v40  ;;  %1864 = vrot.lane.b32.xlu1 %v5796_v50, %s5832_s22  ;;  %v6533_v61 = vld [vmem:[%s7448_s5] ss:$2 sm:$0xf] }
 0x61e   :  { %v5643_v17 = vpop.eup %5642 }
 0x61f   :  { %v5645_v0 = vpop.eup %5644  ;;  %5041 = vmatprep.mubr.msk.bf16.mxu0 %vm975_vm8, %v1251_v16  ;;  %v1238_v30 = vmul.f32 %v5643_v17, %v6430_v46 }
 0x620   :  { %5042 = vmatmul.mubr.msk.bf16.vlgmr.msra.gmra.mxu0 %vm975_vm8, %v1252_v44  ;;  %v1240_v53 = vmul.f32 %v5645_v0, %v6406_v24  ;;  %v5797_v24 = vld [vmem:[%s7446_s3] ss:$8 sps:$4 sm:$0xff]  }
 0x621   :  { %5054 = vmatpush3.bf16.msra.mxu0 %v1705_v23  ;;  %v1255_v39 = vpack.c.bf16 %v1239_v49, %v1238_v30  ;;  %1862 = vrot.lane.b32.xlu1 %v5797_v24, %s5832_s22 }
 0x622   :  { %5055 = vmatprep.subr.bf16.mxu0 %v1694_v56  ;;  %v1256_v59 = vpack.c.bf16 %v1240_v53, %v1240_v53 }
 0x623   :  { %5057 = vmatprep.mubr.msk.bf16.mxu0 %vm975_vm8, %v1255_v39 }
 0x625   :  { %5056 = vmatpush3.bf16.msra.mxu0 %v1694_v56 }
 0x626   :  { %5077 = vmatprep.subr.bf16.mxu0 %v5824_v1 }
 0x628   :  { %5058 = vmatmul.mubr.msk.bf16.vlgmr.msra.gmra.mxu0 %vm975_vm8, %v1256_v59 }
 0x629   :  { %5081 = vmatprep.mubr.msk.bf16.mxu0 %vm5825_vm0, %v5824_v1 }
 0x640   :  { %v6504_v46 = vpop.f32.mrf.mxu1 }
 0x642   :  { %v6506_v22 = vpop.f32.mrf.mxu1 }
 0x644   :  { %v5004_v32 = vpop.f32.mrf.mxu1 }
 0x646   :  { %v6512_v27 = vpop.f32.mrf.mxu1 }
 0x677   :  { %v6508_v63 = vpop.f32.mrf.mxu0 }
 0x679   :  { %v6510_v19 = vpop.f32.mrf.mxu0 }
 0x67b   :  { %v5012_v38 = vpop.f32.mrf.mxu0 }
 0x67d   :  { %v6514_v47 = vpop.f32.mrf.mxu0 }
 0x68f   :  { %v1865_v43 = vpop.permute.xlu1 %1864 }
 0x690   :  { %5062 = vmatpush3.bf16.msra.mxu1 %v1865_v43 }
 0x691   :  { %5063 = vmatprep.subr.bf16.mxu1 %v5824_v1 }
 0x693   :  { %v1863_v52 = vpop.permute.xlu1 %1862 }
 0x694   :  { %5064 = vmatpush3.bf16.msra.mxu1 %v1863_v52 }
 0x695   :  { %5093 = vmatprep.subr.bf16.mxu1 %v5824_v1 }
 0x69b   :  { %v5019_v10 = vpop.f32.mrf.mxu1 }
 0x69d   :  { %v1431_v55 = vpop.f32.mrf.mxu1 }
 0x69f   :  { %v5020_v34 = vpop.f32.mrf.mxu1 }
 0x6a1   :  { %v1434_v2 = vpop.f32.mrf.mxu1 }
 0x6a2   :  { %v5416_v15 = vpack.i.bf16 %v1434_v2, %v1431_v55 }
 0x6a4   :  { %v5027_v58 = vpop.f32.mrf.mxu0  ;;  %5417 = vrot.lane.b32.xlu0 %v5416_v15, %s5833_s24 }
 0x6a6   :  { %v1493_v4 = vpop.f32.mrf.mxu0 }
 0x6a8   :  { %v5028_v23 = vpop.f32.mrf.mxu0 }
 0x6aa   :  { %v1496_v9 = vpop.f32.mrf.mxu0 }
 0x6ab   :  { %v5421_v51 = vpack.i.bf16 %v1496_v9, %v1493_v4 }
 0x6ac   :  { %v5035_v62 = vpop.f32.mrf.mxu1 }
 0x6ad   :  { %5422 = vrot.lane.b32.xlu0 %v5421_v51, %s5833_s24 }
 0x6ae   :  { %v1555_v14 = vpop.f32.mrf.mxu1 }
 0x6b0   :  { %v5036_v37 = vpop.f32.mrf.mxu1 }
 0x6b2   :  { %v1558_v36 = vpop.f32.mrf.mxu1 }
 0x6b3   :  { %v5426_v42 = vpack.i.bf16 %v1558_v36, %v1555_v14 }
 0x6b5   :  { %5427 = vrot.lane.b32.xlu1 %v5426_v42, %s5834_s25 }
 0x6d4   :  { %v5051_v3 = vpop.f32.mrf.mxu1 }
 0x6d6   :  { %v1679_v11 = vpop.f32.mrf.mxu1 }
 0x6d8   :  { %v5052_v31 = vpop.f32.mrf.mxu1 }
 0x6da   :  { %v1682_v25 = vpop.f32.mrf.mxu1 }
 0x6db   :  { %v5436_v45 = vpack.i.bf16 %v1682_v25, %v1679_v11 }
 0x6dd   :  { %5437 = vrot.lane.b32.xlu0 %v5436_v45, %s5835_s26 }
 0x6e0   :  { %v5043_v6 = vpop.f32.mrf.mxu0 }
 0x6e1   :  { %1762 = vrot.lane.b32.xlu0 %v5019_v10, %s5833_s24 }
 0x6e2   :  { %v1617_v5 = vpop.f32.mrf.mxu0 }
 0x6e4   :  { %v5044_v60 = vpop.f32.mrf.mxu0 }
 0x6e5   :  { %1774 = vrot.lane.b32.xlu0 %v5035_v62, %s5834_s25 }
 0x6e6   :  { %v1620_v57 = vpop.f32.mrf.mxu0 }
 0x6e7   :  { %v5431_v26 = vpack.i.bf16 %v1620_v57, %v1617_v5 }
 0x6e8   :  { %v5059_v18 = vpop.f32.mrf.mxu0 }
 0x6e9   :  { %5432 = vrot.lane.b32.xlu1 %v5431_v26, %s5834_s25  ;;  %1809 = vrot.lane.b32.xlu0 %v5027_v58, %s5833_s24 }
 0x6ea   :  { %v1741_v33 = vpop.f32.mrf.mxu0 }
 0x6ec   :  { %v5060_v54 = vpop.f32.mrf.mxu0 }
 0x6ed   :  { %1833 = vrot.lane.b32.xlu0 %v5059_v18, %s5835_s26 }
 0x6ee   :  { %v1744_v21 = vpop.f32.mrf.mxu0 }
 0x6ef   :  { %v5441_v40 = vpack.i.bf16 %v1744_v21, %v1741_v33 }
 0x6f1   :  { %5442 = vrot.lane.b32.xlu1 %v5441_v40, %s5835_s26 }
 0x6f5   :  { %1786 = vrot.lane.b32.xlu1 %v5051_v3, %s5835_s26 }
 0x6f9   :  { %1821 = vrot.lane.b32.xlu1 %v5043_v6, %s5834_s25 }
 0x6fd   :  { %1938 = vrot.lane.b32.xlu1 %v6533_v61, %s5826_s13 }
 0x716   :  { %v5418_v12 = vpop.permute.xlu0 %5417 }
 0x717   :  { %v5420_v44 = vunpack.i.h.bf16 %v5418_v12  ;;  %v5419_v0 = vunpack.i.l.bf16 %v5418_v12 }
 0x719   :  { %v1792_v39 = vsel %vm428_vm5, %v6512_v27, %v5420_v44  ;;  %v1791_v53 = vsel %vm428_vm5, %v6506_v22, %v5419_v0 }
 0x71f   :  { %v5423_v17 = vpop.permute.xlu0 %5422 }
 0x720   :  { %v5425_v43 = vunpack.i.h.bf16 %v5423_v17  ;;  %v5424_v22 = vunpack.i.l.bf16 %v5423_v17 }
 0x722   :  { %v1839_v4 = vsel %vm428_vm5, %v6514_v47, %v5425_v43  ;;  %v1838_v23 = vsel %vm428_vm5, %v6510_v19, %v5424_v22 }
 0x727   :  { %v5428_v16 = vpop.permute.xlu1 %5427 }
 0x728   :  { %v5430_v30 = vunpack.i.h.bf16 %v5428_v16  ;;  %v5429_v49 = vunpack.i.l.bf16 %v5428_v16 }
 0x72a   :  { %v1796_v24 = vsel %vm1794_vm9, %v1792_v39, %v5430_v30  ;;  %v1795_v32 = vsel %vm1794_vm9, %v1791_v53, %v5429_v49 }
 0x74f   :  { %v5438_v56 = vpop.permute.xlu0 %5437 }
 0x750   :  { %v5440_v59 = vunpack.i.h.bf16 %v5438_v56  ;;  %v5439_v50 = vunpack.i.l.bf16 %v5438_v56 }
 0x752   :  { %v1799_v38 = vsel %vm1798_vm10, %v1795_v32, %v5439_v50  ;;  %v1800_v10 = vsel %vm1798_vm10, %v1796_v24, %v5440_v59 }
 0x753   :  { %v1859_v55 = vpack.c.bf16 %v1800_v10, %v1799_v38  ;;  %v1763_v27 = vpop.permute.xlu0 %1762 }
 0x754   :  { %v1793_v37 = vsel %vm428_vm5, %v6504_v46, %v1763_v27 }
 0x755   :  { %5066 = vmatmul.mubr.msk.bf16.vlgmr.msra.gmra.mxu1 %vm161_vm3, %v1859_v55 }
 0x756   :  { %5069 = vmatprep.mubr.msk.bf16.mxu1 %vm5825_vm0, %v5824_v1 }
 0x757   :  { %v1775_v2 = vpop.permute.xlu0 %1774 }
 0x758   :  { %v1797_v11 = vsel %vm1794_vm9, %v1793_v37, %v1775_v2 }
 0x75b   :  { %v5433_v34 = vpop.permute.xlu1 %5432  ;;  %v1810_v36 = vpop.permute.xlu0 %1809 }
 0x75c   :  { %v5435_v15 = vunpack.i.h.bf16 %v5433_v34  ;;  %v5434_v58 = vunpack.i.l.bf16 %v5433_v34  ;;  %v1840_v46 = vsel %vm428_vm5, %v6508_v63, %v1810_v36 }
 0x75e   :  { %v1842_v62 = vsel %vm1794_vm9, %v1839_v4, %v5435_v15  ;;  %v1841_v14 = vsel %vm1794_vm9, %v1838_v23, %v5434_v58 }
 0x75f   :  { %v1834_v57 = vpop.permute.xlu0 %1833 }
 0x763   :  { %v5443_v52 = vpop.permute.xlu1 %5442 }
 0x764   :  { %v5445_v9 = vunpack.i.h.bf16 %v5443_v52  ;;  %v5444_v51 = vunpack.i.l.bf16 %v5443_v52 }
 0x766   :  { %v1844_v42 = vsel %vm1798_vm10, %v1841_v14, %v5444_v51  ;;  %v1845_v3 = vsel %vm1798_vm10, %v1842_v62, %v5445_v9 }
 0x767   :  { %v1850_v47 = vrot.slane %v1844_v42, 7  ;;  %v1851_v31 = vrot.slane %v1845_v3, 7  ;;  %v1787_v25 = vpop.permute.xlu1 %1786 }
 0x768   :  { %v1801_v19 = vsel %vm1798_vm10, %v1797_v11, %v1787_v25 }
 0x769   :  { %v1852_v45 = vsel %vm56_vm2, %v1850_v47, %v1851_v31  ;;  %v1858_v6 = vsel %vm56_vm2, %v1801_v19, %v1850_v47 }
 0x76a   :  { %v1860_v5 = vpack.c.bf16 %v1852_v45, %v1858_v6 }
 0x76b   :  { %v1822_v60 = vpop.permute.xlu1 %1821 }
 0x76c   :  { %v1843_v26 = vsel %vm1794_vm9, %v1840_v46, %v1822_v60  ;;  %5070 = vmatmul.mubr.msk.bf16.gmra.mxu1 %vm161_vm3, %v1860_v5 }
 0x76d   :  { %v1846_v18 = vsel %vm1798_vm10, %v1843_v26, %v1834_v57  ;;  %5073 = vmatprep.mubr.msk.bf16.mxu1 %vm5825_vm0, %v5824_v1 }
 0x76e   :  { %v1853_v33 = vrot.slane %v1846_v18, 7 }
 0x76f   :  { %v1939_v63 = vpop.permute.xlu1 %1938 }
 0x770   :  { %v1854_v54 = vsel %vm56_vm2, %v1851_v31, %v1853_v33  ;;  %v1940_v40 = vrot.slane %v1939_v63, 1  ;;  %v5514_v33 = vld [vmem:[%s7446_s3 + $0x14] ss:$8 sps:$4 sm:$0xff]  }
 0x771   :  { %v1861_v21 = vpack.c.bf16 %v1854_v54, %v1854_v54  ;;  %5078 = vmatpush3.bf16.msra.mxu0 %v5514_v33  ;;  %v5515_v54 = vld [vmem:[%s7446_s3 + $0x4] ss:$8 sps:$4 sm:$0xff]  }
 0x772   :  { %v1944_v12 = vrot.slane %v1940_v40, %v5991_v8  ;;  %5079 = vmatprep.subr.bf16.mxu0 %v5824_v1  ;;  %v5523_v33 = vld [vmem:[%s7447_s4] sm:$0xff]  }
 0x774   :  { %5074 = vmatmul.mubr.msk.bf16.gmra.mxu1 %vm161_vm3, %v1861_v21 }
 0x775   :  { %5109 = vmatprep.mubr.msk.bf16.mxu1 %vm5825_vm0, %v5824_v1  ;;  %5080 = vmatpush3.bf16.msra.mxu0 %v5515_v54  ;;  %v2045_v54 = vrot.slane %v6533_v61, 2 }
 0x776   :  { %5121 = vmatprep.subr.bf16.mxu0 %v5824_v1 }
 0x815   :  { %v1911_v16 = vpop.f32.mrf.mxu1 }
 0x816   :  { %v1933_v17 = vadd.f32 %v1911_v16, %v5943_v20 }
 0x817   :  { %v5067_v44 = vpop.f32.mrf.mxu1 }
 0x818   :  { %v6575_v0 = vadd.f32 %v1944_v12, %v1933_v17 }
 0x819   :  { %v1914_v30 = vpop.f32.mrf.mxu1 }
 0x81a   :  { %v1934_v49 = vadd.f32 %v1914_v30, %v5948_v28  ;;  %v1951_v56 = vsel %vm161_vm3, %v6575_v0, 0.0 }
 0x81b   :  { %1952 = vadd.xlane.f32.xlu0 %v1951_v56  ;;  %v5068_v39 = vpop.f32.mrf.mxu1 }
 0x81c   :  { %v6580_v53 = vadd.f32 %v1944_v12, %v1934_v49 }
 0x81e   :  { %v1954_v59 = vsel %vm161_vm3, %v6580_v53, 0.0 }
 0x81f   :  { %1955 = vadd.xlane.f32.xlu1 %v1954_v59 }
 0x82c   :  { %v1919_v50 = vpop.f32.mrf.mxu1 }
 0x82d   :  { %v1935_v20 = vadd.f32 %v1919_v50, %v5955_v35 }
 0x82e   :  { %v5071_v24 = vpop.f32.mrf.mxu1 }
 0x82f   :  { %v6585_v32 = vadd.f32 %v1944_v12, %v1935_v20 }
 0x830   :  { %v1922_v38 = vpop.f32.mrf.mxu1 }
 0x831   :  { %v1936_v28 = vadd.f32 %v1922_v38, %v5962_v41  ;;  %v1957_v10 = vsel %vm161_vm3, %v6585_v32, 0.0 }
 0x832   :  { %1958 = vadd.xlane.f32.xlu0 %v1957_v10  ;;  %v5072_v55 = vpop.f32.mrf.mxu1 }
 0x833   :  { %v6590_v27 = vadd.f32 %v1944_v12, %v1936_v28 }
 0x834   :  { %v1927_v34 = vpop.f32.mrf.mxu1 }
 0x835   :  { %v1937_v43 = vadd.f32 %v1927_v34, %v5950_v29  ;;  %v1960_v22 = vsel %vm161_vm3, %v6590_v27, 0.0 }
 0x836   :  { %1961 = vadd.xlane.f32.xlu0 %v1960_v22  ;;  %v5075_v35 = vpop.f32.mrf.mxu1 }
 0x837   :  { %v6595_v2 = vadd.f32 %v1944_v12, %v1937_v43 }
 0x838   :  { %v1930_v15 = vpop.f32.mrf.mxu1 }
 0x839   :  { %v1963_v41 = vsel %vm174_vm4, %v6595_v2, 0.0 }
 0x83a   :  { %1964 = vadd.xlane.f32.xlu0 %v1963_v41  ;;  %v5076_v58 = vpop.f32.mrf.mxu1 }
 0x8a4   :  { %v1953_v52 = vpop.xlane.xlu0 %1952 }
 0x8a5   :  { %v1966_v4 = vmul.f32 0.03125, %v1953_v52 }
 0x8a7   :  { %v1971_v23 = vsub.f32 %v6575_v0, %v1966_v4 }
 0x8a8   :  { %v1956_v9 = vpop.xlane.xlu1 %1955 }
 0x8a9   :  { %v1967_v51 = vmul.f32 0.03125, %v1956_v9  ;;  %v1976_v29 = vmul.f32 %v1971_v23, %v1971_v23 }
 0x8ab   :  { %v1972_v62 = vsub.f32 %v6580_v53, %v1967_v51  ;;  %v1981_v14 = vsel %vm161_vm3, %v1976_v29, 0.0 }
 0x8ac   :  { %1982 = vadd.xlane.f32.xlu1 %v1981_v14 }
 0x8ad   :  { %v1977_v37 = vmul.f32 %v1972_v62, %v1972_v62 }
 0x8af   :  { %v1984_v36 = vsel %vm161_vm3, %v1977_v37, 0.0 }
 0x8b0   :  { %1985 = vadd.xlane.f32.xlu0 %v1984_v36 }
 0x8bb   :  { %v1959_v42 = vpop.xlane.xlu0 %1958 }
 0x8bc   :  { %v1968_v3 = vmul.f32 0.03125, %v1959_v42 }
 0x8be   :  { %v1973_v11 = vsub.f32 %v6585_v32, %v1968_v3 }
 0x8bf   :  { %v1962_v47 = vpop.xlane.xlu0 %1961 }
 0x8c0   :  { %v1969_v31 = vmul.f32 0.03125, %v1962_v47  ;;  %v1978_v25 = vmul.f32 %v1973_v11, %v1973_v11 }
 0x8c2   :  { %v1974_v19 = vsub.f32 %v6590_v27, %v1969_v31  ;;  %v1987_v45 = vsel %vm161_vm3, %v1978_v25, 0.0 }
 0x8c3   :  { %1988 = vadd.xlane.f32.xlu1 %v1987_v45  ;;  %v1965_v6 = vpop.xlane.xlu0 %1964 }
 0x8c4   :  { %v1970_v5 = vmul.f32 0.03125, %v1965_v6  ;;  %v1979_v46 = vmul.f32 %v1974_v19, %v1974_v19 }
 0x8c6   :  { %v1975_v60 = vsub.f32 %v6595_v2, %v1970_v5  ;;  %v1990_v57 = vsel %vm161_vm3, %v1979_v46, 0.0  ;;  %v5517_v5 = vld [vmem:[%s7447_s4 + $0x30] sm:$0xff]   ;;  %v5518_v46 = vld [vmem:[%s7447_s4 + $0x28] sm:$0xff]  }
 0x8c7   :  { %1991 = vadd.xlane.f32.xlu0 %v1990_v57  ;;  %v5520_v57 = vld [vmem:[%s7447_s4 + $0x18] sm:$0xff]  }
 0x8c8   :  { %v1980_v26 = vmul.f32 %v1975_v60, %v1975_v60 }
 0x8ca   :  { %v1993_v18 = vsel %vm174_vm4, %v1980_v26, 0.0  ;;  %v5521_v26 = vld [vmem:[%s7447_s4 + $0x10] sm:$0xff]  }
 0x8cb   :  { %1994 = vadd.xlane.f32.xlu1 %v1993_v18  ;;  %v5522_v18 = vld [vmem:[%s7447_s4 + $0x8] sm:$0xff]  }
 0x8dc   :  { %2029 = vrot.lane.b32.xlu1 %v6533_v61, %s5832_s22 }
 0x8dd   :  { %2016 = vrot.lane.b32.xlu0 %v6533_v61, %s5827_s16 }
 0x935   :  { %v1983_v21 = vpop.xlane.xlu1 %1982 }
 0x936   :  { %v1996_v40 = vmul.f32 0.03125, %v1983_v21  ;;  %v2049_v21 = vrot.slane %v2045_v54, %v5991_v8 }
 0x938   :  { %v2001_v16 = vadd.f32 1e-06, %v1996_v40 }
 0x939   :  { %v1986_v63 = vpop.xlane.xlu0 %1985 }
 0x93a   :  { %v1997_v12 = vmul.f32 0.03125, %v1986_v63  ;;  %5646 = vrsqrt.f32 %v2001_v16 }
 0x93c   :  { %v2002_v17 = vadd.f32 1e-06, %v1997_v12 }
 0x93e   :  { %5648 = vrsqrt.f32 %v2002_v17 }
 0x947   :  { %v5647_v24 = vpop.eup %5646 }
 0x948   :  { %v2011_v22 = vmul.f32 %v5647_v24, %v1971_v23 }
 0x94b   :  { %v5649_v10 = vpop.eup %5648 }
 0x94c   :  { %v1989_v44 = vpop.xlane.xlu1 %1988  ;;  %v2012_v35 = vmul.f32 %v5649_v10, %v1972_v62 }
 0x94d   :  { %v1998_v30 = vmul.f32 0.03125, %v1989_v44 }
 0x94f   :  { %v2003_v49 = vadd.f32 1e-06, %v1998_v30 }
 0x950   :  { %v1992_v56 = vpop.xlane.xlu0 %1991 }
 0x951   :  { %5650 = vrsqrt.f32 %v2003_v49  ;;  %v1999_v39 = vmul.f32 0.03125, %v1992_v56 }
 0x953   :  { %v2004_v59 = vadd.f32 1e-06, %v1999_v39 }
 0x954   :  { %v1995_v50 = vpop.xlane.xlu1 %1994  ;;  %v2017_v20 = vpop.permute.xlu0 %2016 }
 0x955   :  { %5652 = vrsqrt.f32 %v2004_v59  ;;  %v2000_v38 = vmul.f32 0.03125, %v1995_v50  ;;  %v2018_v28 = vrot.slane %v2017_v20, 1 }
 0x957   :  { %v2005_v55 = vadd.f32 1e-06, %v2000_v38  ;;  %v2022_v34 = vrot.slane %v2018_v28, %v5991_v8 }
 0x958   :  { %v2030_v43 = vpop.permute.xlu1 %2029 }
 0x959   :  { %5654 = vrsqrt.f32 %v2005_v55  ;;  %v2031_v15 = vrot.slane %v2030_v43, 1  ;;  %v2024_v58 = vmul.f32 %v2022_v34, %v2011_v22  ;;  %v2025_v52 = vmul.f32 %v2022_v34, %v2012_v35 }
 0x95b   :  { %v2035_v41 = vrot.slane %v2031_v15, %v5991_v8 }
 0x95d   :  { %v2037_v4 = vadd.f32 %v2035_v41, %v2024_v58  ;;  %v2038_v9 = vadd.f32 %v2035_v41, %v2025_v52 }
 0x95e   :  { %v5651_v51 = vpop.eup %5650 }
 0x95f   :  { %v2042_v29 = vpack.c.bf16 %v2038_v9, %v2037_v4  ;;  %v2013_v14 = vmul.f32 %v5651_v51, %v1973_v11 }
 0x961   :  { %5082 = vmatmul.mubr.msk.bf16.vlgmr.msra.gmra.mxu0 %vm161_vm3, %v2042_v29  ;;  %v2026_v23 = vmul.f32 %v2022_v34, %v2013_v14 }
 0x962   :  { %v5653_v37 = vpop.eup %5652  ;;  %5085 = vmatprep.mubr.msk.bf16.mxu0 %vm5825_vm0, %v5824_v1 }
 0x963   :  { %v2014_v36 = vmul.f32 %v5653_v37, %v1974_v19  ;;  %v2039_v3 = vadd.f32 %v2035_v41, %v2026_v23  ;;  %v5516_v19 = vld [vmem:[%s7447_s4 + $0x38] sm:$0xff]  }
 0x964   :  { %5094 = vmatpush3.bf16.msra.mxu1 %v5516_v19 }
 0x965   :  { %v2027_v62 = vmul.f32 %v2022_v34, %v2014_v36  ;;  %5095 = vmatprep.subr.bf16.mxu1 %v5824_v1 }
 0x966   :  { %v5655_v42 = vpop.eup %5654 }
 0x967   :  { %v2040_v47 = vadd.f32 %v2035_v41, %v2027_v62  ;;  %v2015_v31 = vmul.f32 %v5655_v42, %v1975_v60  ;;  %v5519_v60 = vld [vmem:[%s7447_s4 + $0x20] sm:$0xff]  }
 0x968   :  { %5096 = vmatpush3.bf16.msra.mxu1 %v5517_v5 }
 0x969   :  { %v2043_v25 = vpack.c.bf16 %v2040_v47, %v2039_v3  ;;  %v2028_v45 = vmul.f32 %v2022_v34, %v2015_v31  ;;  %5097 = vmatprep.subr.bf16.mxu1 %v5824_v1 }
 0x96b   :  { %5086 = vmatmul.mubr.msk.bf16.gmra.mxu0 %vm161_vm3, %v2043_v25  ;;  %v2041_v11 = vadd.f32 %v2035_v41, %v2028_v45 }
 0x96c   :  { %5089 = vmatprep.mubr.msk.bf16.mxu0 %vm5825_vm0, %v5824_v1  ;;  %5098 = vmatpush3.bf16.msra.mxu1 %v5518_v46 }
 0x96d   :  { %v2044_v6 = vpack.c.bf16 %v2041_v11, %v2041_v11  ;;  %5099 = vmatprep.subr.bf16.mxu1 %v5824_v1 }
 0x970   :  { %5100 = vmatpush3.bf16.msra.mxu1 %v5519_v60 }
 0x971   :  { %5101 = vmatprep.subr.bf16.mxu1 %v5824_v1 }
 0x973   :  { %5090 = vmatmul.mubr.msk.bf16.gmra.mxu0 %vm161_vm3, %v2044_v6 }
 0x974   :  { %5125 = vmatprep.mubr.msk.bf16.mxu0 %vm5825_vm0, %v5824_v1  ;;  %5102 = vmatpush3.bf16.msra.mxu1 %v5520_v57 }
 0x975   :  { %5103 = vmatprep.subr.bf16.mxu1 %v5824_v1 }
 0x978   :  { %5104 = vmatpush3.bf16.msra.mxu1 %v5521_v26 }
 0x979   :  { %5105 = vmatprep.subr.bf16.mxu1 %v5824_v1 }
 0x97c   :  { %5106 = vmatpush3.bf16.msra.mxu1 %v5522_v18 }
 0x97d   :  { %5107 = vmatprep.subr.bf16.mxu1 %v5824_v1 }
 0x980   :  { %5108 = vmatpush3.bf16.msra.mxu1 %v5523_v33 }
 0xa21   :  { %v2102_v63 = vpop.f32.mrf.mxu0 }
 0xa22   :  { %v2103_v40 = vadd.f32 %v2102_v63, %v2049_v21 }
 0xa23   :  { %v5083_v12 = vpop.f32.mrf.mxu0 }
 0xa24   :  { %v2129_v16 = vmul.f32 0.044715, %v2103_v40  ;;  %v2124_v46 = vmul.f32 0.5, %v2103_v40 }
 0xa25   :  { %v2105_v17 = vpop.f32.mrf.mxu0 }
 0xa26   :  { %v2134_v44 = vmul.f32 %v2129_v16, %v2103_v40  ;;  %v2106_v30 = vadd.f32 %v2105_v17, %v2049_v21 }
 0xa27   :  { %v5084_v49 = vpop.f32.mrf.mxu0 }
 0xa28   :  { %v2139_v56 = vmul.f32 %v2134_v44, %v2103_v40  ;;  %v2130_v39 = vmul.f32 0.044715, %v2106_v30  ;;  %v2125_v60 = vmul.f32 0.5, %v2106_v30 }
 0xa2a   :  { %v2144_v59 = vadd.f32 %v2139_v56, %v2103_v40  ;;  %v2135_v50 = vmul.f32 %v2130_v39, %v2106_v30 }
 0xa2b   :  { %v2110_v20 = vpop.f32.mrf.mxu0 }
 0xa2c   :  { %v2149_v24 = vmul.f32 0.7978846, %v2144_v59  ;;  %v2140_v38 = vmul.f32 %v2135_v50, %v2106_v30  ;;  %v2111_v28 = vadd.f32 %v2110_v20, %v2049_v21  ;;  %v2297_v20 = vrot.slane %v6533_v61, 3 }
 0xa2d   :  { %v5087_v10 = vpop.f32.mrf.mxu0 }
 0xa2e   :  { %5656 = vtanh.f32 %v2149_v24  ;;  %v2145_v55 = vadd.f32 %v2140_v38, %v2106_v30  ;;  %v2131_v34 = vmul.f32 0.044715, %v2111_v28  ;;  %v2126_v12 = vmul.f32 0.5, %v2111_v28 }
 0xa2f   :  { %v2113_v43 = vpop.f32.mrf.mxu0  ;;  %v2301_v24 = vrot.slane %v2297_v20, %v5991_v8 }
 0xa30   :  { %v2150_v22 = vmul.f32 0.7978846, %v2145_v55  ;;  %v2136_v35 = vmul.f32 %v2131_v34, %v2111_v28  ;;  %v2114_v15 = vadd.f32 %v2113_v43, %v2049_v21 }
 0xa31   :  { %v5088_v41 = vpop.f32.mrf.mxu0 }
 0xa32   :  { %5658 = vtanh.f32 %v2150_v22  ;;  %v2141_v58 = vmul.f32 %v2136_v35, %v2111_v28  ;;  %v2132_v52 = vmul.f32 0.044715, %v2114_v15  ;;  %v2127_v16 = vmul.f32 0.5, %v2114_v15 }
 0xa33   :  { %v2118_v4 = vpop.f32.mrf.mxu0 }
 0xa34   :  { %v2137_v9 = vmul.f32 %v2132_v52, %v2114_v15  ;;  %v2119_v51 = vadd.f32 %v2118_v4, %v2049_v21  ;;  %v2146_v29 = vadd.f32 %v2141_v58, %v2111_v28 }
 0xa35   :  { %v5091_v14 = vpop.f32.mrf.mxu0 }
 0xa36   :  { %v2142_v37 = vmul.f32 %v2137_v9, %v2114_v15  ;;  %v2133_v36 = vmul.f32 0.044715, %v2119_v51  ;;  %v2151_v23 = vmul.f32 0.7978846, %v2146_v29  ;;  %v2128_v39 = vmul.f32 0.5, %v2119_v51 }
 0xa37   :  { %v2121_v62 = vpop.f32.mrf.mxu0 }
 0xa38   :  { %v2138_v42 = vmul.f32 %v2133_v36, %v2119_v51  ;;  %v2147_v3 = vadd.f32 %v2142_v37, %v2114_v15  ;;  %5660 = vtanh.f32 %v2151_v23 }
 0xa39   :  { %v5092_v47 = vpop.f32.mrf.mxu0 }
 0xa3a   :  { %v2152_v31 = vmul.f32 0.7978846, %v2147_v3  ;;  %v2143_v25 = vmul.f32 %v2138_v42, %v2119_v51 }
 0xa3b   :  { %v5657_v45 = vpop.eup %5656 }
 0xa3c   :  { %5662 = vtanh.f32 %v2152_v31  ;;  %v2148_v11 = vadd.f32 %v2143_v25, %v2119_v51  ;;  %v2159_v6 = vadd.f32 1.0, %v5657_v45 }
 0xa3e   :  { %v2153_v19 = vmul.f32 0.7978846, %v2148_v11  ;;  %v2164_v26 = vmul.f32 %v2159_v6, %v2124_v46 }
 0xa3f   :  { %v5659_v5 = vpop.eup %5658 }
 0xa40   :  { %v2160_v57 = vadd.f32 1.0, %v5659_v5  ;;  %5664 = vtanh.f32 %v2153_v19 }
 0xa42   :  { %v2165_v18 = vmul.f32 %v2160_v57, %v2125_v60 }
 0xa44   :  { %v2185_v33 = vpack.c.bf16 %v2165_v18, %v2164_v26 }
 0xa45   :  { %v5661_v54 = vpop.eup %5660 }
 0xa46   :  { %5110 = vmatmul.mubr.bf16.vlgmr.msra.gmra.mxu1 %v2185_v33  ;;  %v2161_v21 = vadd.f32 1.0, %v5661_v54 }
 0xa47   :  { %5113 = vmatprep.mubr.msk.bf16.mxu1 %vm5825_vm0, %v5824_v1 }
 0xa48   :  { %v2166_v44 = vmul.f32 %v2161_v21, %v2126_v12 }
 0xa49   :  { %v5663_v63 = vpop.eup %5662 }
 0xa4a   :  { %v2162_v17 = vadd.f32 1.0, %v5663_v63 }
 0xa4c   :  { %v2167_v49 = vmul.f32 %v2162_v17, %v2127_v16 }
 0xa4d   :  { %v5665_v56 = vpop.eup %5664 }
 0xa4e   :  { %v2186_v40 = vpack.c.bf16 %v2167_v49, %v2166_v44  ;;  %v2163_v30 = vadd.f32 1.0, %v5665_v56 }
 0xa50   :  { %5114 = vmatmul.mubr.bf16.gmra.mxu1 %v2186_v40  ;;  %v2168_v59 = vmul.f32 %v2163_v30, %v2128_v39  ;;  %v5524_v40 = vld [vmem:[%s7446_s3 + $0x30] ss:$8 sps:$4 sm:$0xff]   ;;  %v4631_v30 = vld [vmem:[%s7448_s5 + $0x1] ss:$2 sm:$0xf] }
 0xa51   :  { %5117 = vmatprep.mubr.msk.bf16.mxu1 %vm5825_vm0, %v5824_v1  ;;  %5122 = vmatpush3.bf16.msra.mxu0 %v5524_v40  ;;  %v2384_v39 = vrot.slane %v4631_v30, %v5991_v8 }
 0xa52   :  { %v2187_v50 = vpack.c.bf16 %v2168_v59, %v2168_v59  ;;  %5123 = vmatprep.subr.bf16.mxu0 %v5824_v1  ;;  %v5526_v59 = vld [vmem:[%s7446_s3 + $0x20] ss:$8 sps:$4 sm:$0xff]  }
 0xa55   :  { %5124 = vmatpush3.bf16.msra.mxu0 %v5526_v59 }
 0xa58   :  { %5118 = vmatmul.mubr.bf16.gmra.mxu1 %v2187_v50  ;;  %v2405_v50 = vrot.slane %v4631_v30, %v253_v13 }
 0xb06   :  { %v2270_v38 = vpop.f32.mrf.mxu1 }
 0xb07   :  { %v2292_v28 = vadd.f32 %v2270_v38, %v6575_v0 }
 0xb08   :  { %v5111_v10 = vpop.f32.mrf.mxu1 }
 0xb09   :  { %v6672_v55 = vadd.f32 %v2301_v24, %v2292_v28 }
 0xb0a   :  { %v2273_v34 = vpop.f32.mrf.mxu1 }
 0xb0b   :  { %v2293_v43 = vadd.f32 %v2273_v34, %v6580_v53  ;;  %v2315_v22 = vsel %vm161_vm3, %v6672_v55, 0.0 }
 0xb0c   :  { %2316 = vadd.xlane.f32.xlu1 %v2315_v22  ;;  %v5112_v35 = vpop.f32.mrf.mxu1 }
 0xb0d   :  { %v6677_v15 = vadd.f32 %v2301_v24, %v2293_v43 }
 0xb0f   :  { %v2318_v61 = vsel %vm161_vm3, %v6677_v15, 0.0 }
 0xb10   :  { %2319 = vadd.xlane.f32.xlu0 %v2318_v61  ;;  %v2278_v41 = vpop.f32.mrf.mxu1 }
 0xb11   :  { %v2294_v0 = vadd.f32 %v2278_v41, %v6585_v32 }
 0xb12   :  { %v5115_v58 = vpop.f32.mrf.mxu1 }
 0xb13   :  { %v6682_v52 = vadd.f32 %v2301_v24, %v2294_v0 }
 0xb14   :  { %v2281_v4 = vpop.f32.mrf.mxu1 }
 0xb15   :  { %v2295_v53 = vadd.f32 %v2281_v4, %v6590_v27  ;;  %v2321_v9 = vsel %vm161_vm3, %v6682_v52, 0.0 }
 0xb16   :  { %2322 = vadd.xlane.f32.xlu0 %v2321_v9  ;;  %v5116_v51 = vpop.f32.mrf.mxu1 }
 0xb17   :  { %v6687_v29 = vadd.f32 %v2301_v24, %v2295_v53 }
 0xb18   :  { %v2286_v14 = vpop.f32.mrf.mxu1 }
 0xb19   :  { %v2296_v37 = vadd.f32 %v2286_v14, %v6595_v2  ;;  %v2324_v36 = vsel %vm161_vm3, %v6687_v29, 0.0 }
 0xb1a   :  { %2325 = vadd.xlane.f32.xlu1 %v2324_v36  ;;  %v5119_v32 = vpop.f32.mrf.mxu1 }
 0xb1b   :  { %v6692_v23 = vadd.f32 %v2301_v24, %v2296_v37 }
 0xb1c   :  { %v2289_v62 = vpop.f32.mrf.mxu1 }
 0xb1d   :  { %v2327_v27 = vsel %vm174_vm4, %v6692_v23, 0.0 }
 0xb1e   :  { %2328 = vadd.xlane.f32.xlu0 %v2327_v27  ;;  %v5120_v42 = vpop.f32.mrf.mxu1 }
 0xb95   :  { %v2317_v3 = vpop.xlane.xlu1 %2316 }
 0xb96   :  { %v2330_v47 = vmul.f32 0.03125, %v2317_v3 }
 0xb98   :  { %v2335_v31 = vsub.f32 %v6672_v55, %v2330_v47 }
 0xb99   :  { %v2320_v25 = vpop.xlane.xlu0 %2319 }
 0xb9a   :  { %v2331_v45 = vmul.f32 0.03125, %v2320_v25  ;;  %v2340_v2 = vmul.f32 %v2335_v31, %v2335_v31 }
 0xb9c   :  { %v2336_v11 = vsub.f32 %v6677_v15, %v2331_v45  ;;  %v2345_v6 = vsel %vm161_vm3, %v2340_v2, 0.0 }
 0xb9d   :  { %2346 = vadd.xlane.f32.xlu1 %v2345_v6 }
 0xb9e   :  { %v2341_v19 = vmul.f32 %v2336_v11, %v2336_v11 }
 0xb9f   :  { %v2323_v5 = vpop.xlane.xlu0 %2322 }
 0xba0   :  { %v2332_v46 = vmul.f32 0.03125, %v2323_v5  ;;  %v2348_v60 = vsel %vm161_vm3, %v2341_v19, 0.0 }
 0xba1   :  { %2349 = vadd.xlane.f32.xlu0 %v2348_v60 }
 0xba2   :  { %v2337_v57 = vsub.f32 %v6682_v52, %v2332_v46 }
 0xba3   :  { %v2326_v26 = vpop.xlane.xlu1 %2325 }
 0xba4   :  { %v2333_v18 = vmul.f32 0.03125, %v2326_v26  ;;  %v2342_v33 = vmul.f32 %v2337_v57, %v2337_v57 }
 0xba6   :  { %v2338_v54 = vsub.f32 %v6687_v29, %v2333_v18  ;;  %v2351_v21 = vsel %vm161_vm3, %v2342_v33, 0.0 }
 0xba7   :  { %2352 = vadd.xlane.f32.xlu1 %v2351_v21  ;;  %v2329_v63 = vpop.xlane.xlu0 %2328 }
 0xba8   :  { %v2334_v12 = vmul.f32 0.03125, %v2329_v63  ;;  %v2343_v16 = vmul.f32 %v2338_v54, %v2338_v54 }
 0xbaa   :  { %v2339_v17 = vsub.f32 %v6692_v23, %v2334_v12  ;;  %v2354_v44 = vsel %vm161_vm3, %v2343_v16, 0.0 }
 0xbab   :  { %2355 = vadd.xlane.f32.xlu0 %v2354_v44 }
 0xbac   :  { %v2344_v49 = vmul.f32 %v2339_v17, %v2339_v17 }
 0xbae   :  { %v2357_v56 = vsel %vm174_vm4, %v2344_v49, 0.0 }
 0xbaf   :  { %2358 = vadd.xlane.f32.xlu1 %v2357_v56 }
 0xbc0   :  { %2418 = vrot.lane.b32.xlu1 %v2384_v39, %s5827_s16 }
 0xbc1   :  { %2391 = vrot.lane.b32.xlu0 %v2384_v39, %s5826_s13 }
 0xbc4   :  { %2420 = vrot.lane.b32.xlu1 %v2405_v50, %s5827_s16 }
 0xc26   :  { %v2347_v20 = vpop.xlane.xlu1 %2346 }
 0xc27   :  { %v2360_v24 = vmul.f32 0.03125, %v2347_v20 }
 0xc29   :  { %v2365_v38 = vadd.f32 1e-06, %v2360_v24 }
 0xc2a   :  { %v2350_v28 = vpop.xlane.xlu0 %2349 }
 0xc2b   :  { %5666 = vrsqrt.f32 %v2365_v38  ;;  %v2361_v10 = vmul.f32 0.03125, %v2350_v28 }
 0xc2d   :  { %v2366_v34 = vadd.f32 1e-06, %v2361_v10 }
 0xc2f   :  { %5668 = vrsqrt.f32 %v2366_v34 }
 0xc30   :  { %v2353_v43 = vpop.xlane.xlu1 %2352 }
 0xc31   :  { %v2362_v22 = vmul.f32 0.03125, %v2353_v43 }
 0xc33   :  { %v2367_v35 = vadd.f32 1e-06, %v2362_v22 }
 0xc34   :  { %v2356_v61 = vpop.xlane.xlu0 %2355 }
 0xc35   :  { %5670 = vrsqrt.f32 %v2367_v35  ;;  %v2363_v41 = vmul.f32 0.03125, %v2356_v61 }
 0xc37   :  { %v2368_v0 = vadd.f32 1e-06, %v2363_v41 }
 0xc38   :  { %v5667_v58 = vpop.eup %5666  ;;  %v2359_v7 = vpop.xlane.xlu1 %2358 }
 0xc39   :  { %5672 = vrsqrt.f32 %v2368_v0  ;;  %v2364_v13 = vmul.f32 0.03125, %v2359_v7  ;;  %v2375_v4 = vmul.f32 %v5667_v58, %v2335_v31  ;;  %v2392_v37 = vpop.permute.xlu0 %2391 }
 0xc3b   :  { %v2369_v53 = vadd.f32 1e-06, %v2364_v13  ;;  %v2386_v14 = vmul.f32 %v2384_v39, %v2375_v4 }
 0xc3c   :  { %v5669_v9 = vpop.eup %5668  ;;  %v2419_v26 = vpop.permute.xlu1 %2418 }
 0xc3d   :  { %5674 = vrsqrt.f32 %v2369_v53  ;;  %v2376_v51 = vmul.f32 %v5669_v9, %v2336_v11  ;;  %v2394_v32 = vadd.f32 %v2392_v37, %v2386_v14 }
 0xc3f   :  { %v2387_v36 = vmul.f32 %v2384_v39, %v2376_v51 }
 0xc40   :  { %v2421_v18 = vpop.permute.xlu1 %2420 }
 0xc41   :  { %v2395_v62 = vadd.f32 %v2392_v37, %v2387_v36 }
 0xc42   :  { %v5671_v27 = vpop.eup %5670 }
 0xc43   :  { %v2399_v42 = vpack.c.bf16 %v2395_v62, %v2394_v32  ;;  %v2377_v3 = vmul.f32 %v5671_v27, %v2337_v57 }
 0xc45   :  { %5126 = vmatmul.mubr.msk.bf16.vlgmr.msra.gmra.mxu0 %vm161_vm3, %v2399_v42  ;;  %v2388_v31 = vmul.f32 %v2384_v39, %v2377_v3 }
 0xc46   :  { %v5673_v47 = vpop.eup %5672  ;;  %5129 = vmatprep.mubr.msk.bf16.mxu0 %vm5825_vm0, %v5824_v1 }
 0xc47   :  { %v2378_v25 = vmul.f32 %v5673_v47, %v2338_v54  ;;  %v2396_v6 = vadd.f32 %v2392_v37, %v2388_v31  ;;  %v2422_v54 = vsel %vm90_vm1, %v2419_v26, %v2421_v18 }
 0xc49   :  { %v2389_v45 = vmul.f32 %v2384_v39, %v2378_v25 }
 0xc4a   :  { %v5675_v2 = vpop.eup %5674 }
 0xc4b   :  { %v2397_v11 = vadd.f32 %v2392_v37, %v2389_v45  ;;  %v2379_v19 = vmul.f32 %v5675_v2, %v2339_v17 }
 0xc4d   :  { %v2400_v5 = vpack.c.bf16 %v2397_v11, %v2396_v6  ;;  %v2390_v46 = vmul.f32 %v2384_v39, %v2379_v19 }
 0xc4f   :  { %5130 = vmatmul.mubr.msk.bf16.gmra.mxu0 %vm161_vm3, %v2400_v5  ;;  %v2398_v60 = vadd.f32 %v2392_v37, %v2390_v46 }
 0xc50   :  { %5133 = vmatprep.mubr.msk.bf16.mxu0 %vm5825_vm0, %v5824_v1 }
 0xc51   :  { %v2401_v57 = vpack.c.bf16 %v2398_v60, %v2398_v60 }
 0xc57   :  { %5134 = vmatmul.mubr.msk.bf16.gmra.mxu0 %vm161_vm3, %v2401_v57 }
 0xd05   :  { %v2467_v33 = vpop.f32.mrf.mxu0 }
 0xd06   :  { %v2468_v12 = vadd.f32 %v2467_v33, %v2422_v54 }
 0xd07   :  { %v5127_v21 = vpop.f32.mrf.mxu0 }
 0xd09   :  { %v2470_v63 = vpop.f32.mrf.mxu0 }
 0xd0a   :  { %v2471_v16 = vadd.f32 %v2470_v63, %v2422_v54 }
 0xd0b   :  { %v5128_v17 = vpop.f32.mrf.mxu0 }
 0xd0c   :  { %v6730_v44 = vpack.c.bf16 %v2471_v16, %v2468_v12 }
 0xd0e   :  { %5141 = vmatprep.mubr.msk.bf16.mxu0 %vm428_vm5, %v6730_v44 }
 0xd0f   :  { %v2475_v49 = vpop.f32.mrf.mxu0 }
 0xd10   :  { %v2476_v56 = vadd.f32 %v2475_v49, %v2422_v54 }
 0xd11   :  { %v5131_v40 = vpop.f32.mrf.mxu0 }
 0xd12   :  { %2506 = vrot.lane.b32.xlu1 %v2476_v56, %s5828_s17  ;;  %v2492_v28 = vrot.slane %v2476_v56, 1  ;;  %v6754_v58 = vpack.c.bf16 %v2476_v56, %v2476_v56 }
 0xd13   :  { %v2478_v30 = vpop.f32.mrf.mxu0 }
 0xd14   :  { %v2479_v39 = vadd.f32 %v2478_v30, %v2422_v54 }
 0xd15   :  { %v5132_v59 = vpop.f32.mrf.mxu0 }
 0xd16   :  { %2504 = vrot.lane.b32.xlu1 %v2471_v16, %s5828_s17  ;;  %v2493_v20 = vrot.slane %v2479_v39, 1 }
 0xd17   :  { %v2483_v50 = vpop.f32.mrf.mxu0 }
 0xd18   :  { %v2484_v24 = vadd.f32 %v2483_v50, %v2422_v54  ;;  %v2494_v43 = vsel %vm341_vm6, %v2492_v28, %v2493_v20 }
 0xd19   :  { %v5135_v38 = vpop.f32.mrf.mxu0 }
 0xd1a   :  { %v2495_v10 = vrot.slane %v2484_v24, 1  ;;  %2524 = vrot.lane.b32.xlu1 %v2476_v56, %s5829_s18 }
 0xd1b   :  { %v2486_v34 = vpop.f32.mrf.mxu0 }
 0xd1c   :  { %v5446_v22 = vpack.i.bf16 %v2468_v12, %v2495_v10  ;;  %v2496_v35 = vsel %vm341_vm6, %v2493_v20, %v2495_v10  ;;  %v6758_v7 = vpack.c.bf16 %v2495_v10, %v2495_v10 }
 0xd1d   :  { %v5136_v61 = vpop.f32.mrf.mxu0  ;;  %v6739_v41 = vpack.c.bf16 %v2496_v35, %v2494_v43  ;;  %v5451_v0 = vpack.i.bf16 %v2496_v35, %v2494_v43 }
 0xd1e   :  { %2522 = vrot.lane.b32.xlu1 %v2471_v16, %s5829_s18  ;;  %5447 = vrot.lane.b32.xlu0 %v5446_v22, %s5828_s17 }
 0xd1f   :  { %5149 = vmatprep.mubr.msk.bf16.mxu1 %vm428_vm5, %v6739_v41 }
 0xd22   :  { %2542 = vrot.lane.b32.xlu1 %v2476_v56, %s5830_s19  ;;  %5452 = vrot.lane.b32.xlu0 %v5451_v0, %s5828_s17 }
 0xd26   :  { %2540 = vrot.lane.b32.xlu1 %v2471_v16, %s5830_s19  ;;  %5457 = vrot.lane.b32.xlu0 %v5446_v22, %s5829_s18 }
 0xd2a   :  { %5472 = vrot.lane.b32.xlu1 %v5451_v0, %s5830_s19  ;;  %5462 = vrot.lane.b32.xlu0 %v5451_v0, %s5829_s18 }
 0xd2e   :  { %2574 = vrot.lane.b32.xlu1 %v6730_v44, %s5826_s13  ;;  %5467 = vrot.lane.b32.xlu0 %v5446_v22, %s5830_s19 }
 0xd32   :  { %2576 = vrot.lane.b32.xlu0 %v6754_v58, %s5826_s13 }
 0xd36   :  { %2642 = vrot.lane.b32.xlu0 %v6758_v7, %s5826_s13 }
 0xd3a   :  { %2640 = vrot.lane.b32.xlu0 %v6739_v41, %s5826_s13 }
 0xd84   :  { %v2507_v13 = vpop.permute.xlu1 %2506 }
 0xd85   :  { %v6764_v4 = vpack.c.bf16 %v2507_v13, %v2507_v13 }
 0xd87   :  { %2708 = vrot.lane.b32.xlu1 %v6764_v4, %s5826_s13 }
 0xd88   :  { %v2505_v53 = vpop.permute.xlu1 %2504 }
 0xd8c   :  { %v2525_v9 = vpop.permute.xlu1 %2524 }
 0xd8d   :  { %v6776_v25 = vpack.c.bf16 %v2525_v9, %v2525_v9 }
 0xd90   :  { %v2523_v51 = vpop.permute.xlu1 %2522  ;;  %v5448_v14 = vpop.permute.xlu0 %5447 }
 0xd91   :  { %v5450_v37 = vunpack.i.h.bf16 %v5448_v14  ;;  %v5449_v36 = vunpack.i.l.bf16 %v5448_v14 }
 0xd93   :  { %v6768_v32 = vpack.c.bf16 %v2505_v53, %v5450_v37  ;;  %v6770_v62 = vpack.c.bf16 %v5449_v36, %v5449_v36 }
 0xd94   :  { %v2543_v27 = vpop.permute.xlu1 %2542  ;;  %v5453_v42 = vpop.permute.xlu0 %5452 }
 0xd95   :  { %v5455_v3 = vunpack.i.h.bf16 %v5453_v42  ;;  %v5454_v47 = vunpack.i.l.bf16 %v5453_v42  ;;  %2706 = vrot.lane.b32.xlu1 %v6768_v32, %s5826_s13  ;;  %2774 = vrot.lane.b32.xlu0 %v6770_v62, %s5826_s13  ;;  %v6789_v26 = vpack.c.bf16 %v2543_v27, %v2543_v27 }
 0xd97   :  { %v2562_v31 = vpack.c.bf16 %v5455_v3, %v5454_v47 }
 0xd98   :  { %v5458_v45 = vpop.permute.xlu0 %5457  ;;  %v2541_v11 = vpop.permute.xlu1 %2540 }
 0xd99   :  { %v5460_v2 = vunpack.i.h.bf16 %v5458_v45  ;;  %v5459_v6 = vunpack.i.l.bf16 %v5458_v45  ;;  %2840 = vrot.lane.b32.xlu1 %v6776_v25, %s5826_s13  ;;  %2772 = vrot.lane.b32.xlu0 %v2562_v31, %s5826_s13 }
 0xd9b   :  { %v6781_v19 = vpack.c.bf16 %v2523_v51, %v5460_v2  ;;  %v6783_v5 = vpack.c.bf16 %v5459_v6, %v5459_v6 }
 0xd9c   :  { %v5463_v46 = vpop.permute.xlu0 %5462  ;;  %v5473_v33 = vpop.permute.xlu1 %5472 }
 0xd9d   :  { %v5465_v60 = vunpack.i.h.bf16 %v5463_v46  ;;  %v5464_v57 = vunpack.i.l.bf16 %v5463_v46  ;;  %2838 = vrot.lane.b32.xlu1 %v6781_v19, %s5826_s13  ;;  %2906 = vrot.lane.b32.xlu0 %v6783_v5, %s5826_s13  ;;  %v5475_v17 = vunpack.i.h.bf16 %v5473_v33  ;;  %v5474_v49 = vunpack.i.l.bf16 %v5473_v33 }
 0xd9f   :  { %v6791_v18 = vpack.c.bf16 %v5465_v60, %v5464_v57  ;;  %v6808_v39 = vpack.c.bf16 %v5475_v17, %v5474_v49 }
 0xda0   :  { %v5468_v54 = vpop.permute.xlu0 %5467  ;;  %v2575_v30 = vpop.permute.xlu1 %2574 }
 0xda1   :  { %v5470_v21 = vunpack.i.h.bf16 %v5468_v54  ;;  %v5469_v63 = vunpack.i.l.bf16 %v5468_v54  ;;  %2972 = vrot.lane.b32.xlu1 %v6789_v26, %s5826_s13  ;;  %2904 = vrot.lane.b32.xlu0 %v6791_v18, %s5826_s13  ;;  %v2585_v24 = vsel %vm428_vm5, %v2575_v30, 0 }
 0xda3   :  { %v6797_v12 = vpack.c.bf16 %v2541_v11, %v5470_v21  ;;  %v6799_v16 = vpack.c.bf16 %v5469_v63, %v5469_v63 }
 0xda4   :  { %v2577_v56 = vpop.permute.xlu0 %2576 }
 0xda5   :  { %5357 = vmatprep.subr.msk.bf16.mxu0 %vm428_vm5, %v2577_v56  ;;  %2970 = vrot.lane.b32.xlu1 %v6797_v12, %s5826_s13  ;;  %v2588_v40 = vsel %vm428_vm5, %v2577_v56, 0 }
 0xda6   :  { %3038 = vrot.lane.b32.xlu0 %v6799_v16, %s5826_s13  ;;  %5138 = vmatpush3.bf16.xpose.msra.mxu0 %v2588_v40 }
 0xda7   :  { %5358 = vmatprep.subr.msk.bf16.mxu0 %vm428_vm5, %v2575_v30 }
 0xda8   :  { %v2643_v59 = vpop.permute.xlu0 %2642 }
 0xda9   :  { %5359 = vmatprep.subr.msk.bf16.mxu1 %vm428_vm5, %v2643_v59  ;;  %3468 = vrot.lane.b32.xlu1 %v6758_v7, %s5827_s16  ;;  %v2654_v50 = vsel %vm428_vm5, %v2643_v59, 0 }
 0xdaa   :  { %3036 = vrot.lane.b32.xlu0 %v6808_v39, %s5826_s13  ;;  %5146 = vmatpush3.bf16.xpose.msra.mxu1 %v2654_v50 }
 0xdac   :  { %v2641_v20 = vpop.permute.xlu0 %2640 }
 0xdad   :  { %3466 = vrot.lane.b32.xlu1 %v6739_v41, %s5827_s16  ;;  %5360 = vmatprep.subr.msk.bf16.mxu1 %vm428_vm5, %v2641_v20  ;;  %v2651_v38 = vsel %vm428_vm5, %v2641_v20, 0 }
 0xdae   :  { %3406 = vrot.lane.b32.xlu0 %v6754_v58, %s5827_s16  ;;  %5140 = vmatpush3.bf16.xpose.msra.mxu0 %v2585_v24 }
 0xdb1   :  { %3652 = vrot.lane.b32.xlu1 %v6781_v19, %s5827_s16 }
 0xdb2   :  { %3404 = vrot.lane.b32.xlu0 %v6730_v44, %s5827_s16  ;;  %5148 = vmatpush3.bf16.xpose.msra.mxu1 %v2651_v38 }
 0xdb5   :  { %5142 = vmatmul.mubr.msk.bf16.vlgmr.msra.gmra.mxu0 %vm428_vm5, %v6754_v58  ;;  %3590 = vrot.lane.b32.xlu1 %v2562_v31, %s5827_s16 }
 0xdb6   :  { %3530 = vrot.lane.b32.xlu0 %v6764_v4, %s5827_s16  ;;  %5157 = vmatprep.mubr.msk.bf16.mxu0 %vm428_vm5, %v6768_v32 }
 0xdb9   :  { %5150 = vmatmul.mubr.msk.bf16.vlgmr.msra.gmra.mxu1 %vm428_vm5, %v6758_v7 }
 0xdba   :  { %3592 = vrot.lane.b32.xlu0 %v6770_v62, %s5827_s16  ;;  %5165 = vmatprep.mubr.msk.bf16.mxu1 %vm428_vm5, %v2562_v31 }
 0xdbe   :  { %3528 = vrot.lane.b32.xlu0 %v6768_v32, %s5827_s16 }
 0xdc2   :  { %3654 = vrot.lane.b32.xlu0 %v6776_v25, %s5827_s16 }
 0xdc6   :  { %3716 = vrot.lane.b32.xlu0 %v6783_v5, %s5827_s16 }
 0xdca   :  { %3778 = vrot.lane.b32.xlu0 %v6789_v26, %s5827_s16 }
 0xdf9   :  { %v2709_v44 = vpop.permute.xlu1 %2708 }
 0xdfa   :  { %5361 = vmatprep.subr.msk.bf16.mxu0 %vm428_vm5, %v2709_v44  ;;  %v2720_v28 = vsel %vm428_vm5, %v2709_v44, 0 }
 0xdfb   :  { %5154 = vmatpush3.bf16.xpose.msra.mxu0 %v2720_v28 }
 0xe07   :  { %v2707_v10 = vpop.permute.xlu1 %2706  ;;  %v2775_v34 = vpop.permute.xlu0 %2774 }
 0xe08   :  { %5362 = vmatprep.subr.msk.bf16.mxu0 %vm428_vm5, %v2707_v10  ;;  %5363 = vmatprep.subr.msk.bf16.mxu1 %vm428_vm5, %v2775_v34  ;;  %v2717_v43 = vsel %vm428_vm5, %v2707_v10, 0  ;;  %v2786_v22 = vsel %vm428_vm5, %v2775_v34, 0 }
 0xe09   :  { %5156 = vmatpush3.bf16.xpose.msra.mxu0 %v2717_v43  ;;  %5162 = vmatpush3.bf16.xpose.msra.mxu1 %v2786_v22 }
 0xe0b   :  { %v2841_v35 = vpop.permute.xlu1 %2840  ;;  %v2773_v61 = vpop.permute.xlu0 %2772 }
 0xe0c   :  { %5364 = vmatprep.subr.msk.bf16.mxu1 %vm428_vm5, %v2773_v61  ;;  %5365 = vmatprep.subr.msk.bf16.mxu0 %vm428_vm5, %v2841_v35  ;;  %v2783_v0 = vsel %vm428_vm5, %v2773_v61, 0  ;;  %v2852_v58 = vsel %vm428_vm5, %v2841_v35, 0 }
 0xe0f   :  { %v2907_v41 = vpop.permute.xlu0 %2906  ;;  %v2839_v7 = vpop.permute.xlu1 %2838 }
 0xe10   :  { %5158 = vmatmul.mubr.msk.bf16.vlgmr.msra.gmra.mxu0 %vm428_vm5, %v6764_v4  ;;  %v2849_v4 = vsel %vm428_vm5, %v2839_v7, 0  ;;  %v2918_v53 = vsel %vm428_vm5, %v2907_v41, 0 }
 0xe11   :  { %5164 = vmatpush3.bf16.xpose.msra.mxu1 %v2783_v0  ;;  %5170 = vmatpush3.bf16.xpose.msra.mxu0 %v2852_v58 }
 0xe12   :  { %5173 = vmatprep.mubr.msk.bf16.mxu0 %vm428_vm5, %v6781_v19  ;;  %5366 = vmatprep.subr.msk.bf16.mxu0 %vm428_vm5, %v2839_v7 }
 0xe13   :  { %5367 = vmatprep.subr.msk.bf16.mxu1 %vm428_vm5, %v2907_v41  ;;  %v2905_v13 = vpop.permute.xlu0 %2904  ;;  %v2973_v51 = vpop.permute.xlu1 %2972 }
 0xe14   :  { %v2984_v37 = vsel %vm428_vm5, %v2973_v51, 0  ;;  %v2915_v36 = vsel %vm428_vm5, %v2905_v13, 0 }
 0xe17   :  { %v2971_v32 = vpop.permute.xlu1 %2970 }
 0xe18   :  { %5166 = vmatmul.mubr.msk.bf16.vlgmr.msra.gmra.mxu1 %vm428_vm5, %v6770_v62  ;;  %v3039_v9 = vpop.permute.xlu0 %3038  ;;  %v2981_v27 = vsel %vm428_vm5, %v2971_v32, 0 }
 0xe19   :  { %5172 = vmatpush3.bf16.xpose.msra.mxu0 %v2849_v4  ;;  %5178 = vmatpush3.bf16.xpose.msra.mxu1 %v2918_v53  ;;  %v3050_v42 = vsel %vm428_vm5, %v3039_v9, 0 }
 0xe1a   :  { %5181 = vmatprep.mubr.msk.bf16.mxu1 %vm428_vm5, %v6791_v18  ;;  %5368 = vmatprep.subr.msk.bf16.mxu1 %vm428_vm5, %v2905_v13 }
 0xe1b   :  { %5369 = vmatprep.subr.msk.bf16.mxu0 %vm428_vm5, %v2973_v51 }
 0xe1c   :  { %v3037_v14 = vpop.permute.xlu0 %3036 }
 0xe1d   :  { %v3047_v45 = vsel %vm428_vm5, %v3037_v14, 0 }
 0xe20   :  { %5174 = vmatmul.mubr.msk.bf16.vlgmr.msra.gmra.mxu0 %vm428_vm5, %v6776_v25  ;;  %v3407_v62 = vpop.permute.xlu0 %3406  ;;  %v3469_v25 = vpop.permute.xlu1 %3468 }
 0xe21   :  { %5180 = vmatpush3.bf16.xpose.msra.mxu1 %v2915_v36  ;;  %5186 = vmatpush3.bf16.xpose.msra.mxu0 %v2984_v37  ;;  %v3416_v3 = vand.u32 %v3407_v62, %v6171_v48  ;;  %v3478_v31 = vand.u32 %v3469_v25, %v6171_v48 }
 0xe22   :  { %5189 = vmatprep.mubr.msk.bf16.mxu0 %vm428_vm5, %v6797_v12  ;;  %5370 = vmatprep.subr.msk.bf16.mxu0 %vm428_vm5, %v2971_v32 }
 0xe23   :  { %5371 = vmatprep.subr.msk.bf16.mxu1 %vm428_vm5, %v3039_v9 }
 0xe24   :  { %v3405_v47 = vpop.permute.xlu0 %3404  ;;  %v3467_v11 = vpop.permute.xlu1 %3466 }
 0xe28   :  { %5182 = vmatmul.mubr.msk.bf16.vlgmr.msra.gmra.mxu1 %vm428_vm5, %v6783_v5  ;;  %v3531_v2 = vpop.permute.xlu0 %3530 }
 0xe29   :  { %5188 = vmatpush3.bf16.xpose.msra.mxu0 %v2981_v27  ;;  %5194 = vmatpush3.bf16.xpose.msra.mxu1 %v3050_v42  ;;  %v6892_v6 = vand.u32 %v3531_v2, %v6171_v48 }
 0xe2a   :  { %5197 = vmatprep.mubr.msk.bf16.mxu1 %vm428_vm5, %v6808_v39  ;;  %5372 = vmatprep.subr.msk.bf16.mxu1 %vm428_vm5, %v3037_v14 }
 0xe2b   :  { %5201 = vmatprep.subr.bf16.mxu0 %v3416_v3 }
 0xe2c   :  { %v3593_v19 = vpop.permute.xlu0 %3592 }
 0xe2d   :  { %v6898_v5 = vand.u32 %v3593_v19, %v6171_v48 }
 0xe30   :  { %5190 = vmatmul.mubr.msk.bf16.vlgmr.msra.gmra.mxu0 %vm428_vm5, %v6789_v26 }
 0xe31   :  { %5196 = vmatpush3.bf16.xpose.msra.mxu1 %v3047_v45  ;;  %5202 = vmatpush3.bf16.msra.mxu0 %v3416_v3 }
 0xe32   :  { %5203 = vmatprep.subr.bf16.mxu0 %v3405_v47  ;;  %5209 = vmatprep.subr.bf16.mxu1 %v3478_v31 }
 0xe35   :  { %5204 = vmatpush3.bf16.msra.mxu0 %v3405_v47 }
 0xe36   :  { %5217 = vmatprep.subr.bf16.mxu0 %v6892_v6 }
 0xe38   :  { %5198 = vmatmul.mubr.msk.bf16.vlgmr.msra.gmra.mxu1 %vm428_vm5, %v6799_v16 }
 0xe39   :  { %5210 = vmatpush3.bf16.msra.mxu1 %v3478_v31 }
 0xe3a   :  { %5211 = vmatprep.subr.bf16.mxu1 %v3467_v11 }
 0xe3d   :  { %5212 = vmatpush3.bf16.msra.mxu1 %v3467_v11 }
 0xe3e   :  { %5225 = vmatprep.subr.bf16.mxu1 %v6898_v5 }
 0xe75   :  { %v5143_v46 = vpop.f32.mrf.mxu0 }
 0xe76   :  { %v6901_v60 = vmul.f32 0.35355338, %v5143_v46 }
 0xe77   :  { %v2624_v57 = vpop.f32.mrf.mxu0 }
 0xe78   :  { %v6903_v26 = vmul.f32 0.35355338, %v2624_v57  ;;  %v3130_v33 = vsel %vm982_vm7, %v6901_v60, -inf }
 0xe79   :  { %3131 = vmax.xlane.f32.xlu0 %v3130_v33  ;;  %v5144_v54 = vpop.f32.mrf.mxu0  ;;  %v5151_v21 = vpop.f32.mrf.mxu1 }
 0xe7a   :  { %v3124_v63 = vsel %vm975_vm8, %v6903_v26, -inf  ;;  %v6911_v30 = vmul.f32 0.35355338, %v5151_v21  ;;  %v6963_v54 = vpop.permute.xlu0 %3528 }
 0xe7b   :  { %3125 = vmax.xlane.f32.xlu1 %v3124_v63  ;;  %v2627_v17 = vpop.f32.mrf.mxu0  ;;  %v2690_v49 = vpop.f32.mrf.mxu1 }
 0xe7c   :  { %v6909_v56 = vmul.f32 0.35355338, %v2627_v17  ;;  %v6917_v24 = vmul.f32 0.35355338, %v2690_v49  ;;  %v3139_v38 = vsel %vm982_vm7, %v6911_v30, -inf }
 0xe7d   :  { %v5152_v40 = vpop.f32.mrf.mxu1 }
 0xe7e   :  { %v3127_v59 = vsel %vm975_vm8, %v6909_v56, -inf  ;;  %v3133_v28 = vsel %vm975_vm8, %v6917_v24, -inf }
 0xe7f   :  { %3128 = vmax.xlane.f32.xlu0 %v3127_v59  ;;  %v2693_v50 = vpop.f32.mrf.mxu1 }
 0xe80   :  { %v6915_v20 = vmul.f32 0.35355338, %v2693_v50 }
 0xe82   :  { %v3136_v44 = vsel %vm975_vm8, %v6915_v20, -inf }
 0xe83   :  { %3140 = vmax.xlane.f32.xlu0 %v3139_v38  ;;  %3137 = vmax.xlane.f32.xlu1 %v3136_v44 }
 0xe87   :  { %3134 = vmax.xlane.f32.xlu0 %v3133_v28  ;;  %v6977_v28 = vpop.permute.xlu0 %3654 }
 0xed0   :  { %v5159_v10 = vpop.f32.mrf.mxu0 }
 0xed1   :  { %v6925_v34 = vmul.f32 0.35355338, %v5159_v10 }
 0xed2   :  { %v2756_v43 = vpop.f32.mrf.mxu0 }
 0xed3   :  { %v6927_v22 = vmul.f32 0.35355338, %v2756_v43  ;;  %v3148_v35 = vsel %vm982_vm7, %v6925_v34, -inf }
 0xed4   :  { %v5160_v61 = vpop.f32.mrf.mxu0  ;;  %3149 = vmax.xlane.f32.xlu1 %v3148_v35 }
 0xed5   :  { %v3142_v58 = vsel %vm975_vm8, %v6927_v22, -inf }
 0xed6   :  { %v2759_v41 = vpop.f32.mrf.mxu0 }
 0xed7   :  { %v6931_v0 = vmul.f32 0.35355338, %v2759_v41 }
 0xed8   :  { %3143 = vmax.xlane.f32.xlu1 %v3142_v58  ;;  %v5167_v7 = vpop.f32.mrf.mxu1 }
 0xed9   :  { %v6935_v13 = vmul.f32 0.35355338, %v5167_v7  ;;  %v3145_v4 = vsel %vm975_vm8, %v6931_v0, -inf  ;;  %v6985_v7 = vpop.permute.xlu0 %3716 }
 0xeda   :  { %3146 = vmax.xlane.f32.xlu0 %v3145_v4  ;;  %v2822_v53 = vpop.f32.mrf.mxu1 }
 0xedb   :  { %v6939_v51 = vmul.f32 0.35355338, %v2822_v53  ;;  %v3157_v14 = vsel %vm982_vm7, %v6935_v13, -inf }
 0xedc   :  { %v5168_v9 = vpop.f32.mrf.mxu1 }
 0xedd   :  { %v3151_v27 = vsel %vm975_vm8, %v6939_v51, -inf }
 0xede   :  { %3158 = vmax.xlane.f32.xlu0 %v3157_v14  ;;  %v2825_v37 = vpop.f32.mrf.mxu1 }
 0xedf   :  { %v6943_v36 = vmul.f32 0.35355338, %v2825_v37  ;;  %v6993_v37 = vpop.permute.xlu1 %3652 }
 0xee0   :  { %v5175_v32 = vpop.f32.mrf.mxu0 }
 0xee1   :  { %v6945_v62 = vmul.f32 0.35355338, %v5175_v32  ;;  %v3154_v42 = vsel %vm975_vm8, %v6943_v36, -inf }
 0xee2   :  { %v2888_v3 = vpop.f32.mrf.mxu0  ;;  %3152 = vmax.xlane.f32.xlu0 %v3151_v27  ;;  %3155 = vmax.xlane.f32.xlu1 %v3154_v42 }
 0xee3   :  { %v6951_v25 = vmul.f32 0.35355338, %v2888_v3  ;;  %v3166_v31 = vsel %vm982_vm7, %v6945_v62, -inf }
 0xee4   :  { %v5176_v47 = vpop.f32.mrf.mxu0 }
 0xee5   :  { %v3160_v57 = vsel %vm975_vm8, %v6951_v25, -inf  ;;  %v6999_v47 = vpop.permute.xlu0 %3778 }
 0xee6   :  { %v2891_v45 = vpop.f32.mrf.mxu0  ;;  %3167 = vmax.xlane.f32.xlu1 %v3166_v31  ;;  %v7001_v31 = vpop.permute.xlu1 %3590 }
 0xee7   :  { %v6955_v2 = vmul.f32 0.35355338, %v2891_v45 }
 0xee8   :  { %v5183_v11 = vpop.f32.mrf.mxu1 }
 0xee9   :  { %v6957_v19 = vmul.f32 0.35355338, %v5183_v11  ;;  %v3163_v46 = vsel %vm975_vm8, %v6955_v2, -inf }
 0xeea   :  { %3164 = vmax.xlane.f32.xlu0 %v3163_v46  ;;  %3161 = vmax.xlane.f32.xlu1 %v3160_v57  ;;  %v2954_v33 = vpop.f32.mrf.mxu1 }
 0xeeb   :  { %v6965_v63 = vmul.f32 0.35355338, %v2954_v33  ;;  %v3175_v17 = vsel %vm982_vm7, %v6957_v19, -inf }
 0xeec   :  { %v5184_v21 = vpop.f32.mrf.mxu1 }
 0xeed   :  { %v3169_v38 = vsel %vm975_vm8, %v6965_v63, -inf }
 0xeee   :  { %3176 = vmax.xlane.f32.xlu0 %v3175_v17  ;;  %v2957_v49 = vpop.f32.mrf.mxu1 }
 0xeef   :  { %v6969_v40 = vmul.f32 0.35355338, %v2957_v49 }
 0xef0   :  { %v5191_v59 = vpop.f32.mrf.mxu0 }
 0xef1   :  { %v6971_v50 = vmul.f32 0.35355338, %v5191_v59  ;;  %v3172_v44 = vsel %vm975_vm8, %v6969_v40, -inf }
 0xef2   :  { %v3020_v10 = vpop.f32.mrf.mxu0  ;;  %3170 = vmax.xlane.f32.xlu0 %v3169_v38  ;;  %3173 = vmax.xlane.f32.xlu1 %v3172_v44 }
 0xef3   :  { %v6979_v35 = vmul.f32 0.35355338, %v3020_v10  ;;  %v3184_v61 = vsel %vm982_vm7, %v6971_v50, -inf }
 0xef4   :  { %v5192_v43 = vpop.f32.mrf.mxu0 }
 0xef5   :  { %v3178_v14 = vsel %vm975_vm8, %v6979_v35, -inf }
 0xef6   :  { %v3023_v41 = vpop.f32.mrf.mxu0  ;;  %3185 = vmax.xlane.f32.xlu1 %v3184_v61 }
 0xef7   :  { %v6983_v58 = vmul.f32 0.35355338, %v3023_v41 }
 0xef8   :  { %v5199_v4 = vpop.f32.mrf.mxu1 }
 0xef9   :  { %v6987_v53 = vmul.f32 0.35355338, %v5199_v4  ;;  %v3181_v9 = vsel %vm975_vm8, %v6983_v58, -inf }
 0xefa   :  { %3182 = vmax.xlane.f32.xlu0 %v3181_v9  ;;  %3179 = vmax.xlane.f32.xlu1 %v3178_v14  ;;  %v3086_v32 = vpop.f32.mrf.mxu1 }
 0xefb   :  { %v6995_v42 = vmul.f32 0.35355338, %v3086_v32  ;;  %v3193_v3 = vsel %vm982_vm7, %v6987_v53, -inf }
 0xefc   :  { %v5200_v27 = vpop.f32.mrf.mxu1 }
 0xefd   :  { %v3187_v45 = vsel %vm975_vm8, %v6995_v42, -inf }
 0xefe   :  { %3194 = vmax.xlane.f32.xlu0 %v3193_v3 }
 0xf02   :  { %v3132_v11 = vpop.xlane.xlu0 %3131  ;;  %3188 = vmax.xlane.f32.xlu0 %v3187_v45 }
 0xf03   :  { %v3198_v46 = vsub.f32 %v6901_v60, %v3132_v11 }
 0xf04   :  { %v3126_v57 = vpop.xlane.xlu1 %3125 }
 0xf05   :  { %v3224_v33 = vmul.f32 1.442695, %v3198_v46  ;;  %v3196_v21 = vsub.f32 %v6903_v26, %v3126_v57 }
 0xf07   :  { %5676 = vpow2.f32 %v3224_v33  ;;  %v3220_v17 = vmul.f32 1.442695, %v3196_v21 }
 0xf08   :  { %v3129_v49 = vpop.xlane.xlu0 %3128 }
 0xf09   :  { %5678 = vpow2.f32 %v3220_v17  ;;  %v3197_v59 = vsub.f32 %v6909_v56, %v3129_v49  ;;  %v3089_v56 = vpop.f32.mrf.mxu1 }
 0xf0a   :  { %v7016_v14 = vmul.f32 0.35355338, %v3089_v56 }
 0xf0b   :  { %v3222_v38 = vmul.f32 1.442695, %v3197_v59 }
 0xf0c   :  { %v3141_v44 = vpop.xlane.xlu0 %3140  ;;  %v3190_v27 = vsel %vm975_vm8, %v7016_v14, -inf  ;;  %v3138_v57 = vpop.xlane.xlu1 %3137 }
 0xf0d   :  { %5680 = vpow2.f32 %v3222_v38  ;;  %v3201_v10 = vsub.f32 %v6911_v30, %v3141_v44  ;;  %v3200_v33 = vsub.f32 %v6915_v20, %v3138_v57 }
 0xf0f   :  { %v3230_v43 = vmul.f32 1.442695, %v3201_v10  ;;  %v3228_v21 = vmul.f32 1.442695, %v3200_v33 }
 0xf10   :  { %v3135_v61 = vpop.xlane.xlu0 %3134 }
 0xf11   :  { %5682 = vpow2.f32 %v3230_v43  ;;  %v3199_v60 = vsub.f32 %v6917_v24, %v3135_v61 }
 0xf13   :  { %v3226_v41 = vmul.f32 1.442695, %v3199_v60 }
 0xf14   :  { %v7010_v4 = vpop.eup %5676 }
 0xf15   :  { %5684 = vpow2.f32 %v3226_v41  ;;  %v3274_v26 = vsel %vm982_vm7, %v7010_v4, 0.0 }
 0xf16   :  { %v7014_v9 = vpop.eup %5678  ;;  %3275 = vadd.xlane.f32.xlu1 %v3274_v26  ;;  %5686 = vpow2.f32 %v3228_v21 }
 0xf17   :  { %v3268_v30 = vsel %vm975_vm8, %v7014_v9, 0.0 }
 0xf1a   :  { %v7020_v32 = vpop.eup %5680  ;;  %3269 = vadd.xlane.f32.xlu1 %v3268_v30 }
 0xf1b   :  { %v3271_v24 = vsel %vm975_vm8, %v7020_v32, 0.0 }
 0xf1c   :  { %3272 = vadd.xlane.f32.xlu0 %v3271_v24 }
 0xf1e   :  { %v7026_v3 = vpop.eup %5682  ;;  %3191 = vmax.xlane.f32.xlu1 %v3190_v27 }
 0xf1f   :  { %v3283_v45 = vsel %vm982_vm7, %v7026_v3, 0.0 }
 0xf20   :  { %3284 = vadd.xlane.f32.xlu0 %v3283_v45 }
 0xf22   :  { %v7030_v11 = vpop.eup %5684 }
 0xf23   :  { %v3277_v46 = vsel %vm975_vm8, %v7030_v11, 0.0  ;;  %v7037_v17 = vpop.eup %5686 }
 0xf24   :  { %3278 = vadd.xlane.f32.xlu0 %v3277_v46  ;;  %v3280_v49 = vsel %vm975_vm8, %v7037_v17, 0.0 }
 0xf2f   :  { %3714 = vrot.lane.b32.xlu1 %v6791_v18, %s5827_s16 }
 0xf53   :  { %3281 = vadd.xlane.f32.xlu1 %v3280_v49 }
 0xf5d   :  { %v3150_v59 = vpop.xlane.xlu1 %3149 }
 0xf5e   :  { %v3204_v38 = vsub.f32 %v6925_v34, %v3150_v59 }
 0xf60   :  { %v3236_v44 = vmul.f32 1.442695, %v3204_v38 }
 0xf61   :  { %v3144_v10 = vpop.xlane.xlu1 %3143 }
 0xf62   :  { %5688 = vpow2.f32 %v3236_v44  ;;  %v3202_v43 = vsub.f32 %v6927_v22, %v3144_v10 }
 0xf63   :  { %v3147_v18 = vpop.xlane.xlu0 %3146 }
 0xf64   :  { %v3232_v61 = vmul.f32 1.442695, %v3202_v43  ;;  %v3203_v20 = vsub.f32 %v6931_v0, %v3147_v18 }
 0xf66   :  { %5690 = vpow2.f32 %v3232_v61  ;;  %v3234_v60 = vmul.f32 1.442695, %v3203_v20 }
 0xf67   :  { %v3159_v41 = vpop.xlane.xlu0 %3158 }
 0xf68   :  { %5692 = vpow2.f32 %v3234_v60  ;;  %v3207_v26 = vsub.f32 %v6935_v13, %v3159_v41 }
 0xf6a   :  { %v3242_v56 = vmul.f32 1.442695, %v3207_v26 }
 0xf6b   :  { %v3153_v30 = vpop.xlane.xlu0 %3152  ;;  %v3156_v24 = vpop.xlane.xlu1 %3155 }
 0xf6c   :  { %5694 = vpow2.f32 %v3242_v56  ;;  %v3205_v34 = vsub.f32 %v6939_v51, %v3153_v30  ;;  %v3206_v27 = vsub.f32 %v6943_v36, %v3156_v24 }
 0xf6e   :  { %v3238_v45 = vmul.f32 1.442695, %v3205_v34  ;;  %v3240_v22 = vmul.f32 1.442695, %v3206_v27 }
 0xf6f   :  { %v7047_v46 = vpop.eup %5688  ;;  %v3168_v57 = vpop.xlane.xlu1 %3167 }
 0xf70   :  { %5696 = vpow2.f32 %v3238_v45  ;;  %v3210_v0 = vsub.f32 %v6945_v62, %v3168_v57  ;;  %v3292_v33 = vsel %vm982_vm7, %v7047_v46, 0.0 }
 0xf71   :  { %5698 = vpow2.f32 %v3240_v22  ;;  %3293 = vadd.xlane.f32.xlu1 %v3292_v33 }
 0xf72   :  { %v3248_v13 = vmul.f32 1.442695, %v3210_v0 }
 0xf73   :  { %v7052_v21 = vpop.eup %5690  ;;  %v3165_v49 = vpop.xlane.xlu0 %3164 }
 0xf74   :  { %v3162_v51 = vpop.xlane.xlu1 %3161  ;;  %5700 = vpow2.f32 %v3248_v13  ;;  %v3209_v36 = vsub.f32 %v6955_v2, %v3165_v49  ;;  %v3286_v38 = vsel %vm975_vm8, %v7052_v21, 0.0 }
 0xf75   :  { %v3208_v59 = vsub.f32 %v6951_v25, %v3162_v51  ;;  %v7058_v44 = vpop.eup %5692  ;;  %3287 = vadd.xlane.f32.xlu1 %v3286_v38 }
 0xf76   :  { %v3246_v62 = vmul.f32 1.442695, %v3209_v36  ;;  %v3289_v43 = vsel %vm975_vm8, %v7058_v44, 0.0 }
 0xf77   :  { %v3244_v10 = vmul.f32 1.442695, %v3208_v59  ;;  %v3177_v18 = vpop.xlane.xlu0 %3176  ;;  %3290 = vadd.xlane.f32.xlu0 %v3289_v43 }
 0xf78   :  { %5702 = vpow2.f32 %v3246_v62  ;;  %v3213_v61 = vsub.f32 %v6957_v19, %v3177_v18 }
 0xf79   :  { %v7063_v20 = vpop.eup %5694  ;;  %5704 = vpow2.f32 %v3244_v10 }
 0xf7a   :  { %v3254_v25 = vmul.f32 1.442695, %v3213_v61  ;;  %v3301_v2 = vsel %vm982_vm7, %v7063_v20, 0.0 }
 0xf7b   :  { %v3174_v60 = vpop.xlane.xlu1 %3173  ;;  %3302 = vadd.xlane.f32.xlu0 %v3301_v2  ;;  %v3171_v24 = vpop.xlane.xlu0 %3170 }
 0xf7c   :  { %5706 = vpow2.f32 %v3254_v25  ;;  %v3212_v41 = vsub.f32 %v6969_v40, %v3174_v60 }
 0xf7d   :  { %v7068_v26 = vpop.eup %5696 }
 0xf7e   :  { %v7070_v56 = vpop.eup %5698  ;;  %v3252_v30 = vmul.f32 1.442695, %v3212_v41  ;;  %v3295_v19 = vsel %vm975_vm8, %v7068_v26, 0.0 }
 0xf7f   :  { %v3186_v34 = vpop.xlane.xlu1 %3185  ;;  %3296 = vadd.xlane.f32.xlu0 %v3295_v19  ;;  %v3298_v27 = vsel %vm975_vm8, %v7070_v56, 0.0 }
 0xf80   :  { %v3216_v45 = vsub.f32 %v6971_v50, %v3186_v34  ;;  %3299 = vadd.xlane.f32.xlu1 %v3298_v27  ;;  %5708 = vpow2.f32 %v3252_v30 }
 0xf81   :  { %v7077_v22 = vpop.eup %5700 }
 0xf82   :  { %v3260_v40 = vmul.f32 1.442695, %v3216_v45  ;;  %v3310_v57 = vsel %vm982_vm7, %v7077_v22, 0.0 }
 0xf83   :  { %v3183_v0 = vpop.xlane.xlu0 %3182  ;;  %v3180_v33 = vpop.xlane.xlu1 %3179 }
 0xf84   :  { %5710 = vpow2.f32 %v3260_v40  ;;  %v3215_v13 = vsub.f32 %v6983_v58, %v3183_v0  ;;  %v3214_v49 = vsub.f32 %v6979_v35, %v3180_v33  ;;  %3311 = vadd.xlane.f32.xlu1 %v3310_v57  ;;  %v3211_v57 = vsub.f32 %v6965_v63, %v3171_v24 }
 0xf85   :  { %v7083_v51 = vpop.eup %5702 }
 0xf86   :  { %v7085_v36 = vpop.eup %5704  ;;  %v3256_v50 = vmul.f32 1.442695, %v3214_v49  ;;  %v3307_v59 = vsel %vm975_vm8, %v7083_v51, 0.0  ;;  %v3258_v38 = vmul.f32 1.442695, %v3215_v13 }
 0xf87   :  { %v3195_v62 = vpop.xlane.xlu0 %3194  ;;  %3308 = vadd.xlane.f32.xlu0 %v3307_v59  ;;  %v3304_v10 = vsel %vm975_vm8, %v7085_v36, 0.0  ;;  %v3250_v13 = vmul.f32 1.442695, %v3211_v57 }
 0xf88   :  { %v3219_v43 = vsub.f32 %v6987_v53, %v3195_v62  ;;  %3305 = vadd.xlane.f32.xlu1 %v3304_v10  ;;  %5712 = vpow2.f32 %v3256_v50 }
 0xf89   :  { %v7092_v58 = vpop.eup %5706  ;;  %5714 = vpow2.f32 %v3258_v38 }
 0xf8a   :  { %v3319_v35 = vsel %vm982_vm7, %v7092_v58, 0.0  ;;  %v3266_v18 = vmul.f32 1.442695, %v3219_v43 }
 0xf8b   :  { %v3189_v40 = vpop.xlane.xlu0 %3188 }
 0xf8c   :  { %3320 = vadd.xlane.f32.xlu1 %v3319_v35  ;;  %5716 = vpow2.f32 %v3266_v18  ;;  %v3217_v49 = vsub.f32 %v6995_v42, %v3189_v40 }
 0xf8d   :  { %v7096_v61 = vpop.eup %5708 }
 0xf8e   :  { %v3316_v25 = vsel %vm975_vm8, %v7096_v61, 0.0  ;;  %v3262_v38 = vmul.f32 1.442695, %v3217_v49 }
 0xf90   :  { %3317 = vadd.xlane.f32.xlu1 %v3316_v25 }
 0xf91   :  { %v7100_v2 = vpop.eup %5710 }
 0xf92   :  { %v3328_v53 = vsel %vm982_vm7, %v7100_v2, 0.0 }
 0xf94   :  { %3329 = vadd.xlane.f32.xlu1 %v3328_v53 }
 0xf95   :  { %v7104_v60 = vpop.eup %5712 }
 0xf96   :  { %v3322_v41 = vsel %vm975_vm8, %v7104_v60, 0.0  ;;  %v7108_v30 = vpop.eup %5714 }
 0xf97   :  { %v3325_v19 = vsel %vm975_vm8, %v7108_v30, 0.0 }
 0xf98   :  { %3323 = vadd.xlane.f32.xlu1 %v3322_v41  ;;  %v5799_v41 = vld [vmem:[%s7446_s3 + $0x30] ss:$8 sps:$4 sm:$0xff]  }
 0xf99   :  { %v7112_v34 = vpop.eup %5716 }
 0xf9a   :  { %v3337_v45 = vsel %vm982_vm7, %v7112_v34, 0.0 }
 0xf9c   :  { %3326 = vadd.xlane.f32.xlu1 %v3325_v19 }
 0xf9d   :  { %3840 = vrot.lane.b32.xlu0 %v6799_v16, %s5827_s16 }
 0xf9f   :  { %v3276_v27 = vpop.xlane.xlu1 %3275 }
 0xfa0   :  { %3338 = vadd.xlane.f32.xlu1 %v3337_v45  ;;  %5718 = vrcp.f32 %v3276_v27 }
 0xfa3   :  { %v3270_v0 = vpop.xlane.xlu1 %3269 }
 0xfa4   :  { %5720 = vrcp.f32 %v3270_v0 }
 0xfa5   :  { %v3273_v33 = vpop.xlane.xlu0 %3272 }
 0xfa6   :  { %5722 = vrcp.f32 %v3273_v33 }
 0xfa7   :  { %v3192_v50 = vpop.xlane.xlu1 %3191  ;;  %5724 = vpow2.f32 %v3250_v13 }
 0xfa8   :  { %v3218_v59 = vsub.f32 %v7016_v14, %v3192_v50 }
 0xfa9   :  { %v3285_v19 = vpop.xlane.xlu0 %3284 }
 0xfaa   :  { %v3264_v16 = vmul.f32 1.442695, %v3218_v59 }
 0xfac   :  { %5726 = vpow2.f32 %v3264_v16 }
 0xfad   :  { %5728 = vpow2.f32 %v3262_v38  ;;  %v5719_v62 = vpop.eup %5718  ;;  %v3279_v27 = vpop.xlane.xlu0 %3278 }
 0xfae   :  { %v3366_v63 = vmul.f32 %v5719_v62, %v7010_v4  ;;  %5730 = vrcp.f32 %v3285_v19 }
 0xfaf   :  { %5732 = vrcp.f32 %v3279_v27 }
 0xfb0   :  { %v3389_v25 = vpack.c.bf16 %v3366_v63, %v3366_v63 }
 0xfb1   :  { %v5721_v10 = vpop.eup %5720 }
 0xfb2   :  { %v3364_v24 = vmul.f32 %v5721_v10, %v7014_v9 }
 0xfb3   :  { %v5723_v43 = vpop.eup %5722 }
 0xfb4   :  { %v3365_v35 = vmul.f32 %v5723_v43, %v7020_v32  ;;  %v7124_v42 = vpop.eup %5724  ;;  %v3664_v32 = vand.u32 %v6977_v28, %v6171_v48  ;;  %v5800_v28 = vld [vmem:[%s7446_s3 + $0x20] ss:$8 sps:$4 sm:$0xff]  }
 0xfb5   :  { %v3313_v4 = vsel %vm975_vm8, %v7124_v42, 0.0 }
 0xfb6   :  { %v3388_v18 = vpack.c.bf16 %v3365_v35, %v3364_v24 }
 0xfb8   :  { %5205 = vmatprep.mubr.msk.bf16.mxu0 %vm975_vm8, %v3388_v18 }
 0xfb9   :  { %v7127_v14 = vpop.eup %5726  ;;  %5206 = vmatmul.mubr.msk.bf16.vlgmr.msra.gmra.mxu0 %vm975_vm8, %v3389_v25 }
 0xfba   :  { %5218 = vmatpush3.bf16.msra.mxu0 %v6892_v6  ;;  %v3334_v53 = vsel %vm975_vm8, %v7127_v14, 0.0  ;;  %v7136_v9 = vpop.eup %5728 }
 0xfbb   :  { %5219 = vmatprep.subr.bf16.mxu0 %v6963_v54  ;;  %3335 = vadd.xlane.f32.xlu1 %v3334_v53  ;;  %v3331_v6 = vsel %vm975_vm8, %v7136_v9, 0.0  ;;  %v5731_v45 = vpop.eup %5730 }
 0xfbc   :  { %3314 = vadd.xlane.f32.xlu0 %v3313_v4  ;;  %v5733_v40 = vpop.eup %5732  ;;  %v3369_v0 = vmul.f32 %v5731_v45, %v7026_v3 }
 0xfbd   :  { %v3367_v33 = vmul.f32 %v5733_v40, %v7030_v11 }
 0xfbe   :  { %5220 = vmatpush3.bf16.msra.mxu0 %v6963_v54  ;;  %v7155_v54 = vpop.permute.xlu1 %3714  ;;  %v3391_v50 = vpack.c.bf16 %v3369_v0, %v3369_v0 }
 0xfbf   :  { %5233 = vmatprep.subr.bf16.mxu0 %v3664_v32 }
 0xfc0   :  { %3332 = vadd.xlane.f32.xlu0 %v3331_v6 }
 0xfcc   :  { %3776 = vrot.lane.b32.xlu1 %v6797_v12, %s5827_s16 }
 0xfd0   :  { %4007 = vrot.lane.b32.xlu1 %v5799_v41, %s5832_s22  ;;  %v3788_v41 = vand.u32 %v6999_v47, %v6171_v48 }
 0xfd4   :  { %4005 = vrot.lane.b32.xlu1 %v5800_v28, %s5832_s22 }
 0xfd6   :  { %3838 = vrot.lane.b32.xlu0 %v6808_v39, %s5827_s16  ;;  %v3726_v39 = vand.u32 %v6985_v7, %v6171_v48 }
 0xfdc   :  { %v3282_v12 = vpop.xlane.xlu1 %3281 }
 0xfdd   :  { %5734 = vrcp.f32 %v3282_v12 }
 0xfea   :  { %v5735_v57 = vpop.eup %5734 }
 0xfeb   :  { %v3368_v13 = vmul.f32 %v5735_v57, %v7037_v17 }
 0xfed   :  { %v3390_v49 = vpack.c.bf16 %v3368_v13, %v3367_v33 }
 0xfef   :  { %5213 = vmatprep.mubr.msk.bf16.mxu1 %vm975_vm8, %v3390_v49 }
 0xff0   :  { %5214 = vmatmul.mubr.msk.bf16.vlgmr.msra.gmra.mxu1 %vm975_vm8, %v3391_v50 }
 0xff1   :  { %5226 = vmatpush3.bf16.msra.mxu1 %v6898_v5 }
 0xff2   :  { %5227 = vmatprep.subr.bf16.mxu1 %v7001_v31 }
 0xff5   :  { %5228 = vmatpush3.bf16.msra.mxu1 %v7001_v31 }
 0xff6   :  { %5241 = vmatprep.subr.bf16.mxu1 %v3726_v39 }
 0xffa   :  { %v3294_v3 = vpop.xlane.xlu1 %3293 }
 0xffb   :  { %5736 = vrcp.f32 %v3294_v3 }
 0xffe   :  { %v3288_v11 = vpop.xlane.xlu1 %3287 }
 0xfff   :  { %5738 = vrcp.f32 %v3288_v11 }
0x1000   :  { %v3291_v17 = vpop.xlane.xlu0 %3290 }
0x1001   :  { %5740 = vrcp.f32 %v3291_v17 }
0x1004   :  { %v3303_v59 = vpop.xlane.xlu0 %3302 }
0x1005   :  { %5742 = vrcp.f32 %v3303_v59 }
0x1008   :  { %v3297_v16 = vpop.xlane.xlu0 %3296  ;;  %v5737_v5 = vpop.eup %5736 }
0x1009   :  { %5744 = vrcp.f32 %v3297_v16  ;;  %v3300_v38 = vpop.xlane.xlu1 %3299  ;;  %v3372_v7 = vmul.f32 %v5737_v5, %v7047_v46 }
0x100a   :  { %5746 = vrcp.f32 %v3300_v38 }
0x100b   :  { %v3393_v25 = vpack.c.bf16 %v3372_v7, %v3372_v7 }
0x100c   :  { %v5739_v62 = vpop.eup %5738 }
0x100d   :  { %v3312_v10 = vpop.xlane.xlu1 %3311  ;;  %v3370_v31 = vmul.f32 %v5739_v62, %v7052_v21 }
0x100e   :  { %v5741_v43 = vpop.eup %5740  ;;  %5748 = vrcp.f32 %v3312_v10 }
0x100f   :  { %v3371_v63 = vmul.f32 %v5741_v43, %v7058_v44 }
0x1010   :  { %v3309_v24 = vpop.xlane.xlu0 %3308 }
0x1011   :  { %5750 = vrcp.f32 %v3309_v24  ;;  %v3306_v35 = vpop.xlane.xlu1 %3305  ;;  %v3392_v18 = vpack.c.bf16 %v3371_v63, %v3370_v31 }
0x1012   :  { %5752 = vrcp.f32 %v3306_v35  ;;  %v5743_v53 = vpop.eup %5742 }
0x1013   :  { %5221 = vmatprep.mubr.msk.bf16.mxu0 %vm975_vm8, %v3392_v18  ;;  %v3375_v44 = vmul.f32 %v5743_v53, %v7063_v20 }
0x1014   :  { %5222 = vmatmul.mubr.msk.bf16.vlgmr.msra.gmra.mxu0 %vm975_vm8, %v3393_v25  ;;  %v3841_v40 = vpop.permute.xlu0 %3840 }
0x1015   :  { %5234 = vmatpush3.bf16.msra.mxu0 %v3664_v32  ;;  %v3321_v4 = vpop.xlane.xlu1 %3320  ;;  %v3395_v32 = vpack.c.bf16 %v3375_v44, %v3375_v44  ;;  %v3850_v57 = vand.u32 %v3841_v40, %v6171_v48 }
0x1016   :  { %v5745_v6 = vpop.eup %5744  ;;  %5235 = vmatprep.subr.bf16.mxu0 %v6993_v37 }
0x1017   :  { %v5747_v46 = vpop.eup %5746  ;;  %v3373_v21 = vmul.f32 %v5745_v6, %v7068_v26 }
0x1018   :  { %v3374_v19 = vmul.f32 %v5747_v46, %v7070_v56 }
0x1019   :  { %5236 = vmatpush3.bf16.msra.mxu0 %v6993_v37  ;;  %v3318_v28 = vpop.xlane.xlu1 %3317 }
0x101a   :  { %5249 = vmatprep.subr.bf16.mxu0 %v3788_v41  ;;  %v3394_v27 = vpack.c.bf16 %v3374_v19, %v3373_v21 }
0x101b   :  { %v5749_v12 = vpop.eup %5748 }
0x101c   :  { %5229 = vmatprep.mubr.msk.bf16.mxu1 %vm975_vm8, %v3394_v27  ;;  %v3378_v37 = vmul.f32 %v5749_v12, %v7077_v22 }
0x101d   :  { %5230 = vmatmul.mubr.msk.bf16.vlgmr.msra.gmra.mxu1 %vm975_vm8, %v3395_v32  ;;  %v3330_v45 = vpop.xlane.xlu1 %3329 }
0x101e   :  { %v5751_v26 = vpop.eup %5750  ;;  %5242 = vmatpush3.bf16.msra.mxu1 %v3726_v39  ;;  %v3397_v13 = vpack.c.bf16 %v3378_v37, %v3378_v37 }
0x101f   :  { %v5753_v20 = vpop.eup %5752  ;;  %5243 = vmatprep.subr.bf16.mxu1 %v7155_v54  ;;  %v3377_v47 = vmul.f32 %v5751_v26, %v7083_v51 }
0x1020   :  { %v3376_v56 = vmul.f32 %v5753_v20, %v7085_v36 }
0x1021   :  { %v3324_v0 = vpop.xlane.xlu1 %3323 }
0x1022   :  { %5244 = vmatpush3.bf16.msra.mxu1 %v7155_v54  ;;  %v3396_v33 = vpack.c.bf16 %v3377_v47, %v3376_v56  ;;  %5754 = vrcp.f32 %v3324_v0 }
0x1023   :  { %5257 = vmatprep.subr.bf16.mxu1 %v3850_v57 }
0x1024   :  { %5237 = vmatprep.mubr.msk.bf16.mxu0 %vm975_vm8, %v3396_v33 }
0x1025   :  { %5238 = vmatmul.mubr.msk.bf16.vlgmr.msra.gmra.mxu0 %vm975_vm8, %v3397_v13  ;;  %v3327_v49 = vpop.xlane.xlu1 %3326 }
0x1026   :  { %5250 = vmatpush3.bf16.msra.mxu0 %v3788_v41  ;;  %5756 = vrcp.f32 %v3327_v49 }
0x1027   :  { %5758 = vrcp.f32 %v3330_v45 }
0x1028   :  { %5760 = vrcp.f32 %v3321_v4 }
0x1029   :  { %v3339_v54 = vpop.xlane.xlu1 %3338  ;;  %5762 = vrcp.f32 %v3318_v28 }
0x102f   :  { %v5755_v51 = vpop.eup %5754 }
0x1030   :  { %v3382_v36 = vmul.f32 %v5755_v51, %v7104_v60 }
0x1033   :  { %v5757_v22 = vpop.eup %5756 }
0x1034   :  { %v3383_v48 = vmul.f32 %v5757_v22, %v7108_v30  ;;  %v5759_v39 = vpop.eup %5758 }
0x1035   :  { %v3384_v17 = vmul.f32 %v5759_v39, %v7100_v2  ;;  %v5761_v30 = vpop.eup %5760 }
0x1036   :  { %v3400_v50 = vpack.c.bf16 %v3383_v48, %v3382_v36  ;;  %v5763_v38 = vpop.eup %5762  ;;  %v3381_v2 = vmul.f32 %v5761_v30, %v7092_v58 }
0x1037   :  { %v3401_v60 = vpack.c.bf16 %v3384_v17, %v3384_v17  ;;  %v3380_v10 = vmul.f32 %v5763_v38, %v7096_v61  ;;  %v7238_v17 = vld [vmem:[%s7448_s5 + $0x1] ss:$2 sm:$0xf] }
0x1038   :  { %5253 = vmatprep.mubr.msk.bf16.mxu0 %vm975_vm8, %v3400_v50  ;;  %v3399_v63 = vpack.c.bf16 %v3381_v2, %v3381_v2 }
0x1044   :  { %v3336_v3 = vpop.xlane.xlu1 %3335 }
0x1045   :  { %v3315_v11 = vpop.xlane.xlu0 %3314 }
0x1046   :  { %5764 = vrcp.f32 %v3315_v11 }
0x1047   :  { %5766 = vrcp.f32 %v3336_v3 }
0x1048   :  { %v3777_v59 = vpop.permute.xlu1 %3776 }
0x1049   :  { %v3333_v16 = vpop.xlane.xlu0 %3332  ;;  %5251 = vmatprep.subr.bf16.mxu0 %v3777_v59 }
0x104a   :  { %5768 = vrcp.f32 %v3333_v16  ;;  %5252 = vmatpush3.bf16.msra.mxu0 %v3777_v59 }
0x104b   :  { %5770 = vrcp.f32 %v3339_v54  ;;  %5265 = vmatprep.subr.bf16.mxu0 %v5824_v1 }
0x104c   :  { %v4008_v19 = vpop.permute.xlu1 %4007 }
0x104d   :  { %5254 = vmatmul.mubr.msk.bf16.vlgmr.msra.gmra.mxu0 %vm975_vm8, %v3401_v60  ;;  %v3839_v25 = vpop.permute.xlu0 %3838 }
0x104e   :  { %5269 = vmatprep.mubr.msk.bf16.mxu0 %vm5825_vm0, %v5824_v1  ;;  %5266 = vmatpush3.bf16.msra.mxu0 %v4008_v19 }
0x104f   :  { %5267 = vmatprep.subr.bf16.mxu0 %v5824_v1 }
0x1050   :  { %v4006_v45 = vpop.permute.xlu1 %4005 }
0x1052   :  { %5268 = vmatpush3.bf16.msra.mxu0 %v4006_v45 }
0x1053   :  { %v5765_v5 = vpop.eup %5764  ;;  %5297 = vmatprep.subr.bf16.mxu0 %v5824_v1 }
0x1054   :  { %v3379_v62 = vmul.f32 %v5765_v5, %v7124_v42  ;;  %v5767_v43 = vpop.eup %5766 }
0x1055   :  { %v3386_v18 = vmul.f32 %v5767_v43, %v7127_v14 }
0x1056   :  { %v3398_v7 = vpack.c.bf16 %v3380_v10, %v3379_v62 }
0x1057   :  { %v5769_v31 = vpop.eup %5768 }
0x1058   :  { %v5771_v24 = vpop.eup %5770  ;;  %5245 = vmatprep.mubr.msk.bf16.mxu1 %vm975_vm8, %v3398_v7  ;;  %v3385_v35 = vmul.f32 %v5769_v31, %v7136_v9 }
0x1059   :  { %5246 = vmatmul.mubr.msk.bf16.vlgmr.msra.gmra.mxu1 %vm975_vm8, %v3399_v63  ;;  %v3387_v42 = vmul.f32 %v5771_v24, %v7112_v34 }
0x105a   :  { %5258 = vmatpush3.bf16.msra.mxu1 %v3850_v57  ;;  %v3402_v58 = vpack.c.bf16 %v3386_v18, %v3385_v35 }
0x105b   :  { %5259 = vmatprep.subr.bf16.mxu1 %v3839_v25  ;;  %v3403_v61 = vpack.c.bf16 %v3387_v42, %v3387_v42 }
0x105c   :  { %5261 = vmatprep.mubr.msk.bf16.mxu1 %vm975_vm8, %v3402_v58 }
0x105e   :  { %5260 = vmatpush3.bf16.msra.mxu1 %v3839_v25 }
0x105f   :  { %5281 = vmatprep.subr.bf16.mxu1 %v5824_v1 }
0x1061   :  { %5262 = vmatmul.mubr.msk.bf16.vlgmr.msra.gmra.mxu1 %vm975_vm8, %v3403_v61 }
0x1062   :  { %5285 = vmatprep.mubr.msk.bf16.mxu1 %vm5825_vm0, %v5824_v1 }
0x1079   :  { %v7210_v14 = vpop.f32.mrf.mxu0 }
0x107b   :  { %v7212_v9 = vpop.f32.mrf.mxu0 }
0x107d   :  { %v5208_v53 = vpop.f32.mrf.mxu0 }
0x107f   :  { %v3455_v46 = vpop.f32.mrf.mxu0 }
0x10b0   :  { %v7214_v4 = vpop.f32.mrf.mxu1 }
0x10b2   :  { %v7216_v6 = vpop.f32.mrf.mxu1 }
0x10b4   :  { %v5216_v34 = vpop.f32.mrf.mxu1 }
0x10b6   :  { %v7218_v27 = vpop.f32.mrf.mxu1 }
0x10d4   :  { %v5223_v21 = vpop.f32.mrf.mxu0 }
0x10d6   :  { %v3576_v44 = vpop.f32.mrf.mxu0 }
0x10d8   :  { %v5224_v41 = vpop.f32.mrf.mxu0 }
0x10da   :  { %v3579_v28 = vpop.f32.mrf.mxu0 }
0x10db   :  { %v5476_v32 = vpack.i.bf16 %v3579_v28, %v3576_v44 }
0x10dd   :  { %v7221_v12 = vpop.f32.mrf.mxu1  ;;  %5477 = vrot.lane.b32.xlu0 %v5476_v32, %s5833_s24 }
0x10df   :  { %v3638_v26 = vpop.f32.mrf.mxu1 }
0x10e1   :  { %v5232_v40 = vpop.f32.mrf.mxu1 }
0x10e3   :  { %v3641_v20 = vpop.f32.mrf.mxu1 }
0x10e4   :  { %v5481_v47 = vpack.i.bf16 %v3641_v20, %v3638_v26 }
0x10e5   :  { %v5239_v37 = vpop.f32.mrf.mxu0 }
0x10e6   :  { %5482 = vrot.lane.b32.xlu0 %v5481_v47, %s5833_s24 }
0x10e7   :  { %v3700_v56 = vpop.f32.mrf.mxu0 }
0x10e9   :  { %v5240_v57 = vpop.f32.mrf.mxu0 }
0x10eb   :  { %v3703_v0 = vpop.f32.mrf.mxu0 }
0x10ec   :  { %v5486_v33 = vpack.i.bf16 %v3703_v0, %v3700_v56 }
0x10ee   :  { %5487 = vrot.lane.b32.xlu1 %v5486_v33, %s5834_s25 }
0x110d   :  { %v5255_v13 = vpop.f32.mrf.mxu0 }
0x110f   :  { %v3824_v49 = vpop.f32.mrf.mxu0 }
0x1111   :  { %v5256_v51 = vpop.f32.mrf.mxu0 }
0x1113   :  { %v3827_v22 = vpop.f32.mrf.mxu0 }
0x1114   :  { %v5496_v36 = vpack.i.bf16 %v3827_v22, %v3824_v49 }
0x1116   :  { %5497 = vrot.lane.b32.xlu0 %v5496_v36, %s5835_s26 }
0x1119   :  { %v7228_v48 = vpop.f32.mrf.mxu1 }
0x111a   :  { %3907 = vrot.lane.b32.xlu0 %v5223_v21, %s5833_s24 }
0x111b   :  { %v3762_v50 = vpop.f32.mrf.mxu1 }
0x111d   :  { %v5248_v54 = vpop.f32.mrf.mxu1 }
0x111e   :  { %3919 = vrot.lane.b32.xlu0 %v5239_v37, %s5834_s25 }
0x111f   :  { %v3765_v39 = vpop.f32.mrf.mxu1 }
0x1120   :  { %v5491_v3 = vpack.i.bf16 %v3765_v39, %v3762_v50 }
0x1121   :  { %v7232_v11 = vpop.f32.mrf.mxu1 }
0x1122   :  { %5492 = vrot.lane.b32.xlu1 %v5491_v3, %s5834_s25  ;;  %4081 = vrot.lane.b32.xlu0 %v7238_v17, %s5826_s13 }
0x1123   :  { %v3886_v59 = vpop.f32.mrf.mxu1 }
0x1125   :  { %v5264_v16 = vpop.f32.mrf.mxu1 }
0x1127   :  { %v3889_v60 = vpop.f32.mrf.mxu1 }
0x1128   :  { %v5501_v30 = vpack.i.bf16 %v3889_v60, %v3886_v59 }
0x112a   :  { %5502 = vrot.lane.b32.xlu1 %v5501_v30, %s5835_s26 }
0x112e   :  { %3931 = vrot.lane.b32.xlu1 %v5255_v13, %s5835_s26 }
0x114f   :  { %v5478_v38 = vpop.permute.xlu0 %5477 }
0x1150   :  { %v5480_v62 = vunpack.i.h.bf16 %v5478_v38  ;;  %v5479_v10 = vunpack.i.l.bf16 %v5478_v38 }
0x1152   :  { %v3937_v63 = vsel %vm428_vm5, %v3455_v46, %v5480_v62  ;;  %v3936_v24 = vsel %vm428_vm5, %v7212_v9, %v5479_v10 }
0x1158   :  { %v5483_v2 = vpop.permute.xlu0 %5482 }
0x1159   :  { %v5485_v21 = vunpack.i.h.bf16 %v5483_v2  ;;  %v5484_v9 = vunpack.i.l.bf16 %v5483_v2 }
0x115b   :  { %v3982_v28 = vsel %vm428_vm5, %v7218_v27, %v5485_v21  ;;  %v3981_v32 = vsel %vm428_vm5, %v7216_v6, %v5484_v9 }
0x1160   :  { %v5488_v5 = vpop.permute.xlu1 %5487 }
0x1161   :  { %v5490_v43 = vunpack.i.h.bf16 %v5488_v5  ;;  %v5489_v7 = vunpack.i.l.bf16 %v5488_v5 }
0x1163   :  { %v3940_v25 = vsel %vm1794_vm9, %v3937_v63, %v5490_v43  ;;  %v3939_v58 = vsel %vm1794_vm9, %v3936_v24, %v5489_v7 }
0x1188   :  { %v5498_v31 = vpop.permute.xlu0 %5497 }
0x1189   :  { %v5500_v35 = vunpack.i.h.bf16 %v5498_v31  ;;  %v5499_v18 = vunpack.i.l.bf16 %v5498_v31 }
0x118b   :  { %v3942_v42 = vsel %vm1798_vm10, %v3939_v58, %v5499_v18  ;;  %v3943_v61 = vsel %vm1798_vm10, %v3940_v25, %v5500_v35 }
0x118c   :  { %v4002_v53 = vpack.c.bf16 %v3943_v61, %v3942_v42  ;;  %v3908_v34 = vpop.permute.xlu0 %3907 }
0x118d   :  { %v3938_v37 = vsel %vm428_vm5, %v7210_v14, %v3908_v34 }
0x118e   :  { %5270 = vmatmul.mubr.msk.bf16.vlgmr.msra.gmra.mxu0 %vm161_vm3, %v4002_v53 }
0x118f   :  { %5273 = vmatprep.mubr.msk.bf16.mxu0 %vm5825_vm0, %v5824_v1 }
0x1190   :  { %v3920_v45 = vpop.permute.xlu0 %3919 }
0x1191   :  { %v3941_v27 = vsel %vm1794_vm9, %v3938_v37, %v3920_v45 }
0x1194   :  { %v5493_v46 = vpop.permute.xlu1 %5492  ;;  %v4082_v22 = vpop.permute.xlu0 %4081 }
0x1195   :  { %v5495_v44 = vunpack.i.h.bf16 %v5493_v46  ;;  %v5494_v41 = vunpack.i.l.bf16 %v5493_v46  ;;  %v4083_v36 = vrot.slane %v4082_v22, 1 }
0x1197   :  { %v3985_v20 = vsel %vm1794_vm9, %v3982_v28, %v5495_v44  ;;  %v3984_v47 = vsel %vm1794_vm9, %v3981_v32, %v5494_v41  ;;  %v7277_v50 = vrot.slane %v4083_v36, %v5991_v8 }
0x119c   :  { %v5503_v19 = vpop.permute.xlu1 %5502 }
0x119d   :  { %v5505_v26 = vunpack.i.h.bf16 %v5503_v19  ;;  %v5504_v40 = vunpack.i.l.bf16 %v5503_v19 }
0x119f   :  { %v3987_v56 = vsel %vm1798_vm10, %v3984_v47, %v5504_v40  ;;  %v7264_v57 = vsel %vm1798_vm10, %v3985_v20, %v5505_v26  ;;  %v5528_v20 = vld [vmem:[%s7446_s3 + $0x34] ss:$8 sps:$4 sm:$0xff]   ;;  %v5529_v47 = vld [vmem:[%s7446_s3 + $0x24] ss:$8 sps:$4 sm:$0xff]  }
0x11a0   :  { %v3993_v0 = vrot.slane %v3987_v56, 7  ;;  %v3994_v6 = vrot.slane %v7264_v57, 7  ;;  %v3932_v33 = vpop.permute.xlu1 %3931  ;;  %5282 = vmatpush3.bf16.msra.mxu1 %v5528_v20 }
0x11a1   :  { %v3944_v13 = vsel %vm1798_vm10, %v3941_v27, %v3932_v33  ;;  %5283 = vmatprep.subr.bf16.mxu1 %v5824_v1 }
0x11a2   :  { %v3995_v49 = vsel %vm56_vm2, %v3993_v0, %v3994_v6  ;;  %v4001_v51 = vsel %vm56_vm2, %v3944_v13, %v3993_v0 }
0x11a3   :  { %v4003_v14 = vpack.c.bf16 %v3995_v49, %v4001_v51 }
0x11a4   :  { %5284 = vmatpush3.bf16.msra.mxu1 %v5529_v47 }
0x11a5   :  { %5274 = vmatmul.mubr.msk.bf16.gmra.mxu0 %vm161_vm3, %v4003_v14  ;;  %5325 = vmatprep.subr.bf16.mxu1 %v5824_v1 }
0x11a6   :  { %5277 = vmatprep.mubr.msk.bf16.mxu0 %vm5825_vm0, %v5824_v1 }
0x124e   :  { %v4054_v54 = vpop.f32.mrf.mxu0 }
0x124f   :  { %v4076_v39 = vadd.f32 %v4054_v54, %v6672_v55 }
0x1250   :  { %v5271_v3 = vpop.f32.mrf.mxu0 }
0x1251   :  { %v7281_v59 = vadd.f32 %v7277_v50, %v4076_v39 }
0x1252   :  { %v4057_v16 = vpop.f32.mrf.mxu0 }
0x1253   :  { %v4077_v60 = vadd.f32 %v4057_v16, %v6677_v15  ;;  %v4094_v30 = vsel %vm161_vm3, %v7281_v59, 0.0 }
0x1254   :  { %4095 = vadd.xlane.f32.xlu1 %v4094_v30  ;;  %v5272_v38 = vpop.f32.mrf.mxu0 }
0x1255   :  { %v4090_v5 = vadd.f32 %v7277_v50, %v4077_v60 }
0x1257   :  { %v4097_v2 = vsel %vm161_vm3, %v4090_v5, 0.0 }
0x1258   :  { %4098 = vadd.xlane.f32.xlu0 %v4097_v2 }
0x1265   :  { %v4062_v62 = vpop.f32.mrf.mxu0  ;;  %4159 = vrot.lane.b32.xlu1 %v7238_v17, %s5827_s16  ;;  %s5836_s16 = smov [#allocation2]  }
0x1266   :  { %v4078_v55 = vadd.f32 %v4062_v62, %v6682_v52  ;;  %s4559_s28 = sshll.u32 %s5836_s16, 4  ;;  %s4560_s28 = int_to_ptr.vmem [resolvable:$true] %s4559_s28 }
0x1267   :  { %v5275_v10 = vpop.f32.mrf.mxu0  ;;  %p5807_p1 = scmp.lt.s32.totalorder %s4560_s28, %s4560_s28 }
0x1268   :  { %v7292_v43 = vadd.f32 %v7277_v50, %v4078_v55 }
0x1269   :  { %v4065_v15 = vpop.f32.mrf.mxu0 }
0x126a   :  { %v4079_v7 = vadd.f32 %v4065_v15, %v6687_v29  ;;  %v4100_v31 = vsel %vm161_vm3, %v7292_v43, 0.0 }
0x126b   :  { %4101 = vadd.xlane.f32.xlu0 %v4100_v31  ;;  %v5276_v63 = vpop.f32.mrf.mxu0 }
0x126c   :  { %v4092_v24 = vadd.f32 %v7277_v50, %v4079_v7 }
0x126e   :  { %v4103_v35 = vsel %vm161_vm3, %v4092_v24, 0.0 }
0x126f   :  { %4104 = vadd.xlane.f32.xlu0 %v4103_v35 }
0x12dd   :  { %v4096_v18 = vpop.xlane.xlu1 %4095 }
0x12de   :  { %v4109_v25 = vmul.f32 0.03125, %v4096_v18 }
0x12e0   :  { %v4114_v52 = vsub.f32 %v7281_v59, %v4109_v25 }
0x12e1   :  { %v4099_v58 = vpop.xlane.xlu0 %4098 }
0x12e2   :  { %v4110_v42 = vmul.f32 0.03125, %v4099_v58  ;;  %v4119_v61 = vmul.f32 %v4114_v52, %v4114_v52 }
0x12e4   :  { %v4115_v53 = vsub.f32 %v4090_v5, %v4110_v42  ;;  %v4124_v29 = vsel %vm161_vm3, %v4119_v61, 0.0 }
0x12e5   :  { %4125 = vadd.xlane.f32.xlu1 %v4124_v29 }
0x12e6   :  { %v4120_v34 = vmul.f32 %v4115_v53, %v4115_v53 }
0x12e8   :  { %v4127_v46 = vsel %vm161_vm3, %v4120_v34, 0.0 }
0x12e9   :  { %4128 = vadd.xlane.f32.xlu0 %v4127_v46 }
0x12f4   :  { %v4102_v21 = vpop.xlane.xlu0 %4101 }
0x12f5   :  { %v4111_v9 = vmul.f32 0.03125, %v4102_v21  ;;  %v5530_v21 = vld [vmem:[%s7447_s4 + $0x78] sm:$0xff]  }
0x12f6   :  { %5298 = vmatpush3.bf16.msra.mxu0 %v5530_v21 }
0x12f7   :  { %v7303_v44 = vsub.f32 %v7292_v43, %v4111_v9  ;;  %5299 = vmatprep.subr.bf16.mxu0 %v5824_v1  ;;  %v5531_v9 = vld [vmem:[%s7447_s4 + $0x70] sm:$0xff]  }
0x12f8   :  { %v4105_v41 = vpop.xlane.xlu0 %4104 }
0x12f9   :  { %v4112_v19 = vmul.f32 0.03125, %v4105_v41  ;;  %v4121_v28 = vmul.f32 %v7303_v44, %v7303_v44  ;;  %v5533_v41 = vld [vmem:[%s7447_s4 + $0x60] sm:$0xff]  }
0x12fa   :  { %5300 = vmatpush3.bf16.msra.mxu0 %v5531_v9 }
0x12fb   :  { %v7307_v32 = vsub.f32 %v4092_v24, %v4112_v19  ;;  %v4130_v45 = vsel %vm161_vm3, %v4121_v28, 0.0  ;;  %5301 = vmatprep.subr.bf16.mxu0 %v5824_v1  ;;  %v5534_v19 = vld [vmem:[%s7447_s4 + $0x58] sm:$0xff]   ;;  %v5535_v28 = vld [vmem:[%s7447_s4 + $0x50] sm:$0xff]  }
0x12fc   :  { %4131 = vadd.xlane.f32.xlu1 %v4130_v45  ;;  %v5537_v45 = vld [vmem:[%s7447_s4 + $0x40] sm:$0xff]  }
0x12fd   :  { %v4122_v26 = vmul.f32 %v7307_v32, %v7307_v32 }
0x12ff   :  { %v4133_v40 = vsel %vm161_vm3, %v4122_v26, 0.0  ;;  %v4188_v26 = vrot.slane %v7238_v17, 2 }
0x1300   :  { %4134 = vadd.xlane.f32.xlu0 %v4133_v40 }
0x1301   :  { %v7394_v40 = vrot.slane %v4188_v26, %v5991_v8 }
0x130d   :  { %3952 = vrot.lane.b32.xlu1 %v7221_v12, %s5833_s24  ;;  %v4160_v12 = vpop.permute.xlu1 %4159 }
0x130e   :  { %v4161_v54 = vrot.slane %v4160_v12, 1 }
0x1310   :  { %v7330_v5 = vrot.slane %v4161_v54, %v5991_v8 }
0x1311   :  { %3964 = vrot.lane.b32.xlu1 %v7228_v48, %s5834_s25 }
0x1315   :  { %3976 = vrot.lane.b32.xlu1 %v7232_v11, %s5835_s26 }
0x1316   :  { %4172 = vrot.lane.b32.xlu0 %v7238_v17, %s5832_s22 }
0x136e   :  { %v4126_v37 = vpop.xlane.xlu1 %4125 }
0x136f   :  { %v4139_v48 = vmul.f32 0.03125, %v4126_v37 }
0x1371   :  { %v4144_v0 = vadd.f32 1e-06, %v4139_v48 }
0x1372   :  { %v4129_v56 = vpop.xlane.xlu0 %4128 }
0x1373   :  { %v4140_v27 = vmul.f32 0.03125, %v4129_v56  ;;  %5772 = vrsqrt.f32 %v4144_v0 }
0x1375   :  { %v4145_v33 = vadd.f32 1e-06, %v4140_v27 }
0x1377   :  { %5774 = vrsqrt.f32 %v4145_v33 }
0x1380   :  { %v5773_v51 = vpop.eup %5772 }
0x1381   :  { %v4154_v3 = vmul.f32 %v5773_v51, %v4114_v52 }
0x1383   :  { %v4167_v10 = vmul.f32 %v7330_v5, %v4154_v3 }
0x1384   :  { %v5775_v11 = vpop.eup %5774 }
0x1385   :  { %v4132_v13 = vpop.xlane.xlu1 %4131  ;;  %v4155_v16 = vmul.f32 %v5775_v11, %v4115_v53 }
0x1386   :  { %v4141_v49 = vmul.f32 0.03125, %v4132_v13 }
0x1387   :  { %v4168_v15 = vmul.f32 %v7330_v5, %v4155_v16 }
0x1388   :  { %v4146_v14 = vadd.f32 1e-06, %v4141_v49 }
0x1389   :  { %v3953_v22 = vpop.permute.xlu1 %3952  ;;  %v4135_v36 = vpop.xlane.xlu0 %4134 }
0x138a   :  { %5776 = vrsqrt.f32 %v4146_v14  ;;  %v4142_v39 = vmul.f32 0.03125, %v4135_v36  ;;  %v3983_v62 = vsel %vm428_vm5, %v7214_v4, %v3953_v22 }
0x138c   :  { %v4147_v60 = vadd.f32 1e-06, %v4142_v39 }
0x138d   :  { %v3965_v30 = vpop.permute.xlu1 %3964  ;;  %v4173_v38 = vpop.permute.xlu0 %4172 }
0x138e   :  { %5778 = vrsqrt.f32 %v4147_v60  ;;  %v4174_v2 = vrot.slane %v4173_v38, 1  ;;  %v3986_v7 = vsel %vm1794_vm9, %v3983_v62, %v3965_v30 }
0x1390   :  { %v7335_v55 = vrot.slane %v4174_v2, %v5991_v8 }
0x1391   :  { %v3977_v31 = vpop.permute.xlu1 %3976 }
0x1392   :  { %v3989_v63 = vsel %vm1798_vm10, %v3986_v7, %v3977_v31  ;;  %v4180_v24 = vadd.f32 %v7335_v55, %v4167_v10  ;;  %v4181_v35 = vadd.f32 %v7335_v55, %v4168_v15 }
0x1393   :  { %v3996_v18 = vrot.slane %v3989_v63, 7 }
0x1394   :  { %v4185_v25 = vpack.c.bf16 %v4181_v35, %v4180_v24 }
0x1395   :  { %v3997_v4 = vsel %vm56_vm2, %v3994_v6, %v3996_v18 }
0x1396   :  { %v4004_v52 = vpack.c.bf16 %v3997_v4, %v3997_v4  ;;  %5286 = vmatmul.mubr.msk.bf16.vlgmr.msra.gmra.mxu1 %vm161_vm3, %v4185_v25 }
0x1397   :  { %v5777_v58 = vpop.eup %5776  ;;  %5289 = vmatprep.mubr.msk.bf16.mxu1 %vm5825_vm0, %v5824_v1 }
0x1398   :  { %5278 = vmatmul.mubr.msk.bf16.gmra.mxu0 %vm161_vm3, %v4004_v52  ;;  %v4156_v42 = vmul.f32 %v5777_v58, %v7303_v44  ;;  %v5532_v44 = vld [vmem:[%s7447_s4 + $0x68] sm:$0xff]  }
0x1399   :  { %5313 = vmatprep.mubr.msk.bf16.mxu0 %vm5825_vm0, %v5824_v1  ;;  %5302 = vmatpush3.bf16.msra.mxu0 %v5532_v44 }
0x139a   :  { %v4169_v57 = vmul.f32 %v7330_v5, %v4156_v42  ;;  %5303 = vmatprep.subr.bf16.mxu0 %v5824_v1 }
0x139b   :  { %v5779_v61 = vpop.eup %5778 }
0x139c   :  { %v4157_v53 = vmul.f32 %v5779_v61, %v7307_v32  ;;  %v4182_v29 = vadd.f32 %v7335_v55, %v4169_v57  ;;  %v5536_v32 = vld [vmem:[%s7447_s4 + $0x48] sm:$0xff]  }
0x139d   :  { %5304 = vmatpush3.bf16.msra.mxu0 %v5533_v41 }
0x139e   :  { %v4170_v6 = vmul.f32 %v7330_v5, %v4157_v53  ;;  %5305 = vmatprep.subr.bf16.mxu0 %v5824_v1 }
0x13a0   :  { %v4183_v34 = vadd.f32 %v7335_v55, %v4170_v6 }
0x13a1   :  { %5306 = vmatpush3.bf16.msra.mxu0 %v5534_v19 }
0x13a2   :  { %v4186_v46 = vpack.c.bf16 %v4183_v34, %v4182_v29  ;;  %5307 = vmatprep.subr.bf16.mxu0 %v5824_v1 }
0x13a4   :  { %5290 = vmatmul.mubr.msk.bf16.gmra.mxu1 %vm161_vm3, %v4186_v46 }
0x13a5   :  { %5293 = vmatprep.mubr.msk.bf16.mxu1 %vm5825_vm0, %v5824_v1  ;;  %5308 = vmatpush3.bf16.msra.mxu0 %v5535_v28 }
0x13a6   :  { %5309 = vmatprep.subr.bf16.mxu0 %v5824_v1 }
0x13a9   :  { %5310 = vmatpush3.bf16.msra.mxu0 %v5536_v32 }
0x13aa   :  { %5311 = vmatprep.subr.bf16.mxu0 %v5824_v1 }
0x13ad   :  { %5312 = vmatpush3.bf16.msra.mxu0 %v5537_v45 }
0x1456   :  { %v4245_v20 = vpop.f32.mrf.mxu1 }
0x1457   :  { %v4246_v47 = vadd.f32 %v4245_v20, %v7394_v40 }
0x1458   :  { %v4070_v12 = vpop.f32.mrf.mxu0  ;;  %v5287_v37 = vpop.f32.mrf.mxu1 }
0x1459   :  { %v4272_v56 = vmul.f32 0.044715, %v4246_v47  ;;  %v4080_v48 = vadd.f32 %v4070_v12, %v6692_v23  ;;  %v4267_v57 = vmul.f32 0.5, %v4246_v47 }
0x145a   :  { %v5279_v27 = vpop.f32.mrf.mxu0  ;;  %v4248_v0 = vpop.f32.mrf.mxu1 }
0x145b   :  { %v4277_v33 = vmul.f32 %v4272_v56, %v4246_v47  ;;  %v4093_v13 = vadd.f32 %v7277_v50, %v4080_v48  ;;  %v4249_v49 = vadd.f32 %v4248_v0, %v7394_v40  ;;  %v4435_v27 = vrot.slane %v7238_v17, 3 }
0x145c   :  { %v4073_v51 = vpop.f32.mrf.mxu0  ;;  %v5288_v14 = vpop.f32.mrf.mxu1 }
0x145d   :  { %v4282_v11 = vmul.f32 %v4277_v33, %v4246_v47  ;;  %v4273_v22 = vmul.f32 0.044715, %v4249_v49  ;;  %v4106_v36 = vsel %vm174_vm4, %v4093_v13, 0.0  ;;  %v4268_v6 = vmul.f32 0.5, %v4249_v49 }
0x145e   :  { %4107 = vadd.xlane.f32.xlu0 %v4106_v36  ;;  %v5280_v54 = vpop.f32.mrf.mxu0  ;;  %v4439_v0 = vrot.slane %v4435_v27, %v5991_v8 }
0x145f   :  { %v4287_v39 = vadd.f32 %v4282_v11, %v4246_v47  ;;  %v4278_v3 = vmul.f32 %v4273_v22, %v4249_v49 }
0x1461   :  { %v4292_v16 = vmul.f32 0.7978846, %v4287_v39  ;;  %v4283_v60 = vmul.f32 %v4278_v3, %v4249_v49 }
0x1463   :  { %5780 = vtanh.f32 %v4292_v16  ;;  %v4288_v23 = vadd.f32 %v4283_v60, %v4249_v49 }
0x1464   :  { %v4253_v30 = vpop.f32.mrf.mxu1 }
0x1465   :  { %v4293_v38 = vmul.f32 0.7978846, %v4288_v23  ;;  %v4254_v50 = vadd.f32 %v4253_v30, %v7394_v40 }
0x1466   :  { %v5291_v2 = vpop.f32.mrf.mxu1 }
0x1467   :  { %5782 = vtanh.f32 %v4293_v38  ;;  %v4274_v62 = vmul.f32 0.044715, %v4254_v50  ;;  %v4269_v19 = vmul.f32 0.5, %v4254_v50 }
0x1468   :  { %v4256_v10 = vpop.f32.mrf.mxu1 }
0x1469   :  { %v4279_v15 = vmul.f32 %v4274_v62, %v4254_v50  ;;  %v4257_v7 = vadd.f32 %v4256_v10, %v7394_v40 }
0x146a   :  { %v5292_v31 = vpop.f32.mrf.mxu1 }
0x146b   :  { %v4284_v63 = vmul.f32 %v4279_v15, %v4254_v50  ;;  %v4275_v24 = vmul.f32 0.044715, %v4257_v7  ;;  %v4270_v28 = vmul.f32 0.5, %v4257_v7 }
0x146d   :  { %v4289_v35 = vadd.f32 %v4284_v63, %v4254_v50  ;;  %v4280_v18 = vmul.f32 %v4275_v24, %v4257_v7 }
0x146f   :  { %v4294_v25 = vmul.f32 0.7978846, %v4289_v35  ;;  %v4285_v4 = vmul.f32 %v4280_v18, %v4257_v7 }
0x1470   :  { %v5781_v52 = vpop.eup %5780 }
0x1471   :  { %5784 = vtanh.f32 %v4294_v25  ;;  %v4290_v58 = vadd.f32 %v4285_v4, %v4257_v7  ;;  %v4302_v61 = vadd.f32 1.0, %v5781_v52  ;;  %v5539_v25 = vld [vmem:[%s7450_s7] sm:$0xff]  }
0x1473   :  { %v4295_v42 = vmul.f32 0.7978846, %v4290_v58  ;;  %v4307_v34 = vmul.f32 %v4302_v61, %v4267_v57 }
0x1474   :  { %v5783_v53 = vpop.eup %5782 }
0x1475   :  { %5786 = vtanh.f32 %v4295_v42  ;;  %v4303_v29 = vadd.f32 1.0, %v5783_v53 }
0x1477   :  { %v4308_v46 = vmul.f32 %v4303_v29, %v4268_v6 }
0x1479   :  { %v4329_v21 = vpack.c.bf16 %v4308_v46, %v4307_v34 }
0x147b   :  { %5314 = vmatmul.mubr.bf16.vlgmr.msra.gmra.mxu0 %v4329_v21 }
0x147c   :  { %5317 = vmatprep.mubr.msk.bf16.mxu0 %vm5825_vm0, %v5824_v1 }
0x147e   :  { %v5785_v9 = vpop.eup %5784 }
0x147f   :  { %v4304_v44 = vadd.f32 1.0, %v5785_v9 }
0x1481   :  { %v4309_v45 = vmul.f32 %v4304_v44, %v4269_v19 }
0x1482   :  { %v5787_v41 = vpop.eup %5786 }
0x1483   :  { %v4305_v32 = vadd.f32 1.0, %v5787_v41 }
0x1485   :  { %v4310_v26 = vmul.f32 %v4305_v32, %v4270_v28 }
0x1487   :  { %v4330_v20 = vpack.c.bf16 %v4310_v26, %v4309_v45 }
0x1489   :  { %5318 = vmatmul.mubr.bf16.gmra.mxu0 %v4330_v20 }
0x148a   :  { %5321 = vmatprep.mubr.msk.bf16.mxu0 %vm5825_vm0, %v5824_v1 }
0x14e7   :  { %v4108_v47 = vpop.xlane.xlu0 %4107 }
0x14e8   :  { %v4113_v12 = vmul.f32 0.03125, %v4108_v47  ;;  %v4701_v47 = vld [vmem:[%s7449_s6] ss:$0 sm:$0xff] }
0x14ea   :  { %v4118_v37 = vsub.f32 %v4093_v13, %v4113_v12 }
0x14ec   :  { %v4123_v56 = vmul.f32 %v4118_v37, %v4118_v37 }
0x14ee   :  { %v4136_v48 = vsel %vm174_vm4, %v4123_v56, 0.0 }
0x14ef   :  { %4137 = vadd.xlane.f32.xlu1 %v4136_v48  ;;  %v4702_v48 = vld [vmem:[%s7449_s6 + $0x1] ss:$0 sm:$0xff]  ;;  %s5802_s6 = scalar_lea.vmem %s4560_s28, 32 }
0x14f0   :  { %p5803_p0 = scmp.ne.s32.totalorder %s4560_s28, %s5802_s6  ;;  %p5808_p2 = scmp.lt.s32.totalorder %s5802_s6, %s5802_s6 }
0x14f2   :  { %p5809_p3 = por %p5808_p2, %p5807_p1 }
0x14f4   :  { %p5810_p4 = pnand %p5809_p3, %p5803_p0 }
0x153b   :  { %v4414_v33 = vpop.f32.mrf.mxu0 }
0x153c   :  { %v4433_v49 = vadd.f32 %v4414_v33, %v7281_v59 }
0x153d   :  { %v5315_v51 = vpop.f32.mrf.mxu0 }
0x153e   :  { %v4441_v14 = vadd.f32 %v4439_v0, %v4433_v49 }
0x153f   :  { %v4417_v11 = vpop.f32.mrf.mxu0 }
0x1540   :  { %v4445_v22 = vsel %vm161_vm3, %v4441_v14, 0.0 }
0x1541   :  { %4446 = vadd.xlane.f32.xlu0 %v4445_v22  ;;  %v5316_v36 = vpop.f32.mrf.mxu0 }
0x1549   :  { %v4421_v54 = vpop.f32.mrf.mxu0 }
0x154a   :  { %v4434_v13 = vadd.f32 %v4421_v54, %v7292_v43  ;;  %v4703_v54 = vld [vmem:[%s7451_s8] ss:$0 sm:$0xff] }
0x154b   :  { %v5319_v39 = vpop.f32.mrf.mxu0 }
0x154c   :  { %v4442_v3 = vadd.f32 %v4439_v0, %v4434_v13 }
0x154d   :  { %v4424_v16 = vpop.f32.mrf.mxu0 }
0x154e   :  { %v4448_v17 = vsel %vm161_vm3, %v4442_v3, 0.0 }
0x154f   :  { %4449 = vadd.xlane.f32.xlu0 %v4448_v17  ;;  %v5320_v8 = vpop.f32.mrf.mxu0 }
0x1578   :  { %v4138_v60 = vpop.xlane.xlu1 %4137 }
0x1579   :  { %v4143_v23 = vmul.f32 0.03125, %v4138_v60 }
0x157b   :  { %v4148_v59 = vadd.f32 1e-06, %v4143_v23 }
0x157d   :  { %5788 = vrsqrt.f32 %v4148_v59 }
0x158a   :  { %v5789_v30 = vpop.eup %5788 }
0x158b   :  { %v4158_v38 = vmul.f32 %v5789_v30, %v4118_v37 }
0x158d   :  { %v4171_v50 = vmul.f32 %v7330_v5, %v4158_v38 }
0x158f   :  { %v4184_v2 = vadd.f32 %v7335_v55, %v4171_v50  ;;  %v5538_v55 = vld [vmem:[%s7450_s7 + $0x8] sm:$0xff]  }
0x1590   :  { %5326 = vmatpush3.bf16.msra.mxu1 %v5538_v55 }
0x1591   :  { %v4187_v62 = vpack.c.bf16 %v4184_v2, %v4184_v2  ;;  %5327 = vmatprep.subr.bf16.mxu1 %v5824_v1 }
0x1593   :  { %5294 = vmatmul.mubr.msk.bf16.gmra.mxu1 %vm161_vm3, %v4187_v62 }
0x1594   :  { %5329 = vmatprep.mubr.msk.bf16.mxu1 %vm5825_vm0, %v5824_v1  ;;  %5328 = vmatpush3.bf16.msra.mxu1 %v5539_v25 }
0x15ca   :  { %v4447_v43 = vpop.xlane.xlu0 %4446 }
0x15cb   :  { %v4451_v10 = vmul.f32 0.03125, %v4447_v43 }
0x15cd   :  { %v4453_v15 = vsub.f32 %v4441_v14, %v4451_v10 }
0x15cf   :  { %v4455_v7 = vmul.f32 %v4453_v15, %v4453_v15 }
0x15d1   :  { %v4457_v31 = vsel %vm161_vm3, %v4455_v7, 0.0 }
0x15d2   :  { %4458 = vadd.xlane.f32.xlu0 %v4457_v31 }
0x15d8   :  { %v4450_v63 = vpop.xlane.xlu0 %4449 }
0x15d9   :  { %v4452_v24 = vmul.f32 0.03125, %v4450_v63 }
0x15db   :  { %v4454_v35 = vsub.f32 %v4442_v3, %v4452_v24 }
0x15dd   :  { %v4456_v18 = vmul.f32 %v4454_v35, %v4454_v35 }
0x15df   :  { %v4460_v5 = vsel %vm161_vm3, %v4456_v18, 0.0 }
0x15e0   :  { %4461 = vadd.xlane.f32.xlu1 %v4460_v5 }
0x1653   :  { %v4261_v4 = vpop.f32.mrf.mxu1 }
0x1654   :  { %v4262_v52 = vadd.f32 %v4261_v4, %v7394_v40 }
0x1655   :  { %v5295_v58 = vpop.f32.mrf.mxu1 }
0x1656   :  { %v4276_v42 = vmul.f32 0.044715, %v4262_v52  ;;  %v4271_v28 = vmul.f32 0.5, %v4262_v52 }
0x1657   :  { %v4264_v61 = vpop.f32.mrf.mxu1 }
0x1658   :  { %v4281_v53 = vmul.f32 %v4276_v42, %v4262_v52 }
0x1659   :  { %v5296_v57 = vpop.f32.mrf.mxu1 }
0x165a   :  { %v4286_v6 = vmul.f32 %v4281_v53, %v4262_v52 }
0x165b   :  { %v4459_v34 = vpop.xlane.xlu0 %4458 }
0x165c   :  { %v4291_v29 = vadd.f32 %v4286_v6, %v4262_v52  ;;  %v4463_v21 = vmul.f32 0.03125, %v4459_v34 }
0x165e   :  { %v4296_v46 = vmul.f32 0.7978846, %v4291_v29  ;;  %v4465_v1 = vadd.f32 1e-06, %v4463_v21 }
0x1660   :  { %5790 = vtanh.f32 %v4296_v46 }
0x1661   :  { %5792 = vrsqrt.f32 %v4465_v1 }
0x1669   :  { %v4462_v9 = vpop.xlane.xlu1 %4461 }
0x166a   :  { %v4464_v44 = vmul.f32 0.03125, %v4462_v9 }
0x166c   :  { %v4466_v41 = vadd.f32 1e-06, %v4464_v44 }
0x166d   :  { %v5791_v19 = vpop.eup %5790 }
0x166e   :  { %5794 = vrsqrt.f32 %v4466_v41  ;;  %v4306_v40 = vadd.f32 1.0, %v5791_v19  ;;  %v5793_v26 = vpop.eup %5792 }
0x166f   :  { %v4469_v20 = vmul.f32 %v5793_v26, %v4453_v15 }
0x1670   :  { %v4311_v32 = vmul.f32 %v4306_v40, %v4271_v28 }
0x1671   :  { %v4475_v37 = vmul.f32 %v4701_v47, %v4469_v20 }
0x1672   :  { %v4331_v45 = vpack.c.bf16 %v4311_v32, %v4311_v32 }
0x1673   :  { %v4481_v0 = vadd.f32 %v4702_v48, %v4475_v37 }
0x1674   :  { %5322 = vmatmul.mubr.bf16.gmra.mxu0 %v4331_v45 }
0x167b   :  { %v5795_v12 = vpop.eup %5794 }
0x167c   :  { %v4470_v56 = vmul.f32 %v5795_v12, %v4454_v35 }
0x167e   :  { %v4476_v27 = vmul.f32 %v4701_v47, %v4470_v56 }
0x1680   :  { %v4482_v33 = vadd.f32 %v4702_v48, %v4476_v27 }
0x1682   :  { %v4483_v49 = vsel %vm56_vm2, %v4481_v0, %v4482_v33 }
0x1683   :  { %v4488_v51 = vpack.c.bf16 %v4483_v49, %v4483_v49 }
0x1685   :  { %5330 = vmatmul.mubr.msk.bf16.vlgmr.msra.gmra.mxu1 %vm161_vm3, %v4488_v51 }
0x1734   :  { %v4428_v14 = vpop.f32.mrf.mxu0 }
0x1736   :  { %v5323_v11 = vpop.f32.mrf.mxu0 }
0x1738   :  { %v4430_v22 = vpop.f32.mrf.mxu0 }
0x173a   :  { %v5324_v36 = vpop.f32.mrf.mxu0 }
0x1745   :  { %v4545_v13 = vpop.f32.mrf.mxu1 }
0x1746   :  { %v4546_v39 = vadd.f32 %v4703_v54, %v4545_v13 }
0x1747   :  { %v5331_v3 = vpop.f32.mrf.mxu1 }
0x1748   :  { %4552 = vst.msk [vmem:[#allocation2] sm:$0x3] %vm4551_vm11, %v4546_v39 }
0x1749   :  { %v4548_v16 = vpop.f32.mrf.mxu1 }
0x174a   :  { %5813 = shalt.err (!%p5810_p4)
}
0x174b   :  { %4562 = dma.vmem_to_hbm [thread:$0]  %s4560_s28, 32, %s7452_s9, [#allocation3]   ;;  %v5332_v17 = vpop.f32.mrf.mxu1 }
0x174c   :  { %5822 = dma.done.wait [#allocation3], 32  }
0x174d   :  { %5823 = vsyncadd [#allocation3], 4294967264 }
0x174e   :  { %4566 = vsyncpa [#allocation3], 1 }

</bundles_post_ra>
